<compile_context>
chip_gen: v7x
topology: tpu7x:2x2x1
jax: 0.10.0
libtpu: 0.0.40
codegen_flags: <defaults>
</compile_context>

<pallas_src>
import jax
import jax.numpy as jnp
from jax.experimental import pallas as pl
from jax.experimental.pallas import tpu as pltpu

IN_EPS = 1e-5          # PyTorch InstanceNorm2d default eps
LEAKY_SLOPE = 0.01


# --------------------------------------------------------------------------- fused conv kernel
def fused_conv3x3_in(xp, w_bf16, gamma, beta, *, negative_slope=None,
                     residual=None, cout_tile=128):
    """3x3 stride-1 conv (bias=False) + InstanceNorm2d(affine) [+LeakyReLU] [+residual].

    xp       : (N, H+2, W+2, Cin)  zero-padded NHWC input, float32
    w_bf16   : (3, 3, Cin, Cout)   conv weight, bfloat16 (halves weight DMA)
    gamma    : (Cout,)             InstanceNorm affine scale
    beta     : (Cout,)             InstanceNorm affine shift
    residual : optional (N, H*W, Cout) float32 added after the norm
    returns  : (N, H*W, Cout) float32
    """
    N, Hp, Wp, Cin = xp.shape
    H, W = Hp - 2, Wp - 2
    Cout = w_bf16.shape[3]

    # Channel tile: full channels when small, otherwise 128-multiples.
    if Cout <= cout_tile or Cout % cout_tile != 0:
        tc = Cout
    else:
        tc = cout_tile
    grid = (N, Cout // tc)

    has_res = residual is not None
    g2 = gamma.reshape(1, Cout).astype(jnp.float32)
    b2 = beta.reshape(1, Cout).astype(jnp.float32)

    def kernel(xp_ref, w_ref, g_ref, b_ref, *rest):
        if has_res:
            res_ref, o_ref = rest
        else:
            (o_ref,) = rest

        x = xp_ref[0]                                     # (Hp, Wp, Cin) f32 in VMEM
        acc = jnp.zeros((H * W, tc), jnp.float32)
        # 9-tap shifted-window conv: the padded activation is read from HBM
        # exactly once per (sample, channel tile); im2col is never materialized.
        for di in range(3):
            for dj in range(3):
                win = x[di:di + H, dj:dj + W, :].reshape(H * W, Cin)
                rhs = w_ref[di, dj]                       # (Cin, tc) bf16
                acc = acc + jnp.dot(win.astype(jnp.bfloat16), rhs,
                                    preferred_element_type=jnp.float32)

        # InstanceNorm2d: per-(sample, channel) stats over H*W, biased variance.
        mean = jnp.mean(acc, axis=0, keepdims=True)       # (1, tc)
        cen = acc - mean
        var = jnp.mean(cen * cen, axis=0, keepdims=True)
        y = cen * jax.lax.rsqrt(var + IN_EPS)
        y = y * g_ref[...] + b_ref[...]                   # affine

        if negative_slope is not None:                    # LeakyReLU(0.01)
            y = jnp.where(y >= 0.0, y, negative_slope * y)
        if has_res:                                       # x + main(x)
            y = y + res_ref[0]
        o_ref[0] = y

    in_specs = [
        pl.BlockSpec((1, Hp, Wp, Cin), lambda n, c: (n, 0, 0, 0)),
        pl.BlockSpec((3, 3, Cin, tc), lambda n, c: (0, 0, 0, c)),
        pl.BlockSpec((1, tc), lambda n, c: (0, c)),
        pl.BlockSpec((1, tc), lambda n, c: (0, c)),
    ]
    inputs = [xp.astype(jnp.float32), w_bf16.astype(jnp.bfloat16), g2, b2]
    if has_res:
        in_specs.append(pl.BlockSpec((1, H * W, tc), lambda n, c: (n, 0, c)))
        inputs.append(residual.astype(jnp.float32))

    out = pl.pallas_call(
        kernel,
        out_shape=jax.ShapeDtypeStruct((N, H * W, Cout), jnp.float32),
        grid=grid,
        in_specs=in_specs,
        out_specs=pl.BlockSpec((1, H * W, tc), lambda n, c: (n, 0, c)),
        compiler_params=pltpu.CompilerParams(
            dimension_semantics=("parallel", "parallel")),
    )(*inputs)
    return out


# --------------------------------------------------------------------------- forward
def residual_block_forward(x_nchw, params):
    """x_nchw: (N, C, H, W) float32 -> (N, C, H, W) float32."""
    x = jnp.transpose(x_nchw, (0, 2, 3, 1)).astype(jnp.float32)   # NHWC
    N, H, W, C = x.shape

    # conv1 + InstanceNorm + LeakyReLU (fused)
    xp = jnp.pad(x, ((0, 0), (1, 1), (1, 1), (0, 0)))
    h = fused_conv3x3_in(xp, params["w1"], params["g1"], params["b1"],
                         negative_slope=LEAKY_SLOPE)              # (N, H*W, C)

    # TODO(synk): nn.Dropout() (train-mode stochastic masking) intentionally
    #             skipped — eval/inference identity.

    # conv2 + InstanceNorm + residual add (fused)
    hp = jnp.pad(h.reshape(N, H, W, C), ((0, 0), (1, 1), (1, 1), (0, 0)))
    y = fused_conv3x3_in(hp, params["w2"], params["g2"], params["b2"],
                         negative_slope=None,
                         residual=x.reshape(N, H * W, C))         # (N, H*W, C)

    return jnp.transpose(y.reshape(N, H, W, C), (0, 3, 1, 2))     # back to NCHW


# --------------------------------------------------------------------------- parameters
def init_params(key, channels):
    k1, k2, k3, k4, k5, k6, k7, k8 = jax.random.split(key, 8)

    def conv_w(k, cin, cout):
        # PyTorch layout (Cout, Cin, 3, 3) -> (kh, kw, Cin, Cout), bf16 for the MXU.
        fan = cin * 9
        w = jax.random.normal(k, (cout, cin, 3, 3), jnp.float32) / jnp.sqrt(fan)
        return jnp.transpose(w, (2, 3, 1, 0)).astype(jnp.bfloat16)

    return {
        "w1": conv_w(k1, channels, channels),
        "g1": 1.0 + 0.1 * jax.random.normal(k2, (channels,), jnp.float32),
        "b1": 0.1 * jax.random.normal(k3, (channels,), jnp.float32),
        "w2": conv_w(k4, channels, channels),
        "g2": 1.0 + 0.1 * jax.random.normal(k5, (channels,), jnp.float32),
        "b2": 0.1 * jax.random.normal(k6, (channels,), jnp.float32),
    }


# --------------------------------------------------------------------------- main
if __name__ == "__main__":
    key = jax.random.PRNGKey(0)
    kp, kx = jax.random.split(key)

    N, C, H, W = 2, 32, 16, 16          # ResidualBlock requires dim_in == dim_out
    params = init_params(kp, C)
    x = jax.random.normal(kx, (N, C, H, W), jnp.float32)

    fwd = jax.jit(residual_block_forward)
    out = jax.block_until_ready(fwd(x, params))

    assert out.shape == (N, C, H, W), out.shape
    assert bool(jnp.all(jnp.isfinite(out)))
    print("KERNEL_OK")
</pallas_src>

<mosaic_0001>
module attributes {stable_mosaic.version = 11 : i64} {
  func.func @kernel(%arg0: i32, %arg1: i32, %arg2: memref<1x18x18x32xf32, #tpu.memory_space<vmem>>, %arg3: memref<3x3x32x32xbf16, #tpu.memory_space<vmem>>, %arg4: memref<1x32xf32, #tpu.memory_space<vmem>>, %arg5: memref<1x32xf32, #tpu.memory_space<vmem>>, %arg6: memref<1x256x32xf32, #tpu.memory_space<vmem>>, %arg7: memref<1x256x32xf32, #tpu.memory_space<vmem>>) attributes {dimension_semantics = [#tpu.dimension_semantics<parallel>, #tpu.dimension_semantics<parallel>], iteration_bounds = array<i64: 2, 1>, scalar_prefetch = 0 : i64, scratch_operands = 0 : i64, tpu.core_type = #tpu.core_type<tc>, window_params = [{transform_indices = @transform_0, window_bounds = array<i64: 1, 18, 18, 32>}, {transform_indices = @transform_1, window_bounds = array<i64: 3, 3, 32, 32>}, {transform_indices = @transform_2, window_bounds = array<i64: 1, 32>}, {transform_indices = @transform_3, window_bounds = array<i64: 1, 32>}, {transform_indices = @transform_4, window_bounds = array<i64: 1, 256, 32>}, {transform_indices = @transform_5, window_bounds = array<i64: 1, 256, 32>}]} {
    %c0 = arith.constant 0 : index
    %c0_0 = arith.constant 0 : index
    %c0_1 = arith.constant 0 : index
    %c0_2 = arith.constant 0 : index
    %0 = vector.load %arg2[%c0, %c0_0, %c0_1, %c0_2] : memref<1x18x18x32xf32, #tpu.memory_space<vmem>>, vector<1x18x18x32xf32>
    %1 = vector.shape_cast %0 : vector<1x18x18x32xf32> to vector<18x18x32xf32>
    %cst = arith.constant 0.000000e+00 : f32
    %2 = vector.broadcast %cst : f32 to vector<256x32xf32>
    %3 = vector.extract_strided_slice %1 {offsets = [0, 0, 0], sizes = [16, 16, 32], strides = [1, 1, 1]} : vector<18x18x32xf32> to vector<16x16x32xf32>
    %4 = vector.shape_cast %3 : vector<16x16x32xf32> to vector<256x32xf32>
    %c0_3 = arith.constant 0 : index
    %c0_4 = arith.constant 0 : index
    %c0_5 = arith.constant 0 : index
    %c0_6 = arith.constant 0 : index
    %5 = vector.load %arg3[%c0_3, %c0_4, %c0_5, %c0_6] : memref<3x3x32x32xbf16, #tpu.memory_space<vmem>>, vector<1x1x32x32xbf16>
    %6 = vector.shape_cast %5 : vector<1x1x32x32xbf16> to vector<32x32xbf16>
    %7 = arith.truncf %4 : vector<256x32xf32> to vector<256x32xbf16>
    %cst_7 = arith.constant dense<0.000000e+00> : vector<256x32xf32>
    %8 = tpu.matmul %7, %6, %cst_7 {dimension_numbers = #tpu.dot_dimension_numbers<[1], [0], [0], [1], [0, 0, 1, 1], [], []>} : vector<256x32xbf16>, vector<32x32xbf16>, vector<256x32xf32> -> vector<256x32xf32>
    %9 = arith.addf %2, %8 : vector<256x32xf32>
    %10 = vector.extract_strided_slice %1 {offsets = [0, 1, 0], sizes = [16, 16, 32], strides = [1, 1, 1]} : vector<18x18x32xf32> to vector<16x16x32xf32>
    %11 = vector.shape_cast %10 : vector<16x16x32xf32> to vector<256x32xf32>
    %c0_8 = arith.constant 0 : index
    %c1 = arith.constant 1 : index
    %c0_9 = arith.constant 0 : index
    %c0_10 = arith.constant 0 : index
    %12 = vector.load %arg3[%c0_8, %c1, %c0_9, %c0_10] : memref<3x3x32x32xbf16, #tpu.memory_space<vmem>>, vector<1x1x32x32xbf16>
    %13 = vector.shape_cast %12 : vector<1x1x32x32xbf16> to vector<32x32xbf16>
    %14 = arith.truncf %11 : vector<256x32xf32> to vector<256x32xbf16>
    %cst_11 = arith.constant dense<0.000000e+00> : vector<256x32xf32>
    %15 = tpu.matmul %14, %13, %cst_11 {dimension_numbers = #tpu.dot_dimension_numbers<[1], [0], [0], [1], [0, 0, 1, 1], [], []>} : vector<256x32xbf16>, vector<32x32xbf16>, vector<256x32xf32> -> vector<256x32xf32>
    %16 = arith.addf %9, %15 : vector<256x32xf32>
    %17 = vector.extract_strided_slice %1 {offsets = [0, 2, 0], sizes = [16, 16, 32], strides = [1, 1, 1]} : vector<18x18x32xf32> to vector<16x16x32xf32>
    %18 = vector.shape_cast %17 : vector<16x16x32xf32> to vector<256x32xf32>
    %c0_12 = arith.constant 0 : index
    %c2 = arith.constant 2 : index
    %c0_13 = arith.constant 0 : index
    %c0_14 = arith.constant 0 : index
    %19 = vector.load %arg3[%c0_12, %c2, %c0_13, %c0_14] : memref<3x3x32x32xbf16, #tpu.memory_space<vmem>>, vector<1x1x32x32xbf16>
    %20 = vector.shape_cast %19 : vector<1x1x32x32xbf16> to vector<32x32xbf16>
    %21 = arith.truncf %18 : vector<256x32xf32> to vector<256x32xbf16>
    %cst_15 = arith.constant dense<0.000000e+00> : vector<256x32xf32>
    %22 = tpu.matmul %21, %20, %cst_15 {dimension_numbers = #tpu.dot_dimension_numbers<[1], [0], [0], [1], [0, 0, 1, 1], [], []>} : vector<256x32xbf16>, vector<32x32xbf16>, vector<256x32xf32> -> vector<256x32xf32>
    %23 = arith.addf %16, %22 : vector<256x32xf32>
    %24 = vector.extract_strided_slice %1 {offsets = [1, 0, 0], sizes = [16, 16, 32], strides = [1, 1, 1]} : vector<18x18x32xf32> to vector<16x16x32xf32>
    %25 = vector.shape_cast %24 : vector<16x16x32xf32> to vector<256x32xf32>
    %c1_16 = arith.constant 1 : index
    %c0_17 = arith.constant 0 : index
    %c0_18 = arith.constant 0 : index
    %c0_19 = arith.constant 0 : index
    %26 = vector.load %arg3[%c1_16, %c0_17, %c0_18, %c0_19] : memref<3x3x32x32xbf16, #tpu.memory_space<vmem>>, vector<1x1x32x32xbf16>
    %27 = vector.shape_cast %26 : vector<1x1x32x32xbf16> to vector<32x32xbf16>
    %28 = arith.truncf %25 : vector<256x32xf32> to vector<256x32xbf16>
    %cst_20 = arith.constant dense<0.000000e+00> : vector<256x32xf32>
    %29 = tpu.matmul %28, %27, %cst_20 {dimension_numbers = #tpu.dot_dimension_numbers<[1], [0], [0], [1], [0, 0, 1, 1], [], []>} : vector<256x32xbf16>, vector<32x32xbf16>, vector<256x32xf32> -> vector<256x32xf32>
    %30 = arith.addf %23, %29 : vector<256x32xf32>
    %31 = vector.extract_strided_slice %1 {offsets = [1, 1, 0], sizes = [16, 16, 32], strides = [1, 1, 1]} : vector<18x18x32xf32> to vector<16x16x32xf32>
    %32 = vector.shape_cast %31 : vector<16x16x32xf32> to vector<256x32xf32>
    %c1_21 = arith.constant 1 : index
    %c1_22 = arith.constant 1 : index
    %c0_23 = arith.constant 0 : index
    %c0_24 = arith.constant 0 : index
    %33 = vector.load %arg3[%c1_21, %c1_22, %c0_23, %c0_24] : memref<3x3x32x32xbf16, #tpu.memory_space<vmem>>, vector<1x1x32x32xbf16>
    %34 = vector.shape_cast %33 : vector<1x1x32x32xbf16> to vector<32x32xbf16>
    %35 = arith.truncf %32 : vector<256x32xf32> to vector<256x32xbf16>
    %cst_25 = arith.constant dense<0.000000e+00> : vector<256x32xf32>
    %36 = tpu.matmul %35, %34, %cst_25 {dimension_numbers = #tpu.dot_dimension_numbers<[1], [0], [0], [1], [0, 0, 1, 1], [], []>} : vector<256x32xbf16>, vector<32x32xbf16>, vector<256x32xf32> -> vector<256x32xf32>
    %37 = arith.addf %30, %36 : vector<256x32xf32>
    %38 = vector.extract_strided_slice %1 {offsets = [1, 2, 0], sizes = [16, 16, 32], strides = [1, 1, 1]} : vector<18x18x32xf32> to vector<16x16x32xf32>
    %39 = vector.shape_cast %38 : vector<16x16x32xf32> to vector<256x32xf32>
    %c1_26 = arith.constant 1 : index
    %c2_27 = arith.constant 2 : index
    %c0_28 = arith.constant 0 : index
    %c0_29 = arith.constant 0 : index
    %40 = vector.load %arg3[%c1_26, %c2_27, %c0_28, %c0_29] : memref<3x3x32x32xbf16, #tpu.memory_space<vmem>>, vector<1x1x32x32xbf16>
    %41 = vector.shape_cast %40 : vector<1x1x32x32xbf16> to vector<32x32xbf16>
    %42 = arith.truncf %39 : vector<256x32xf32> to vector<256x32xbf16>
    %cst_30 = arith.constant dense<0.000000e+00> : vector<256x32xf32>
    %43 = tpu.matmul %42, %41, %cst_30 {dimension_numbers = #tpu.dot_dimension_numbers<[1], [0], [0], [1], [0, 0, 1, 1], [], []>} : vector<256x32xbf16>, vector<32x32xbf16>, vector<256x32xf32> -> vector<256x32xf32>
    %44 = arith.addf %37, %43 : vector<256x32xf32>
    %45 = vector.extract_strided_slice %1 {offsets = [2, 0, 0], sizes = [16, 16, 32], strides = [1, 1, 1]} : vector<18x18x32xf32> to vector<16x16x32xf32>
    %46 = vector.shape_cast %45 : vector<16x16x32xf32> to vector<256x32xf32>
    %c2_31 = arith.constant 2 : index
    %c0_32 = arith.constant 0 : index
    %c0_33 = arith.constant 0 : index
    %c0_34 = arith.constant 0 : index
    %47 = vector.load %arg3[%c2_31, %c0_32, %c0_33, %c0_34] : memref<3x3x32x32xbf16, #tpu.memory_space<vmem>>, vector<1x1x32x32xbf16>
    %48 = vector.shape_cast %47 : vector<1x1x32x32xbf16> to vector<32x32xbf16>
    %49 = arith.truncf %46 : vector<256x32xf32> to vector<256x32xbf16>
    %cst_35 = arith.constant dense<0.000000e+00> : vector<256x32xf32>
    %50 = tpu.matmul %49, %48, %cst_35 {dimension_numbers = #tpu.dot_dimension_numbers<[1], [0], [0], [1], [0, 0, 1, 1], [], []>} : vector<256x32xbf16>, vector<32x32xbf16>, vector<256x32xf32> -> vector<256x32xf32>
    %51 = arith.addf %44, %50 : vector<256x32xf32>
    %52 = vector.extract_strided_slice %1 {offsets = [2, 1, 0], sizes = [16, 16, 32], strides = [1, 1, 1]} : vector<18x18x32xf32> to vector<16x16x32xf32>
    %53 = vector.shape_cast %52 : vector<16x16x32xf32> to vector<256x32xf32>
    %c2_36 = arith.constant 2 : index
    %c1_37 = arith.constant 1 : index
    %c0_38 = arith.constant 0 : index
    %c0_39 = arith.constant 0 : index
    %54 = vector.load %arg3[%c2_36, %c1_37, %c0_38, %c0_39] : memref<3x3x32x32xbf16, #tpu.memory_space<vmem>>, vector<1x1x32x32xbf16>
    %55 = vector.shape_cast %54 : vector<1x1x32x32xbf16> to vector<32x32xbf16>
    %56 = arith.truncf %53 : vector<256x32xf32> to vector<256x32xbf16>
    %cst_40 = arith.constant dense<0.000000e+00> : vector<256x32xf32>
    %57 = tpu.matmul %56, %55, %cst_40 {dimension_numbers = #tpu.dot_dimension_numbers<[1], [0], [0], [1], [0, 0, 1, 1], [], []>} : vector<256x32xbf16>, vector<32x32xbf16>, vector<256x32xf32> -> vector<256x32xf32>
    %58 = arith.addf %51, %57 : vector<256x32xf32>
    %59 = vector.extract_strided_slice %1 {offsets = [2, 2, 0], sizes = [16, 16, 32], strides = [1, 1, 1]} : vector<18x18x32xf32> to vector<16x16x32xf32>
    %60 = vector.shape_cast %59 : vector<16x16x32xf32> to vector<256x32xf32>
    %c2_41 = arith.constant 2 : index
    %c2_42 = arith.constant 2 : index
    %c0_43 = arith.constant 0 : index
    %c0_44 = arith.constant 0 : index
    %61 = vector.load %arg3[%c2_41, %c2_42, %c0_43, %c0_44] : memref<3x3x32x32xbf16, #tpu.memory_space<vmem>>, vector<1x1x32x32xbf16>
    %62 = vector.shape_cast %61 : vector<1x1x32x32xbf16> to vector<32x32xbf16>
    %63 = arith.truncf %60 : vector<256x32xf32> to vector<256x32xbf16>
    %cst_45 = arith.constant dense<0.000000e+00> : vector<256x32xf32>
    %64 = tpu.matmul %63, %62, %cst_45 {dimension_numbers = #tpu.dot_dimension_numbers<[1], [0], [0], [1], [0, 0, 1, 1], [], []>} : vector<256x32xbf16>, vector<32x32xbf16>, vector<256x32xf32> -> vector<256x32xf32>
    %65 = arith.addf %58, %64 : vector<256x32xf32>
    %cst_46 = arith.constant dense<0.000000e+00> : vector<32xf32>
    %66 = vector.multi_reduction <add>, %65, %cst_46 [0] : vector<256x32xf32> to vector<32xf32>
    %67 = vector.shape_cast %66 : vector<32xf32> to vector<1x32xf32>
    %cst_47 = arith.constant 2.560000e+02 : f32
    %68 = vector.broadcast %cst_47 : f32 to vector<1x32xf32>
    %69 = arith.divf %67, %68 : vector<1x32xf32>
    %70 = vector.broadcast %69 : vector<1x32xf32> to vector<256x32xf32>
    %71 = arith.subf %65, %70 : vector<256x32xf32>
    %72 = arith.mulf %71, %71 : vector<256x32xf32>
    %cst_48 = arith.constant dense<0.000000e+00> : vector<32xf32>
    %73 = vector.multi_reduction <add>, %72, %cst_48 [0] : vector<256x32xf32> to vector<32xf32>
    %74 = vector.shape_cast %73 : vector<32xf32> to vector<1x32xf32>
    %cst_49 = arith.constant 2.560000e+02 : f32
    %75 = vector.broadcast %cst_49 : f32 to vector<1x32xf32>
    %76 = arith.divf %74, %75 : vector<1x32xf32>
    %cst_50 = arith.constant 9.99999974E-6 : f32
    %77 = vector.broadcast %cst_50 : f32 to vector<1x32xf32>
    %78 = arith.addf %76, %77 : vector<1x32xf32>
    %79 = math.rsqrt %78 : vector<1x32xf32>
    %80 = vector.broadcast %79 : vector<1x32xf32> to vector<256x32xf32>
    %81 = arith.mulf %71, %80 : vector<256x32xf32>
    %c0_51 = arith.constant 0 : index
    %c0_52 = arith.constant 0 : index
    %82 = vector.load %arg4[%c0_51, %c0_52] : memref<1x32xf32, #tpu.memory_space<vmem>>, vector<1x32xf32>
    %83 = vector.broadcast %82 : vector<1x32xf32> to vector<256x32xf32>
    %84 = arith.mulf %81, %83 : vector<256x32xf32>
    %c0_53 = arith.constant 0 : index
    %c0_54 = arith.constant 0 : index
    %85 = vector.load %arg5[%c0_53, %c0_54] : memref<1x32xf32, #tpu.memory_space<vmem>>, vector<1x32xf32>
    %86 = vector.broadcast %85 : vector<1x32xf32> to vector<256x32xf32>
    %87 = arith.addf %84, %86 : vector<256x32xf32>
    %c0_55 = arith.constant 0 : index
    %c0_56 = arith.constant 0 : index
    %c0_57 = arith.constant 0 : index
    %88 = vector.load %arg6[%c0_55, %c0_56, %c0_57] : memref<1x256x32xf32, #tpu.memory_space<vmem>>, vector<1x256x32xf32>
    %89 = vector.shape_cast %88 : vector<1x256x32xf32> to vector<256x32xf32>
    %90 = arith.addf %87, %89 : vector<256x32xf32>
    %c0_58 = arith.constant 0 : index
    %c0_59 = arith.constant 0 : index
    %c0_60 = arith.constant 0 : index
    %91 = vector.load %arg7[%c0_58, %c0_59, %c0_60] : memref<1x256x32xf32, #tpu.memory_space<vmem>>, vector<1x256x32xf32>
    %92 = vector.shape_cast %91 : vector<1x256x32xf32> to vector<256x32xf32>
    %93 = vector.shape_cast %90 : vector<256x32xf32> to vector<1x256x32xf32>
    tpu.vector_store %arg7[%c0_58, %c0_59, %c0_60], %93 {strides = array<i32>} : memref<1x256x32xf32, #tpu.memory_space<vmem>>, vector<1x256x32xf32>,
    return
  }
  func.func @transform_0(%arg0: i32, %arg1: i32) -> (i32, i32, i32, i32) {
    %c0_i32 = arith.constant 0 : i32
    %c0_i32_0 = arith.constant 0 : i32
    %c0_i32_1 = arith.constant 0 : i32
    %c0_i32_2 = arith.constant 0 : i32
    return %arg0, %c0_i32, %c0_i32_0, %c0_i32_1 : i32, i32, i32, i32
  }
  func.func @transform_1(%arg0: i32, %arg1: i32) -> (i32, i32, i32, i32) {
    %c0_i32 = arith.constant 0 : i32
    %c0_i32_0 = arith.constant 0 : i32
    %c0_i32_1 = arith.constant 0 : i32
    %c0_i32_2 = arith.constant 0 : i32
    return %c0_i32, %c0_i32_0, %c0_i32_1, %arg1 : i32, i32, i32, i32
  }
  func.func @transform_2(%arg0: i32, %arg1: i32) -> (i32, i32) {
    %c0_i32 = arith.constant 0 : i32
    %c0_i32_0 = arith.constant 0 : i32
    return %c0_i32, %arg1 : i32, i32
  }
  func.func @transform_3(%arg0: i32, %arg1: i32) -> (i32, i32) {
    %c0_i32 = arith.constant 0 : i32
    %c0_i32_0 = arith.constant 0 : i32
    return %c0_i32, %arg1 : i32, i32
  }
  func.func @transform_4(%arg0: i32, %arg1: i32) -> (i32, i32, i32) {
    %c0_i32 = arith.constant 0 : i32
    %c0_i32_0 = arith.constant 0 : i32
    return %arg0, %c0_i32, %arg1 : i32, i32, i32
  }
  func.func @transform_5(%arg0: i32, %arg1: i32) -> (i32, i32, i32) {
    %c0_i32 = arith.constant 0 : i32
    %c0_i32_0 = arith.constant 0 : i32
    return %arg0, %c0_i32, %arg1 : i32, i32, i32
  }
}

module attributes {stable_mosaic.version = 11 : i64} {
  func.func @kernel(%arg0: i32, %arg1: i32, %arg2: memref<1x18x18x32xf32, #tpu.memory_space<vmem>>, %arg3: memref<3x3x32x32xbf16, #tpu.memory_space<vmem>>, %arg4: memref<1x32xf32, #tpu.memory_space<vmem>>, %arg5: memref<1x32xf32, #tpu.memory_space<vmem>>, %arg6: memref<1x256x32xf32, #tpu.memory_space<vmem>>) attributes {dimension_semantics = [#tpu.dimension_semantics<parallel>, #tpu.dimension_semantics<parallel>], iteration_bounds = array<i64: 2, 1>, scalar_prefetch = 0 : i64, scratch_operands = 0 : i64, tpu.core_type = #tpu.core_type<tc>, window_params = [{transform_indices = @transform_0, window_bounds = array<i64: 1, 18, 18, 32>}, {transform_indices = @transform_1, window_bounds = array<i64: 3, 3, 32, 32>}, {transform_indices = @transform_2, window_bounds = array<i64: 1, 32>}, {transform_indices = @transform_3, window_bounds = array<i64: 1, 32>}, {transform_indices = @transform_4, window_bounds = array<i64: 1, 256, 32>}]} {
    %c0 = arith.constant 0 : index
    %c0_0 = arith.constant 0 : index
    %c0_1 = arith.constant 0 : index
    %c0_2 = arith.constant 0 : index
    %0 = vector.load %arg2[%c0, %c0_0, %c0_1, %c0_2] : memref<1x18x18x32xf32, #tpu.memory_space<vmem>>, vector<1x18x18x32xf32>
    %1 = vector.shape_cast %0 : vector<1x18x18x32xf32> to vector<18x18x32xf32>
    %cst = arith.constant 0.000000e+00 : f32
    %2 = vector.broadcast %cst : f32 to vector<256x32xf32>
    %3 = vector.extract_strided_slice %1 {offsets = [0, 0, 0], sizes = [16, 16, 32], strides = [1, 1, 1]} : vector<18x18x32xf32> to vector<16x16x32xf32>
    %4 = vector.shape_cast %3 : vector<16x16x32xf32> to vector<256x32xf32>
    %c0_3 = arith.constant 0 : index
    %c0_4 = arith.constant 0 : index
    %c0_5 = arith.constant 0 : index
    %c0_6 = arith.constant 0 : index
    %5 = vector.load %arg3[%c0_3, %c0_4, %c0_5, %c0_6] : memref<3x3x32x32xbf16, #tpu.memory_space<vmem>>, vector<1x1x32x32xbf16>
    %6 = vector.shape_cast %5 : vector<1x1x32x32xbf16> to vector<32x32xbf16>
    %7 = arith.truncf %4 : vector<256x32xf32> to vector<256x32xbf16>
    %cst_7 = arith.constant dense<0.000000e+00> : vector<256x32xf32>
    %8 = tpu.matmul %7, %6, %cst_7 {dimension_numbers = #tpu.dot_dimension_numbers<[1], [0], [0], [1], [0, 0, 1, 1], [], []>} : vector<256x32xbf16>, vector<32x32xbf16>, vector<256x32xf32> -> vector<256x32xf32>
    %9 = arith.addf %2, %8 : vector<256x32xf32>
    %10 = vector.extract_strided_slice %1 {offsets = [0, 1, 0], sizes = [16, 16, 32], strides = [1, 1, 1]} : vector<18x18x32xf32> to vector<16x16x32xf32>
    %11 = vector.shape_cast %10 : vector<16x16x32xf32> to vector<256x32xf32>
    %c0_8 = arith.constant 0 : index
    %c1 = arith.constant 1 : index
    %c0_9 = arith.constant 0 : index
    %c0_10 = arith.constant 0 : index
    %12 = vector.load %arg3[%c0_8, %c1, %c0_9, %c0_10] : memref<3x3x32x32xbf16, #tpu.memory_space<vmem>>, vector<1x1x32x32xbf16>
    %13 = vector.shape_cast %12 : vector<1x1x32x32xbf16> to vector<32x32xbf16>
    %14 = arith.truncf %11 : vector<256x32xf32> to vector<256x32xbf16>
    %cst_11 = arith.constant dense<0.000000e+00> : vector<256x32xf32>
    %15 = tpu.matmul %14, %13, %cst_11 {dimension_numbers = #tpu.dot_dimension_numbers<[1], [0], [0], [1], [0, 0, 1, 1], [], []>} : vector<256x32xbf16>, vector<32x32xbf16>, vector<256x32xf32> -> vector<256x32xf32>
    %16 = arith.addf %9, %15 : vector<256x32xf32>
    %17 = vector.extract_strided_slice %1 {offsets = [0, 2, 0], sizes = [16, 16, 32], strides = [1, 1, 1]} : vector<18x18x32xf32> to vector<16x16x32xf32>
    %18 = vector.shape_cast %17 : vector<16x16x32xf32> to vector<256x32xf32>
    %c0_12 = arith.constant 0 : index
    %c2 = arith.constant 2 : index
    %c0_13 = arith.constant 0 : index
    %c0_14 = arith.constant 0 : index
    %19 = vector.load %arg3[%c0_12, %c2, %c0_13, %c0_14] : memref<3x3x32x32xbf16, #tpu.memory_space<vmem>>, vector<1x1x32x32xbf16>
    %20 = vector.shape_cast %19 : vector<1x1x32x32xbf16> to vector<32x32xbf16>
    %21 = arith.truncf %18 : vector<256x32xf32> to vector<256x32xbf16>
    %cst_15 = arith.constant dense<0.000000e+00> : vector<256x32xf32>
    %22 = tpu.matmul %21, %20, %cst_15 {dimension_numbers = #tpu.dot_dimension_numbers<[1], [0], [0], [1], [0, 0, 1, 1], [], []>} : vector<256x32xbf16>, vector<32x32xbf16>, vector<256x32xf32> -> vector<256x32xf32>
    %23 = arith.addf %16, %22 : vector<256x32xf32>
    %24 = vector.extract_strided_slice %1 {offsets = [1, 0, 0], sizes = [16, 16, 32], strides = [1, 1, 1]} : vector<18x18x32xf32> to vector<16x16x32xf32>
    %25 = vector.shape_cast %24 : vector<16x16x32xf32> to vector<256x32xf32>
    %c1_16 = arith.constant 1 : index
    %c0_17 = arith.constant 0 : index
    %c0_18 = arith.constant 0 : index
    %c0_19 = arith.constant 0 : index
    %26 = vector.load %arg3[%c1_16, %c0_17, %c0_18, %c0_19] : memref<3x3x32x32xbf16, #tpu.memory_space<vmem>>, vector<1x1x32x32xbf16>
    %27 = vector.shape_cast %26 : vector<1x1x32x32xbf16> to vector<32x32xbf16>
    %28 = arith.truncf %25 : vector<256x32xf32> to vector<256x32xbf16>
    %cst_20 = arith.constant dense<0.000000e+00> : vector<256x32xf32>
    %29 = tpu.matmul %28, %27, %cst_20 {dimension_numbers = #tpu.dot_dimension_numbers<[1], [0], [0], [1], [0, 0, 1, 1], [], []>} : vector<256x32xbf16>, vector<32x32xbf16>, vector<256x32xf32> -> vector<256x32xf32>
    %30 = arith.addf %23, %29 : vector<256x32xf32>
    %31 = vector.extract_strided_slice %1 {offsets = [1, 1, 0], sizes = [16, 16, 32], strides = [1, 1, 1]} : vector<18x18x32xf32> to vector<16x16x32xf32>
    %32 = vector.shape_cast %31 : vector<16x16x32xf32> to vector<256x32xf32>
    %c1_21 = arith.constant 1 : index
    %c1_22 = arith.constant 1 : index
    %c0_23 = arith.constant 0 : index
    %c0_24 = arith.constant 0 : index
    %33 = vector.load %arg3[%c1_21, %c1_22, %c0_23, %c0_24] : memref<3x3x32x32xbf16, #tpu.memory_space<vmem>>, vector<1x1x32x32xbf16>
    %34 = vector.shape_cast %33 : vector<1x1x32x32xbf16> to vector<32x32xbf16>
    %35 = arith.truncf %32 : vector<256x32xf32> to vector<256x32xbf16>
    %cst_25 = arith.constant dense<0.000000e+00> : vector<256x32xf32>
    %36 = tpu.matmul %35, %34, %cst_25 {dimension_numbers = #tpu.dot_dimension_numbers<[1], [0], [0], [1], [0, 0, 1, 1], [], []>} : vector<256x32xbf16>, vector<32x32xbf16>, vector<256x32xf32> -> vector<256x32xf32>
    %37 = arith.addf %30, %36 : vector<256x32xf32>
    %38 = vector.extract_strided_slice %1 {offsets = [1, 2, 0], sizes = [16, 16, 32], strides = [1, 1, 1]} : vector<18x18x32xf32> to vector<16x16x32xf32>
    %39 = vector.shape_cast %38 : vector<16x16x32xf32> to vector<256x32xf32>
    %c1_26 = arith.constant 1 : index
    %c2_27 = arith.constant 2 : index
    %c0_28 = arith.constant 0 : index
    %c0_29 = arith.constant 0 : index
    %40 = vector.load %arg3[%c1_26, %c2_27, %c0_28, %c0_29] : memref<3x3x32x32xbf16, #tpu.memory_space<vmem>>, vector<1x1x32x32xbf16>
    %41 = vector.shape_cast %40 : vector<1x1x32x32xbf16> to vector<32x32xbf16>
    %42 = arith.truncf %39 : vector<256x32xf32> to vector<256x32xbf16>
    %cst_30 = arith.constant dense<0.000000e+00> : vector<256x32xf32>
    %43 = tpu.matmul %42, %41, %cst_30 {dimension_numbers = #tpu.dot_dimension_numbers<[1], [0], [0], [1], [0, 0, 1, 1], [], []>} : vector<256x32xbf16>, vector<32x32xbf16>, vector<256x32xf32> -> vector<256x32xf32>
    %44 = arith.addf %37, %43 : vector<256x32xf32>
    %45 = vector.extract_strided_slice %1 {offsets = [2, 0, 0], sizes = [16, 16, 32], strides = [1, 1, 1]} : vector<18x18x32xf32> to vector<16x16x32xf32>
    %46 = vector.shape_cast %45 : vector<16x16x32xf32> to vector<256x32xf32>
    %c2_31 = arith.constant 2 : index
    %c0_32 = arith.constant 0 : index
    %c0_33 = arith.constant 0 : index
    %c0_34 = arith.constant 0 : index
    %47 = vector.load %arg3[%c2_31, %c0_32, %c0_33, %c0_34] : memref<3x3x32x32xbf16, #tpu.memory_space<vmem>>, vector<1x1x32x32xbf16>
    %48 = vector.shape_cast %47 : vector<1x1x32x32xbf16> to vector<32x32xbf16>
    %49 = arith.truncf %46 : vector<256x32xf32> to vector<256x32xbf16>
    %cst_35 = arith.constant dense<0.000000e+00> : vector<256x32xf32>
    %50 = tpu.matmul %49, %48, %cst_35 {dimension_numbers = #tpu.dot_dimension_numbers<[1], [0], [0], [1], [0, 0, 1, 1], [], []>} : vector<256x32xbf16>, vector<32x32xbf16>, vector<256x32xf32> -> vector<256x32xf32>
    %51 = arith.addf %44, %50 : vector<256x32xf32>
    %52 = vector.extract_strided_slice %1 {offsets = [2, 1, 0], sizes = [16, 16, 32], strides = [1, 1, 1]} : vector<18x18x32xf32> to vector<16x16x32xf32>
    %53 = vector.shape_cast %52 : vector<16x16x32xf32> to vector<256x32xf32>
    %c2_36 = arith.constant 2 : index
    %c1_37 = arith.constant 1 : index
    %c0_38 = arith.constant 0 : index
    %c0_39 = arith.constant 0 : index
    %54 = vector.load %arg3[%c2_36, %c1_37, %c0_38, %c0_39] : memref<3x3x32x32xbf16, #tpu.memory_space<vmem>>, vector<1x1x32x32xbf16>
    %55 = vector.shape_cast %54 : vector<1x1x32x32xbf16> to vector<32x32xbf16>
    %56 = arith.truncf %53 : vector<256x32xf32> to vector<256x32xbf16>
    %cst_40 = arith.constant dense<0.000000e+00> : vector<256x32xf32>
    %57 = tpu.matmul %56, %55, %cst_40 {dimension_numbers = #tpu.dot_dimension_numbers<[1], [0], [0], [1], [0, 0, 1, 1], [], []>} : vector<256x32xbf16>, vector<32x32xbf16>, vector<256x32xf32> -> vector<256x32xf32>
    %58 = arith.addf %51, %57 : vector<256x32xf32>
    %59 = vector.extract_strided_slice %1 {offsets = [2, 2, 0], sizes = [16, 16, 32], strides = [1, 1, 1]} : vector<18x18x32xf32> to vector<16x16x32xf32>
    %60 = vector.shape_cast %59 : vector<16x16x32xf32> to vector<256x32xf32>
    %c2_41 = arith.constant 2 : index
    %c2_42 = arith.constant 2 : index
    %c0_43 = arith.constant 0 : index
    %c0_44 = arith.constant 0 : index
    %61 = vector.load %arg3[%c2_41, %c2_42, %c0_43, %c0_44] : memref<3x3x32x32xbf16, #tpu.memory_space<vmem>>, vector<1x1x32x32xbf16>
    %62 = vector.shape_cast %61 : vector<1x1x32x32xbf16> to vector<32x32xbf16>
    %63 = arith.truncf %60 : vector<256x32xf32> to vector<256x32xbf16>
    %cst_45 = arith.constant dense<0.000000e+00> : vector<256x32xf32>
    %64 = tpu.matmul %63, %62, %cst_45 {dimension_numbers = #tpu.dot_dimension_numbers<[1], [0], [0], [1], [0, 0, 1, 1], [], []>} : vector<256x32xbf16>, vector<32x32xbf16>, vector<256x32xf32> -> vector<256x32xf32>
    %65 = arith.addf %58, %64 : vector<256x32xf32>
    %cst_46 = arith.constant dense<0.000000e+00> : vector<32xf32>
    %66 = vector.multi_reduction <add>, %65, %cst_46 [0] : vector<256x32xf32> to vector<32xf32>
    %67 = vector.shape_cast %66 : vector<32xf32> to vector<1x32xf32>
    %cst_47 = arith.constant 2.560000e+02 : f32
    %68 = vector.broadcast %cst_47 : f32 to vector<1x32xf32>
    %69 = arith.divf %67, %68 : vector<1x32xf32>
    %70 = vector.broadcast %69 : vector<1x32xf32> to vector<256x32xf32>
    %71 = arith.subf %65, %70 : vector<256x32xf32>
    %72 = arith.mulf %71, %71 : vector<256x32xf32>
    %cst_48 = arith.constant dense<0.000000e+00> : vector<32xf32>
    %73 = vector.multi_reduction <add>, %72, %cst_48 [0] : vector<256x32xf32> to vector<32xf32>
    %74 = vector.shape_cast %73 : vector<32xf32> to vector<1x32xf32>
    %cst_49 = arith.constant 2.560000e+02 : f32
    %75 = vector.broadcast %cst_49 : f32 to vector<1x32xf32>
    %76 = arith.divf %74, %75 : vector<1x32xf32>
    %cst_50 = arith.constant 9.99999974E-6 : f32
    %77 = vector.broadcast %cst_50 : f32 to vector<1x32xf32>
    %78 = arith.addf %76, %77 : vector<1x32xf32>
    %79 = math.rsqrt %78 : vector<1x32xf32>
    %80 = vector.broadcast %79 : vector<1x32xf32> to vector<256x32xf32>
    %81 = arith.mulf %71, %80 : vector<256x32xf32>
    %c0_51 = arith.constant 0 : index
    %c0_52 = arith.constant 0 : index
    %82 = vector.load %arg4[%c0_51, %c0_52] : memref<1x32xf32, #tpu.memory_space<vmem>>, vector<1x32xf32>
    %83 = vector.broadcast %82 : vector<1x32xf32> to vector<256x32xf32>
    %84 = arith.mulf %81, %83 : vector<256x32xf32>
    %c0_53 = arith.constant 0 : index
    %c0_54 = arith.constant 0 : index
    %85 = vector.load %arg5[%c0_53, %c0_54] : memref<1x32xf32, #tpu.memory_space<vmem>>, vector<1x32xf32>
    %86 = vector.broadcast %85 : vector<1x32xf32> to vector<256x32xf32>
    %87 = arith.addf %84, %86 : vector<256x32xf32>
    %cst_55 = arith.constant 0.000000e+00 : f32
    %88 = vector.broadcast %cst_55 : f32 to vector<256x32xf32>
    %89 = arith.cmpf oge, %87, %88 : vector<256x32xf32>
    %cst_56 = arith.constant 0.00999999977 : f32
    %90 = vector.broadcast %cst_56 : f32 to vector<256x32xf32>
    %91 = arith.mulf %90, %87 : vector<256x32xf32>
    %92 = arith.select %89, %87, %91 : vector<256x32xi1>, vector<256x32xf32>
    %c0_57 = arith.constant 0 : index
    %c0_58 = arith.constant 0 : index
    %c0_59 = arith.constant 0 : index
    %93 = vector.load %arg6[%c0_57, %c0_58, %c0_59] : memref<1x256x32xf32, #tpu.memory_space<vmem>>, vector<1x256x32xf32>
    %94 = vector.shape_cast %93 : vector<1x256x32xf32> to vector<256x32xf32>
    %95 = vector.shape_cast %92 : vector<256x32xf32> to vector<1x256x32xf32>
    tpu.vector_store %arg6[%c0_57, %c0_58, %c0_59], %95 {strides = array<i32>} : memref<1x256x32xf32, #tpu.memory_space<vmem>>, vector<1x256x32xf32>,
    return
  }
  func.func @transform_0(%arg0: i32, %arg1: i32) -> (i32, i32, i32, i32) {
    %c0_i32 = arith.constant 0 : i32
    %c0_i32_0 = arith.constant 0 : i32
    %c0_i32_1 = arith.constant 0 : i32
    %c0_i32_2 = arith.constant 0 : i32
    return %arg0, %c0_i32, %c0_i32_0, %c0_i32_1 : i32, i32, i32, i32
  }
  func.func @transform_1(%arg0: i32, %arg1: i32) -> (i32, i32, i32, i32) {
    %c0_i32 = arith.constant 0 : i32
    %c0_i32_0 = arith.constant 0 : i32
    %c0_i32_1 = arith.constant 0 : i32
    %c0_i32_2 = arith.constant 0 : i32
    return %c0_i32, %c0_i32_0, %c0_i32_1, %arg1 : i32, i32, i32, i32
  }
  func.func @transform_2(%arg0: i32, %arg1: i32) -> (i32, i32) {
    %c0_i32 = arith.constant 0 : i32
    %c0_i32_0 = arith.constant 0 : i32
    return %c0_i32, %arg1 : i32, i32
  }
  func.func @transform_3(%arg0: i32, %arg1: i32) -> (i32, i32) {
    %c0_i32 = arith.constant 0 : i32
    %c0_i32_0 = arith.constant 0 : i32
    return %c0_i32, %arg1 : i32, i32
  }
  func.func @transform_4(%arg0: i32, %arg1: i32) -> (i32, i32, i32) {
    %c0_i32 = arith.constant 0 : i32
    %c0_i32_0 = arith.constant 0 : i32
    return %arg0, %c0_i32, %arg1 : i32, i32, i32
  }
}

</mosaic_0001>

<bundles_post_ra>
// kernel: residual_block_forward.2
= control target key start
LH: loop header
LB: loop body
LE: loop exit
PB: predicated region body
PF: predicated region fallthrough
CT: control target
= control target key end

     0   :  { %s4280_s15 = smov 0   ;;  %s4282_s16 = smov 0   ;;  %s5763_s0 = inlined_call_operand.vmem [shape: f32[2,18,18,32], index: 0, kind: input, shape index: {}]   ;;  %s5764_s1 = inlined_call_operand.vmem [shape: bf16[3,3,32,32], index: 1, kind: input, shape index: {}]   ;;  %s5765_s2 = inlined_call_operand.vmem [shape: f32[1,32], index: 2, kind: input, shape index: {}]   ;;  %s5766_s3 = inlined_call_operand.vmem [shape: f32[1,32], index: 3, kind: input, shape index: {}]   ;;  %s5767_s4 = inlined_call_operand.vmem [shape: f32[2,256,32], index: 4, kind: output, shape index: {}]  }
   0x1   :  { %s4284_s17 = smov 0  }
   0x2 LB: > { %s26_s18 = sadd.s32 1, %s4249_s16  ;;  %p3237_p0 = scmp.ge.s32.totalorder %s4253_s17, 1  ;;  %s4253_s17 = sphi %s4284_s17, %s14_s17   ;;  %s4249_s16 = sphi %s4282_s16, %s5845_s16   ;;  %s4245_s15 = sphi %s4280_s15, %s5844_s15  }
   0x3   : > { %p28_p1 = scmp.ge.s32.totalorder %s26_s18, 2  ;;  %p201_p2 = scmp.lt.s32.totalorder %s4253_s17, 3 }
   0x5   : > { %s5847_s18 = smov (%p28_p1, %s26_s18), 0  ;;  %p202_p3 = pnand %p3237_p0, %p201_p2 }
   0x7   : > { %205 = sbr.rel (%p202_p3) target bundleno = 701 (0x2bd), region = 36 }
   0xe   : > { %v4211_v0 = vld [vmem:[%s5764_s1 + $0x10] sm:$0xff]   ;;  %p240_p4 = scmp.lt.s32.totalorder %s4245_s15, 1  ;;  %v4304_v1 = vld [vmem:[%s5764_s1 + $0x40] sm:$0xff]   ;;  %v4213_v2 = vld [vmem:[%s5764_s1 + $0x18] sm:$0xff]   ;;  %vm386_vm0 = vcmask 1046528   ;;  %vm532_vm1 = vcmask 261120  }
   0xf   : > { %5795 = vst [vmem:[#allocation2_spill] sm:$0xff] %v4304_v1  ;;  %3602 = vmatprep.subr.bf16.mxu1 %v4211_v0  ;;  %3746 = vmatprep.subr.bf16.mxu0 %v4304_v1  ;;  %v4315_v3 = vld [vmem:[%s5764_s1 + $0x48] sm:$0xff]   ;;  %v4215_v4 = vld [vmem:[%s5764_s1] sm:$0xff]   ;;  %v4326_v5 = vld [vmem:[%s5764_s1 + $0x50] sm:$0xff]   ;;  %vm963_vm2 = vcmask 1045504  }
  0x10   : > { %s5849_s15 = smov (!%p240_p4, %s4245_s15), 1  ;;  %3603 = vmatpush3.bf16.msra.mxu1 %v4211_v0  ;;  %5796 = vst [vmem:[#allocation3_spill] sm:$0xff] %v4315_v3  ;;  %3747 = vmatpush3.bf16.msra.mxu0 %v4304_v1  ;;  %v4217_v51 = vld [vmem:[%s5764_s1 + $0x58] sm:$0xff]   ;;  %v4218_v55 = vld [vmem:[%s5764_s1 + $0x8] sm:$0xff]   ;;  %v4455_v0 = vld [vmem:[%s5764_s1 + $0x60] sm:$0xff]  }
  0x11   : > { %3604 = vmatprep.subr.bf16.mxu1 %v4213_v2  ;;  %s4186_s27 = smul.u32 432, %s5849_s15  ;;  %3748 = vmatprep.subr.bf16.mxu0 %v4315_v3  ;;  %s3439_s19 = sshll.u32 %s5849_s15, 8 }
  0x12   : > { %s5534_s21 = scalar_lea.vmem %s5767_s4, %s3439_s19 }
  0x13   : > { %s4331_s8 = scalar_lea.vmem %s5763_s0, %s4186_s27 }
  0x14   : > { %3605 = vmatpush3.bf16.msra.mxu1 %v4213_v2  ;;  %v4334_v6 = vld [vmem:[%s4331_s8] sm:$0xff]  ;;  %v4337_v7 = vld [vmem:[%s4331_s8 + $0x8] sm:$0xff]  ;;  %v4340_v8 = vld [vmem:[%s4331_s8 + $0x10] sm:$0x3]  ;;  %3749 = vmatpush3.bf16.msra.mxu0 %v4315_v3 }
  0x15   : > { %v387_v9 = vrot.slane %v4334_v6, 1  ;;  %v388_v10 = vrot.slane %v4337_v7, 1  ;;  %v390_v11 = vrot.slane %v4340_v8, 1  ;;  %3638 = vmatprep.subr.bf16.mxu1 %v4215_v4  ;;  %v4347_v12 = vld [vmem:[%s4331_s8 + $0x18] sm:$0xff]  ;;  %v4350_v13 = vld [vmem:[%s4331_s8 + $0x20] sm:$0xff]  ;;  %3782 = vmatprep.subr.bf16.mxu0 %v4326_v5  ;;  %v4362_v17 = vld [vmem:[%s4331_s8 + $0x30] sm:$0xff] }
  0x16   : > { %v4353_v14 = vld [vmem:[%s4331_s8 + $0x28] sm:$0x3]  ;;  %v4357_v15 = vpack.c.bf16 %v4350_v13, %v4347_v12  ;;  %v392_v16 = vrot.slane %v4347_v12, 1  ;;  %v393_v20 = vrot.slane %v4350_v13, 1  ;;  %v4369_v22 = vld [vmem:[%s4331_s8 + $0x38] sm:$0xff]  ;;  %v4378_v26 = vld [vmem:[%s4331_s8 + $0x50] sm:$0xff] }
  0x17   : > { %v389_v18 = vsel %vm386_vm0, %v387_v9, %v388_v10  ;;  %v391_v19 = vsel %vm386_vm0, %v388_v10, %v390_v11  ;;  %v395_v21 = vrot.slane %v4353_v14, 1  ;;  %v4372_v23 = vld [vmem:[%s4331_s8 + $0x40] sm:$0x3]  ;;  %v4375_v25 = vld [vmem:[%s4331_s8 + $0x48] sm:$0xff]  ;;  %v397_v29 = vrot.slane %v4362_v17, 1  ;;  %v4399_v37 = vld [vmem:[%s4331_s8 + $0x78] sm:$0xff] }
  0x18   : > { %v504_v24 = vpack.c.bf16 %v391_v19, %v389_v18  ;;  %v394_v27 = vsel %vm386_vm0, %v392_v16, %v393_v20  ;;  %v398_v30 = vrot.slane %v4369_v22, 1  ;;  %v4385_v31 = vld [vmem:[%s4331_s8 + $0x58] sm:$0x3]  ;;  %v4388_v32 = vld [vmem:[%s4331_s8 + $0x60] sm:$0xff]  ;;  %v4391_v33 = vld [vmem:[%s4331_s8 + $0x68] sm:$0xff]  ;;  %v400_v35 = vrot.slane %v4372_v23, 1 }
  0x19   : > { %v396_v28 = vsel %vm386_vm0, %v393_v20, %v395_v21  ;;  %v4396_v36 = vld [vmem:[%s4331_s8 + $0x70] sm:$0x3]  ;;  %v402_v39 = vrot.slane %v4375_v25, 1  ;;  %v403_v40 = vrot.slane %v4378_v26, 1  ;;  %v4405_v41 = vld [vmem:[%s4331_s8 + $0x80] sm:$0xff]  ;;  %v405_v44 = vrot.slane %v4385_v31, 1 }
  0x1a   : > { %3606 = vmatprep.mubr.msk.bf16.mxu1 %vm532_vm1, %v504_v24  ;;  %v505_v34 = vpack.c.bf16 %v396_v28, %v394_v27  ;;  %v399_v38 = vsel %vm386_vm0, %v397_v29, %v398_v30  ;;  %v4408_v42 = vld [vmem:[%s4331_s8 + $0x88] sm:$0x3]  ;;  %v401_v43 = vsel %vm386_vm0, %v398_v30, %v400_v35  ;;  %v407_v45 = vrot.slane %v4388_v32, 1  ;;  %v4440_v59 = vld [vmem:[%s4331_s8 + $0x90] sm:$0xff]  ;;  %v4447_v62 = vld [vmem:[%s4331_s8 + $0x98] sm:$0xff] }
  0x1b   : > { %v408_v46 = vrot.slane %v4391_v33, 1  ;;  %v4416_v47 = vpack.c.bf16 %v401_v43, %v399_v38  ;;  %v404_v48 = vsel %vm386_vm0, %v402_v39, %v403_v40  ;;  %v410_v49 = vrot.slane %v4396_v36, 1  ;;  %v4450_v63 = vld [vmem:[%s4331_s8 + $0xa0] sm:$0x3]  ;;  %v4458_v2 = vld [vmem:[%s4331_s8 + $0xa8] sm:$0xff]  ;;  %v4708_v1 = vld [vmem:[%s4331_s8 + $0x170] sm:$0xff] }
  0x1c   : > { %3750 = vmatprep.mubr.msk.bf16.mxu0 %vm532_vm1, %v505_v34  ;;  %3607 = vmatmul.mubr.msk.bf16.vlgmr.msra.gmra.mrb[0].mxu1 %vm532_vm1, %v505_v34  ;;  %v412_v50 = vrot.slane %v4399_v37, 1  ;;  %v406_v52 = vsel %vm386_vm0, %v403_v40, %v405_v44  ;;  %v413_v53 = vrot.slane %v4405_v41, 1  ;;  %v415_v54 = vrot.slane %v4408_v42, 1  ;;  %v4484_v24 = vld [vmem:[%s4331_s8 + $0xc0] sm:$0xff]  ;;  %v4491_v29 = vld [vmem:[%s4331_s8 + $0xc8] sm:$0xff] }
  0x1d   : > { %3639 = vmatpush3.bf16.msra.mxu1 %v4215_v4  ;;  %5797 = vst [vmem:[#allocation4_spill] sm:$0xff] %v4416_v47  ;;  %3751 = vmatmul.mubr.msk.bf16.vlgmr.msra.gmra.mrb[0].mxu0 %vm532_vm1, %v4416_v47  ;;  %v4434_v56 = vpack.c.bf16 %v406_v52, %v404_v48  ;;  %v409_v57 = vsel %vm386_vm0, %v407_v45, %v408_v46  ;;  %v4461_v4 = vld [vmem:[%s4331_s8 + $0xb0] sm:$0xff]  ;;  %v417_v11 = vrot.slane %v4440_v59, 1  ;;  %v418_v16 = vrot.slane %v4447_v62, 1  ;;  %v4496_v30 = vld [vmem:[%s5764_s1 + $0x20] sm:$0xff]  }
  0x1e   : > { %3610 = vmatprep.mubr.msk.bf16.mxu1 %vm532_vm1, %v4416_v47  ;;  %3783 = vmatpush3.bf16.msra.mxu0 %v4326_v5  ;;  %v411_v58 = vsel %vm386_vm0, %v408_v46, %v410_v49  ;;  %v414_v60 = vsel %vm386_vm0, %v412_v50, %v413_v53  ;;  %v416_v61 = vsel %vm386_vm0, %v413_v53, %v415_v54  ;;  %v4464_v5 = vld [vmem:[%s4331_s8 + $0xb8] sm:$0x3]  ;;  %v420_v18 = vrot.slane %v4450_v63, 1  ;;  %v4501_v38 = vld [vmem:[%s4331_s8 + $0xd0] sm:$0x3] }
  0x1f   : > { %5798 = vst [vmem:[#allocation5_spill] sm:$0xff] %v4434_v56  ;;  %3640 = vmatprep.subr.bf16.mxu1 %v4218_v55  ;;  %3754 = vmatprep.mubr.msk.bf16.mxu0 %vm532_vm1, %v4434_v56  ;;  %v4466_v9 = vpack.c.bf16 %v411_v58, %v409_v57  ;;  %v4470_v10 = vpack.c.bf16 %v416_v61, %v414_v60  ;;  %v422_v19 = vrot.slane %v4458_v2, 1  ;;  %v423_v20 = vrot.slane %v4461_v4, 1  ;;  %v4513_v49 = vld [vmem:[%s4331_s8 + $0xd8] sm:$0xff]  ;;  %v4526_v50 = vld [vmem:[%s4331_s8 + $0xe8] sm:$0x3] }
  0x20   : > { %3784 = vmatprep.subr.bf16.mxu0 %v4217_v51  ;;  %v425_v21 = vrot.slane %v4464_v5, 1  ;;  %v419_v27 = vsel %vm386_vm0, %v417_v11, %v418_v16  ;;  %v421_v28 = vsel %vm386_vm0, %v418_v16, %v420_v18  ;;  %v969_v39 = vrot.slane %v4347_v12, 2  ;;  %v4531_v53 = vld [vmem:[%s4331_s8 + $0xf0] sm:$0xff]  ;;  %v4534_v54 = vld [vmem:[%s4331_s8 + $0xf8] sm:$0xff]  ;;  %v4542_v60 = vld [vmem:[%s4331_s8 + $0x100] sm:$0x3] }
  0x21   : > { %3641 = vmatpush3.bf16.msra.mxu1 %v4218_v55  ;;  %5799 = vst [vmem:[#allocation6_spill] sm:$0xff] %v4466_v9  ;;  %5800 = vst [vmem:[#allocation7_spill] sm:$0xff] %v4470_v10  ;;  %v424_v34 = vsel %vm386_vm0, %v422_v19, %v423_v20  ;;  %v970_v40 = vrot.slane %v4350_v13, 2  ;;  %v972_v43 = vrot.slane %v4353_v14, 2  ;;  %v974_v44 = vrot.slane %v4362_v17, 2  ;;  %v4521_v14 = vld [vmem:[%s4331_s8 + $0xe0] sm:$0xff] }
  0x22   : > { %3785 = vmatpush3.bf16.msra.mxu0 %v4217_v51  ;;  %v426_v35 = vsel %vm386_vm0, %v423_v20, %v425_v21  ;;  %3674 = vmatprep.subr.bf16.mxu1 %v4496_v30  ;;  %v4508_v45 = vpack.c.bf16 %v421_v28, %v419_v27  ;;  %v427_v46 = vrot.slane %v4484_v24, 1  ;;  %v428_v48 = vrot.slane %v4491_v29, 1  ;;  %v4553_v20 = vld [vmem:[%s4331_s8 + $0x108] sm:$0xff]  ;;  %v4557_v27 = vld [vmem:[%s4331_s8 + $0x110] sm:$0xff] }
  0x23   : > { %3818 = vmatprep.subr.bf16.mxu0 %v4455_v0  ;;  %v4517_v12 = vpack.c.bf16 %v426_v35, %v424_v34  ;;  %v430_v13 = vrot.slane %v4501_v38, 1  ;;  %v975_v51 = vrot.slane %v4369_v22, 2  ;;  %v977_v52 = vrot.slane %v4372_v23, 2  ;;  %v4564_v35 = vld [vmem:[%s4331_s8 + $0x118] sm:$0x3] }
  0x24   : > { %3611 = vmatmul.mubr.msk.bf16.gmra.mrb[4].mxu1 %vm532_vm1, %v4434_v56  ;;  %5801 = vst [vmem:[#allocation8_spill] sm:$0xff] %v4508_v45  ;;  %v429_v55 = vsel %vm386_vm0, %v427_v46, %v428_v48  ;;  %v971_v57 = vsel %vm963_vm2, %v969_v39, %v970_v40  ;;  %v973_v58 = vsel %vm963_vm2, %v970_v40, %v972_v43  ;;  %v432_v61 = vrot.slane %v4513_v49, 1 }
  0x25   : > { %3614 = vmatprep.mubr.msk.bf16.mxu1 %vm532_vm1, %v4466_v9  ;;  %3755 = vmatmul.mubr.msk.bf16.gmra.mrb[4].mxu0 %vm532_vm1, %v4466_v9  ;;  %5802 = vst [vmem:[#allocation9_spill] sm:$0xff] %v4517_v12  ;;  %v431_v23 = vsel %vm386_vm0, %v428_v48, %v430_v13  ;;  %v433_v11 = vrot.slane %v4521_v14, 1  ;;  %v435_v16 = vrot.slane %v4526_v50, 1  ;;  %v437_v18 = vrot.slane %v4531_v53, 1  ;;  %v4573_v48 = vld [vmem:[%s4331_s8 + $0x120] sm:$0xff]  ;;  %v4611_v9 = vld [vmem:[%s4331_s8 + $0x138] sm:$0xff] }
  0x26   : > { %3758 = vmatprep.mubr.msk.bf16.mxu0 %vm532_vm1, %v4470_v10  ;;  %v438_v19 = vrot.slane %v4534_v54, 1  ;;  %v440_v21 = vrot.slane %v4542_v60, 1  ;;  %v4559_v28 = vpack.c.bf16 %v431_v23, %v429_v55  ;;  %v4561_v34 = vpack.c.bf16 %v973_v58, %v971_v57  ;;  %v4582_v23 = vld [vmem:[%s4331_s8 + $0x128] sm:$0xff] }
  0x27   : > { %v434_v39 = vsel %vm386_vm0, %v432_v61, %v433_v11  ;;  %v436_v40 = vsel %vm386_vm0, %v433_v11, %v435_v16  ;;  %v976_v43 = vsel %vm963_vm2, %v974_v44, %v975_v51  ;;  %v978_v46 = vsel %vm963_vm2, %v975_v51, %v977_v52  ;;  %v4585_v61 = vld [vmem:[%s4331_s8 + $0x130] sm:$0x3] }
  0x28   : > { %5803 = vst [vmem:[#allocation10_spill] sm:$0xff] %v4559_v28  ;;  %v439_v13 = vsel %vm386_vm0, %v437_v18, %v438_v19  ;;  %v979_v55 = vrot.slane %v4375_v25, 2  ;;  %v980_v57 = vrot.slane %v4378_v26, 2  ;;  %v982_v58 = vrot.slane %v4385_v31, 2 }
  0x29   : > { %v441_v44 = vsel %vm386_vm0, %v438_v19, %v440_v21  ;;  %v442_v51 = vrot.slane %v4553_v20, 1  ;;  %v443_v52 = vrot.slane %v4557_v27, 1  ;;  %v445_v11 = vrot.slane %v4564_v35, 1 }
  0x2a   : > { %v4595_v31 = vpack.c.bf16 %v436_v40, %v434_v39  ;;  %v447_v16 = vrot.slane %v4573_v48, 1  ;;  %v448_v18 = vrot.slane %v4582_v23, 1  ;;  %v450_v19 = vrot.slane %v4585_v61, 1 }
  0x2b   : > { %v4600_v21 = vpack.c.bf16 %v978_v46, %v976_v43  ;;  %v4602_v3 = vpack.c.bf16 %v441_v44, %v439_v13  ;;  %v446_v39 = vsel %vm386_vm0, %v443_v52, %v445_v11  ;;  %v984_v40 = vrot.slane %v4388_v32, 2  ;;  %v4614_v43 = vld [vmem:[%s4331_s8 + $0x140] sm:$0xff]  ;;  %v4634_v11 = vld [vmem:[%s4331_s8 + $0x150] sm:$0xff] }
  0x2c   : > { %3615 = vmatmul.mubr.msk.bf16.gmra.mrb[8].mxu1 %vm532_vm1, %v4470_v10  ;;  %5804 = vst [vmem:[#allocation11_spill] sm:$0xff] %v4595_v31  ;;  %v985_v10 = vrot.slane %v4391_v33, 2  ;;  %v987_v46 = vrot.slane %v4396_v36, 2  ;;  %v989_v13 = vrot.slane %v4399_v37, 2  ;;  %v992_v36 = vrot.slane %v4408_v42, 2 }
  0x2d   : > { %3618 = vmatprep.mubr.msk.bf16.mxu1 %vm532_vm1, %v4508_v45  ;;  %3759 = vmatmul.mubr.msk.bf16.gmra.mrb[8].mxu0 %vm532_vm1, %v4508_v45  ;;  %5805 = vst [vmem:[#allocation12_spill] sm:$0xff] %v4600_v21  ;;  %5806 = vst [vmem:[#allocation13_spill] sm:$0xff] %v4602_v3  ;;  %v444_v45 = vsel %vm386_vm0, %v442_v51, %v443_v52  ;;  %v449_v51 = vsel %vm386_vm0, %v447_v16, %v448_v18  ;;  %v452_v56 = vrot.slane %v4611_v9, 1 }
  0x2e   : > { %3762 = vmatprep.mubr.msk.bf16.mxu0 %vm532_vm1, %v4517_v12  ;;  %v451_v52 = vsel %vm386_vm0, %v448_v18, %v450_v19  ;;  %v986_v42 = vsel %vm963_vm2, %v984_v40, %v985_v10  ;;  %v4655_v18 = vpack.c.bf16 %v4378_v26, %v4375_v25  ;;  %v988_v19 = vsel %vm963_vm2, %v985_v10, %v987_v46 }
  0x2f   : > { %v457_v26 = vrot.slane %v4634_v11, 1  ;;  %v994_v46 = vrot.slane %v4440_v59, 2 }
  0x34   : > { %3619 = vmatmul.mubr.msk.bf16.gmra.mrb[12].mxu1 %vm532_vm1, %v4517_v12  ;;  %v981_v12 = vsel %vm963_vm2, %v979_v55, %v980_v57  ;;  %v990_v55 = vrot.slane %v4405_v41, 2 }
  0x35   : > { %3622 = vmatprep.mubr.msk.bf16.mxu1 %vm532_vm1, %v4559_v28  ;;  %3763 = vmatmul.mubr.msk.bf16.gmra.mrb[12].mxu0 %vm532_vm1, %v4559_v28  ;;  %v983_v28 = vsel %vm963_vm2, %v980_v57, %v982_v58  ;;  %v4620_v57 = vld [vmem:[%s4331_s8 + $0x148] sm:$0x3]  ;;  %v4624_v58 = vpack.c.bf16 %v4369_v22, %v4362_v17  ;;  %v453_v17 = vrot.slane %v4614_v43, 1  ;;  %v4641_v22 = vld [vmem:[%s4331_s8 + $0x158] sm:$0xff] }
  0x36   : > { %3786 = vmatprep.mubr.msk.bf16.mxu0 %vm532_vm1, %v4561_v34  ;;  %v4628_v44 = vpack.c.bf16 %v983_v28, %v981_v12  ;;  %v4221_v12 = vld [vmem:[%s5764_s1 + $0x68] sm:$0xff]   ;;  %v4649_v28 = vpack.c.bf16 %v446_v39, %v444_v45  ;;  %v455_v16 = vrot.slane %v4620_v57, 1  ;;  %v991_v47 = vsel %vm963_vm2, %v989_v13, %v990_v55 }
  0x37   : > { %v4665_v45 = vpack.c.bf16 %v4391_v33, %v4388_v32  ;;  %v993_v25 = vsel %vm963_vm2, %v990_v55, %v992_v36  ;;  %v458_v10 = vrot.slane %v4641_v22, 1  ;;  %v454_v40 = vsel %vm386_vm0, %v452_v56, %v453_v17 }
  0x38   : > { %5807 = vst [vmem:[#allocation14_spill] sm:$0xff] %v4628_v44  ;;  %5808 = vst [vmem:[#allocation15_spill] sm:$0xff] %v4649_v28  ;;  %v995_v32 = vrot.slane %v4447_v62, 2  ;;  %v4679_v33 = vpack.c.bf16 %v4405_v41, %v4399_v37  ;;  %v456_v13 = vsel %vm386_vm0, %v453_v17, %v455_v16  ;;  %v997_v56 = vrot.slane %v4450_v63, 2  ;;  %v4696_v41 = vld [vmem:[%s4331_s8 + $0x168] sm:$0xff] }
  0x39   : > { %v999_v55 = vrot.slane %v4458_v2, 2  ;;  %v4691_v36 = vpack.c.bf16 %v988_v19, %v986_v42  ;;  %v4693_v37 = vpack.c.bf16 %v993_v25, %v991_v47  ;;  %v459_v63 = vsel %vm386_vm0, %v457_v26, %v458_v10  ;;  %v4711_v42 = vld [vmem:[%s4331_s8 + $0x178] sm:$0x3] }
  0x3a   : > { %v1002_v16 = vrot.slane %v4464_v5, 2  ;;  %v4715_v47 = vpack.c.bf16 %v4461_v4, %v4458_v2  ;;  %v4721_v19 = vpack.c.bf16 %v456_v13, %v454_v40  ;;  %v996_v5 = vsel %vm963_vm2, %v994_v46, %v995_v32 }
  0x3b   : > { %5810 = vst [vmem:[#allocation17_spill] sm:$0xff] %v4691_v36  ;;  %5811 = vst [vmem:[#allocation18_spill] sm:$0xff] %v4693_v37  ;;  %v998_v25 = vsel %vm963_vm2, %v995_v32, %v997_v56  ;;  %v462_v2 = vrot.slane %v4696_v41, 1  ;;  %v463_v26 = vrot.slane %v4708_v1, 1  ;;  %v4747_v46 = vpack.c.bf16 %v4534_v54, %v4531_v53 }
  0x3c   : > { %3623 = vmatmul.mubr.msk.bf16.gmra.mrb[16].mxu1 %vm532_vm1, %v4595_v31  ;;  %v4644_v31 = vld [vmem:[%s4331_s8 + $0x160] sm:$0x3]  ;;  %v4751_v32 = vpack.c.bf16 %v4557_v27, %v4553_v20  ;;  %v4755_v13 = vpack.c.bf16 %v4582_v23, %v4573_v48  ;;  %v4759_v56 = vpack.c.bf16 %v4614_v43, %v4611_v9 }
  0x3d   : > { %3626 = vmatprep.mubr.msk.bf16.mxu1 %vm532_vm1, %v4602_v3  ;;  %3787 = vmatmul.mubr.msk.bf16.vlgmr.msra.gmra.mrb[0].mxu0 %vm532_vm1, %v4600_v21  ;;  %v4660_v3 = vpack.c.bf16 %v451_v52, %v449_v51  ;;  %v460_v39 = vrot.slane %v4644_v31, 1  ;;  %v1000_v51 = vrot.slane %v4461_v4, 2  ;;  %v964_v52 = vrot.slane %v4334_v6, 2 }
  0x3e   : > { %3819 = vmatpush3.bf16.msra.mxu0 %v4455_v0  ;;  %3790 = vmatprep.mubr.msk.bf16.mxu0 %vm532_vm1, %v4628_v44  ;;  %v4684_v0 = vld [vmem:[%s5764_s1 + $0x70] sm:$0xff]   ;;  %v4700_v44 = vpack.c.bf16 %v4447_v62, %v4440_v59  ;;  %v965_v59 = vrot.slane %v4337_v7, 2  ;;  %v967_v62 = vrot.slane %v4340_v8, 2  ;;  %v4730_v4 = vpack.c.bf16 %v4491_v29, %v4484_v24 }
  0x3f   : > { %5809 = vst [vmem:[#allocation16_spill] sm:$0xff] %v4660_v3  ;;  %3820 = vmatprep.subr.bf16.mxu0 %v4221_v12  ;;  %v461_v17 = vsel %vm386_vm0, %v458_v10, %v460_v39  ;;  %v465_v10 = vrot.slane %v4711_v42, 1  ;;  %v4740_v39 = vpack.c.bf16 %v4521_v14, %v4513_v49  ;;  %v1003_v40 = vsel %vm963_vm2, %v1000_v51, %v1002_v16 }
  0x40   : > { %v4734_v8 = vpack.c.bf16 %v461_v17, %v459_v63  ;;  %v4770_v63 = vsel %vm963_vm2, %v964_v52, %v965_v59  ;;  %v4773_v17 = vsel %vm963_vm2, %v965_v59, %v967_v62  ;;  %v4775_v16 = vpack.c.bf16 %v998_v25, %v996_v5 }
  0x41   : > { %v1005_v52 = vrot.slane %v4491_v29, 2  ;;  %v1007_v21 = vrot.slane %v4501_v38, 2  ;;  %v466_v59 = vsel %vm386_vm0, %v463_v26, %v465_v10  ;;  %v1010_v62 = vrot.slane %v4521_v14, 2 }
  0x42   : > { %3821 = vmatpush3.bf16.msra.mxu0 %v4221_v12  ;;  %v1001_v12 = vsel %vm963_vm2, %v999_v55, %v1000_v51  ;;  %v4763_v55 = vpack.c.bf16 %v4641_v22, %v4634_v11  ;;  %v4767_v51 = vpack.c.bf16 %v4708_v1, %v4696_v41  ;;  %v1012_v5 = vrot.slane %v4526_v50, 2 }
  0x43   : > { %3854 = vmatprep.subr.bf16.mxu0 %v4684_v0  ;;  %v1008_v25 = vsel %vm963_vm2, %v1005_v52, %v1007_v21  ;;  %v1017_v21 = vrot.slane %v4542_v60, 2 }
  0x44   : > { %3627 = vmatmul.mubr.msk.bf16.gmra.mrb[20].mxu1 %vm532_vm1, %v4649_v28  ;;  %v1081_v28 = vpack.c.bf16 %v4773_v17, %v4770_v63  ;;  %v1013_v14 = vsel %vm963_vm2, %v1010_v62, %v1012_v5  ;;  %v1032_v5 = vrot.slane %v4620_v57, 2  ;;  %v5814_v63 = vld [vmem:[#allocation14_spill] sm:$0xff] }
  0x45   : > { %3630 = vmatprep.mubr.msk.bf16.mxu1 %vm532_vm1, %v4660_v3  ;;  %3791 = vmatmul.mubr.msk.bf16.gmra.mrb[4].mxu0 %vm532_vm1, %v4691_v36  ;;  %v1004_v3 = vrot.slane %v4484_v24, 2  ;;  %v464_v36 = vsel %vm386_vm0, %v462_v2, %v463_v26  ;;  %v1009_v24 = vrot.slane %v4513_v49, 2  ;;  %v1022_v26 = vrot.slane %v4564_v35, 2  ;;  %v5816_v17 = vld [vmem:[#allocation18_spill] sm:$0xff] }
  0x46   : > { %3794 = vmatprep.mubr.msk.bf16.mxu0 %vm532_vm1, %v4693_v37  ;;  %v4782_v37 = vpack.c.bf16 %v1003_v40, %v1001_v12  ;;  %v4797_v29 = vpack.c.bf16 %v466_v59, %v464_v36  ;;  %v322_v12 = vpack.c.bf16 %v4337_v7, %v4334_v6  ;;  %v1014_v36 = vrot.slane %v4531_v53, 2 }
  0x47   : > { %v1006_v38 = vsel %vm963_vm2, %v1004_v3, %v1005_v52  ;;  %v1011_v49 = vsel %vm963_vm2, %v1009_v24, %v1010_v62  ;;  %v1015_v3 = vrot.slane %v4534_v54, 2  ;;  %v1019_v6 = vrot.slane %v4553_v20, 2  ;;  %v4222_v20 = vld [vmem:[%s5764_s1 + $0x28] sm:$0xff]  }
  0x48   : > { %v4805_v50 = vpack.c.bf16 %v1008_v25, %v1006_v38  ;;  %v4809_v2 = vpack.c.bf16 %v1013_v14, %v1011_v49  ;;  %v1020_v7 = vrot.slane %v4557_v27, 2  ;;  %v1024_v40 = vrot.slane %v4573_v48, 2  ;;  %v4847_v48 = vld [vmem:[%s5764_s1 + $0x30] sm:$0xff]  }
  0x49   : > { %v1016_v53 = vsel %vm963_vm2, %v1014_v36, %v1015_v3  ;;  %v1018_v54 = vsel %vm963_vm2, %v1015_v3, %v1017_v21  ;;  %v1025_v52 = vrot.slane %v4582_v23, 2  ;;  %v1027_v59 = vrot.slane %v4585_v61, 2  ;;  %v312_v21 = vld [vmem:[%s4331_s8 + $0x180] sm:$0xff] }
  0x4a   : > { %v1021_v60 = vsel %vm963_vm2, %v1019_v6, %v1020_v7  ;;  %v1023_v10 = vsel %vm963_vm2, %v1020_v7, %v1022_v26  ;;  %v4829_v27 = vpack.c.bf16 %v1018_v54, %v1016_v53  ;;  %v1029_v24 = vrot.slane %v4611_v9, 2  ;;  %v314_v6 = vld [vmem:[%s4331_s8 + $0x190] sm:$0x3] }
  0x4b   : > { %v4833_v35 = vpack.c.bf16 %v1023_v10, %v1021_v60  ;;  %v1030_v62 = vrot.slane %v4614_v43, 2  ;;  %v1028_v9 = vsel %vm963_vm2, %v1025_v52, %v1027_v59  ;;  %v1034_v38 = vrot.slane %v4634_v11, 2 }
  0x4c   : > { %3631 = vmatmul.mubr.msk.bf16.gmra.mrb[24].mxu1 %vm532_vm1, %v4721_v19  ;;  %v1035_v25 = vrot.slane %v4641_v22, 2  ;;  %v1039_v49 = vrot.slane %v4696_v41, 2  ;;  %v1040_v14 = vrot.slane %v4708_v1, 2  ;;  %v1042_v36 = vrot.slane %v4711_v42, 2  ;;  %v313_v41 = vld [vmem:[%s4331_s8 + $0x188] sm:$0xff] }
  0x4d   : > { %3634 = vmatprep.mubr.msk.bf16.mxu1 %vm532_vm1, %v4734_v8  ;;  %3795 = vmatmul.mubr.msk.bf16.gmra.mrb[8].mxu0 %vm532_vm1, %v4775_v16  ;;  %v1031_v23 = vsel %vm963_vm2, %v1029_v24, %v1030_v62  ;;  %v1033_v61 = vsel %vm963_vm2, %v1030_v62, %v1032_v5  ;;  %v1788_v7 = vrot.slane %v312_v21, 2  ;;  %v1789_v26 = vrot.slane %v313_v41, 2  ;;  %v4225_v5 = vld [vmem:[%s5764_s1 + $0x78] sm:$0xff]  }
  0x4e   : > { %3798 = vmatprep.mubr.msk.bf16.mxu0 %vm532_vm1, %v4782_v37  ;;  %v4862_v57 = vpack.c.bf16 %v1033_v61, %v1031_v23  ;;  %v1036_v11 = vsel %vm963_vm2, %v1034_v38, %v1035_v25  ;;  %v1043_v3 = vsel %vm963_vm2, %v1040_v14, %v1042_v36  ;;  %v1791_v53 = vrot.slane %v314_v6, 2  ;;  %v315_v23 = vld [vmem:[%s4331_s8 + $0x198] sm:$0xff]  ;;  %v316_v61 = vld [vmem:[%s4331_s8 + $0x1a0] sm:$0xff] }
  0x4f   : > { %v1567_v54 = vrot.slane %v312_v21, 1  ;;  %v1568_v60 = vrot.slane %v313_v41, 1  ;;  %v1570_v10 = vrot.slane %v314_v6, 1  ;;  %v2447_v38 = vrot.slane %v315_v23, 2  ;;  %v5820_v6 = vld [vmem:[#allocation7_spill] sm:$0xff] }
  0x51   : > { %v1571_v59 = vsel %vm386_vm0, %v1568_v60, %v1570_v10  ;;  %v5826_v10 = vld [vmem:[#allocation3_spill] sm:$0xff] }
  0x54   : > { %3635 = vmatmul.mubr.msk.bf16.gmra.mrb[28].mxu1 %vm532_vm1, %v4797_v29 }
  0x55   : > { %3642 = vmatprep.mubr.msk.bf16.mxu1 %vm532_vm1, %v322_v12  ;;  %3799 = vmatmul.mubr.msk.bf16.gmra.mrb[12].mxu0 %vm532_vm1, %v4805_v50  ;;  %v1037_v12 = vrot.slane %v4644_v31, 2  ;;  %v1041_v31 = vsel %vm963_vm2, %v1039_v49, %v1040_v14  ;;  %v2014_v14 = vpack.c.bf16 %v316_v61, %v315_v23 }
  0x56   : > { %3802 = vmatprep.mubr.msk.bf16.mxu0 %vm532_vm1, %v4809_v2  ;;  %v4887_v42 = vpack.c.bf16 %v1043_v3, %v1041_v31  ;;  %v5817_v31 = vld [vmem:[#allocation4_spill] sm:$0xff]  ;;  %v4228_v3 = vld [vmem:[%s5764_s1 + $0x88] sm:$0xff]  }
  0x57   : > { %v1038_v22 = vsel %vm963_vm2, %v1035_v25, %v1037_v12  ;;  %v2448_v25 = vrot.slane %v316_v61, 2  ;;  %v317_v12 = vld [vmem:[%s4331_s8 + $0x1a8] sm:$0x3] }
  0x58   : > { %v4883_v1 = vpack.c.bf16 %v1038_v22, %v1036_v11  ;;  %v2450_v49 = vrot.slane %v317_v12, 2 }
  0x59   : > { %v4989_v36 = vsel %vm963_vm2, %v2447_v38, %v2448_v25 }
  0x5a   : > { %v4992_v11 = vsel %vm963_vm2, %v2448_v25, %v2450_v49 }
  0x5b   : > { %v2459_v22 = vpack.c.bf16 %v4992_v11, %v4989_v36 }
  0x5c   : > { %3643 = vmatmul.mubr.msk.bf16.vlgmr.msra.gmra.mrb[0].mxu1 %vm532_vm1, %v4357_v15 }
  0x5d   : > { %3675 = vmatpush3.bf16.msra.mxu1 %v4496_v30  ;;  %3646 = vmatprep.mubr.msk.bf16.mxu1 %vm532_vm1, %v4624_v58  ;;  %v1026_v30 = vsel %vm963_vm2, %v1024_v40, %v1025_v52  ;;  %v1792_v40 = vsel %vm963_vm2, %v1789_v26, %v1791_v53  ;;  %v1569_v52 = vsel %vm386_vm0, %v1567_v54, %v1568_v60  ;;  %v5823_v53 = vld [vmem:[#allocation10_spill] sm:$0xff]  ;;  %v5824_v54 = vld [vmem:[#allocation11_spill] sm:$0xff]  ;;  %v5825_v60 = vld [vmem:[#allocation13_spill] sm:$0xff] }
  0x5e   : > { %3676 = vmatprep.subr.bf16.mxu1 %v4222_v20  ;;  %3803 = vmatmul.mubr.msk.bf16.gmra.mrb[16].mxu0 %vm532_vm1, %v4829_v27  ;;  %v4858_v43 = vpack.c.bf16 %v1028_v9, %v1026_v30  ;;  %v4899_v24 = vpack.c.bf16 %v1571_v59, %v1569_v52  ;;  %v4227_v30 = vld [vmem:[%s5764_s1 + $0x80] sm:$0xff]   ;;  %v5812_v9 = vld [vmem:[#allocation12_spill] sm:$0xff] }
  0x5f   : > { %3806 = vmatprep.mubr.msk.bf16.mxu0 %vm532_vm1, %v4833_v35 }
  0x61   : > { %3677 = vmatpush3.bf16.msra.mxu1 %v4222_v20  ;;  %v1790_v20 = vsel %vm963_vm2, %v1788_v7, %v1789_v26  ;;  %v5821_v7 = vld [vmem:[#allocation8_spill] sm:$0xff]  ;;  %v5822_v26 = vld [vmem:[#allocation9_spill] sm:$0xff] }
  0x62   : > { %3710 = vmatprep.subr.bf16.mxu1 %v4847_v48  ;;  %v4901_v62 = vpack.c.bf16 %v1792_v40, %v1790_v20  ;;  %v5827_v20 = vld [vmem:[#allocation15_spill] sm:$0xff]  ;;  %v2229_v40 = vrot.slane %v317_v12, 1 }
  0x64   : > { %3647 = vmatmul.mubr.msk.bf16.gmra.mrb[4].mxu1 %vm532_vm1, %v4655_v18 }
  0x65   : > { %3650 = vmatprep.mubr.msk.bf16.mxu1 %vm532_vm1, %v4665_v45 }
  0x66   : > { %3807 = vmatmul.mubr.msk.bf16.gmra.mrb[20].mxu0 %vm532_vm1, %v4858_v43 }
  0x67   : > { %3810 = vmatprep.mubr.msk.bf16.mxu0 %vm532_vm1, %v4862_v57 }
  0x6c   : > { %3651 = vmatmul.mubr.msk.bf16.gmra.mrb[8].mxu1 %vm532_vm1, %v4679_v33 }
  0x6d   : > { %3654 = vmatprep.mubr.msk.bf16.mxu1 %vm532_vm1, %v4700_v44 }
  0x6e   : > { %3811 = vmatmul.mubr.msk.bf16.gmra.mrb[24].mxu0 %vm532_vm1, %v4883_v1 }
  0x6f   : > { %3814 = vmatprep.mubr.msk.bf16.mxu0 %vm532_vm1, %v4887_v42 }
  0x74   : > { %3655 = vmatmul.mubr.msk.bf16.gmra.mrb[12].mxu1 %vm532_vm1, %v4715_v47 }
  0x75   : > { %3658 = vmatprep.mubr.msk.bf16.mxu1 %vm532_vm1, %v4730_v4 }
  0x76   : > { %3815 = vmatmul.mubr.msk.bf16.gmra.mrb[28].mxu0 %vm532_vm1, %v4901_v62 }
  0x77   : > { %3822 = vmatprep.mubr.msk.bf16.mxu0 %vm532_vm1, %v4624_v58 }
  0x7c   : > { %3659 = vmatmul.mubr.msk.bf16.gmra.mrb[16].mxu1 %vm532_vm1, %v4740_v39 }
  0x7d   : > { %3662 = vmatprep.mubr.msk.bf16.mxu1 %vm532_vm1, %v4747_v46 }
  0x7e   : > { %3823 = vmatmul.mubr.msk.bf16.vlgmr.msra.gmra.mrb[0].mxu0 %vm532_vm1, %v4655_v18 }
  0x7f   : > { %3855 = vmatpush3.bf16.msra.mxu0 %v4684_v0  ;;  %3826 = vmatprep.mubr.msk.bf16.mxu0 %vm532_vm1, %v4665_v45  ;;  %v4226_v0 = vld [vmem:[%s5764_s1 + $0x38] sm:$0xff]  }
  0x80   : > { %3856 = vmatprep.subr.bf16.mxu0 %v4225_v5 }
  0x83   : > { %3857 = vmatpush3.bf16.msra.mxu0 %v4225_v5 }
  0x84   : > { %3663 = vmatmul.mubr.msk.bf16.gmra.mrb[20].mxu1 %vm532_vm1, %v4751_v32  ;;  %3890 = vmatprep.subr.bf16.mxu0 %v4227_v30 }
  0x85   : > { %3666 = vmatprep.mubr.msk.bf16.mxu1 %vm532_vm1, %v4755_v13 }
  0x86   : > { %3827 = vmatmul.mubr.msk.bf16.gmra.mrb[4].mxu0 %vm532_vm1, %v4679_v33 }
  0x87   : > { %3830 = vmatprep.mubr.msk.bf16.mxu0 %vm532_vm1, %v4700_v44 }
  0x8c   : > { %3667 = vmatmul.mubr.msk.bf16.gmra.mrb[24].mxu1 %vm532_vm1, %v4759_v56 }
  0x8d   : > { %3670 = vmatprep.mubr.msk.bf16.mxu1 %vm532_vm1, %v4763_v55 }
  0x8e   : > { %3831 = vmatmul.mubr.msk.bf16.gmra.mrb[8].mxu0 %vm532_vm1, %v4715_v47 }
  0x8f   : > { %3834 = vmatprep.mubr.msk.bf16.mxu0 %vm532_vm1, %v4730_v4 }
  0x94   : > { %3671 = vmatmul.mubr.msk.bf16.gmra.mrb[28].mxu1 %vm532_vm1, %v4767_v51 }
  0x95   : > { %3678 = vmatprep.mubr.msk.bf16.mxu1 %vm532_vm1, %v1081_v28  ;;  %v5813_v28 = vld [vmem:[#allocation2_spill] sm:$0xff] }
  0x96   : > { %3835 = vmatmul.mubr.msk.bf16.gmra.mrb[12].mxu0 %vm532_vm1, %v4740_v39 }
  0x97   : > { %3838 = vmatprep.mubr.msk.bf16.mxu0 %vm532_vm1, %v4747_v46 }
  0x9c   : > { %3679 = vmatmul.mubr.msk.bf16.vlgmr.msra.gmra.mrb[0].mxu1 %vm532_vm1, %v4561_v34  ;;  %v5815_v34 = vld [vmem:[#allocation17_spill] sm:$0xff] }
  0x9d   : > { %3711 = vmatpush3.bf16.msra.mxu1 %v4847_v48  ;;  %3682 = vmatprep.mubr.msk.bf16.mxu1 %vm532_vm1, %v5812_v9  ;;  %v4975_v48 = vpack.c.bf16 %v313_v41, %v312_v21  ;;  %v5818_v21 = vld [vmem:[#allocation5_spill] sm:$0xff]  ;;  %v5819_v41 = vld [vmem:[#allocation6_spill] sm:$0xff] }
  0x9e   : > { %3712 = vmatprep.subr.bf16.mxu1 %v4226_v0  ;;  %3839 = vmatmul.mubr.msk.bf16.gmra.mrb[16].mxu0 %vm532_vm1, %v4751_v32 }
  0x9f   : > { %3842 = vmatprep.mubr.msk.bf16.mxu0 %vm532_vm1, %v4755_v13 }
  0xa1   : > { %3713 = vmatpush3.bf16.msra.mxu1 %v4226_v0 }
  0xa2   : > { %3926 = vmatprep.subr.bf16.mxu1 %v5813_v28 }
  0xa4   : > { %3683 = vmatmul.mubr.msk.bf16.gmra.mrb[4].mxu1 %vm532_vm1, %v5814_v63 }
  0xa5   : > { %3686 = vmatprep.mubr.msk.bf16.mxu1 %vm532_vm1, %v5815_v34 }
  0xa6   : > { %3843 = vmatmul.mubr.msk.bf16.gmra.mrb[20].mxu0 %vm532_vm1, %v4759_v56 }
  0xa7   : > { %3846 = vmatprep.mubr.msk.bf16.mxu0 %vm532_vm1, %v4763_v55 }
  0xac   : > { %3687 = vmatmul.mubr.msk.bf16.gmra.mrb[8].mxu1 %vm532_vm1, %v5816_v17 }
  0xad   : > { %3690 = vmatprep.mubr.msk.bf16.mxu1 %vm532_vm1, %v4775_v16 }
  0xae   : > { %3847 = vmatmul.mubr.msk.bf16.gmra.mrb[24].mxu0 %vm532_vm1, %v4767_v51 }
  0xaf   : > { %3850 = vmatprep.mubr.msk.bf16.mxu0 %vm532_vm1, %v4975_v48 }
  0xb4   : > { %3691 = vmatmul.mubr.msk.bf16.gmra.mrb[12].mxu1 %vm532_vm1, %v4782_v37 }
  0xb5   : > { %3694 = vmatprep.mubr.msk.bf16.mxu1 %vm532_vm1, %v4805_v50 }
  0xb6   : > { %3851 = vmatmul.mubr.msk.bf16.gmra.mrb[28].mxu0 %vm532_vm1, %v2014_v14 }
  0xb7   : > { %3858 = vmatprep.mubr.msk.bf16.mxu0 %vm532_vm1, %v5817_v31 }
  0xbc   : > { %3695 = vmatmul.mubr.msk.bf16.gmra.mrb[16].mxu1 %vm532_vm1, %v4809_v2 }
  0xbd   : > { %3698 = vmatprep.mubr.msk.bf16.mxu1 %vm532_vm1, %v4829_v27 }
  0xbe   : > { %3859 = vmatmul.mubr.msk.bf16.vlgmr.msra.gmra.mrb[0].mxu0 %vm532_vm1, %v5818_v21 }
  0xbf   : > { %3891 = vmatpush3.bf16.msra.mxu0 %v4227_v30  ;;  %3862 = vmatprep.mubr.msk.bf16.mxu0 %vm532_vm1, %v5819_v41 }
  0xc0   : > { %3892 = vmatprep.subr.bf16.mxu0 %v4228_v3 }
  0xc3   : > { %3893 = vmatpush3.bf16.msra.mxu0 %v4228_v3 }
  0xc4   : > { %3699 = vmatmul.mubr.msk.bf16.gmra.mrb[20].mxu1 %vm532_vm1, %v4833_v35 }
  0xc5   : > { %3702 = vmatprep.mubr.msk.bf16.mxu1 %vm532_vm1, %v4858_v43 }
  0xc6   : > { %3863 = vmatmul.mubr.msk.bf16.gmra.mrb[4].mxu0 %vm532_vm1, %v5820_v6 }
  0xc7   : > { %3866 = vmatprep.mubr.msk.bf16.mxu0 %vm532_vm1, %v5821_v7 }
  0xcc   : > { %3703 = vmatmul.mubr.msk.bf16.gmra.mrb[24].mxu1 %vm532_vm1, %v4862_v57 }
  0xcd   : > { %3706 = vmatprep.mubr.msk.bf16.mxu1 %vm532_vm1, %v4883_v1 }
  0xce   : > { %3867 = vmatmul.mubr.msk.bf16.gmra.mrb[8].mxu0 %vm532_vm1, %v5822_v26 }
  0xcf   : > { %3870 = vmatprep.mubr.msk.bf16.mxu0 %vm532_vm1, %v5823_v53 }
  0xd4   : > { %3707 = vmatmul.mubr.msk.bf16.gmra.mrb[28].mxu1 %vm532_vm1, %v4887_v42 }
  0xd5   : > { %3714 = vmatprep.mubr.msk.bf16.mxu1 %vm532_vm1, %v4357_v15  ;;  %v5828_v15 = vld [vmem:[#allocation16_spill] sm:$0xff] }
  0xd6   : > { %3871 = vmatmul.mubr.msk.bf16.gmra.mrb[12].mxu0 %vm532_vm1, %v5824_v54 }
  0xd7   : > { %3874 = vmatprep.mubr.msk.bf16.mxu0 %vm532_vm1, %v5825_v60 }
  0xdc   : > { %3715 = vmatmul.mubr.msk.bf16.vlgmr.msra.gmra.mrb[0].mxu1 %vm532_vm1, %v4624_v58  ;;  %v2226_v58 = vrot.slane %v315_v23, 1 }
  0xdd   : > { %3928 = vmatpush3.bf16.msra.mxu1 %v5813_v28  ;;  %3718 = vmatprep.mubr.msk.bf16.mxu1 %vm532_vm1, %v4655_v18  ;;  %v2227_v18 = vrot.slane %v316_v61, 1 }
  0xde   : > { %3927 = vmatprep.subr.bf16.mxu1 %v5826_v10  ;;  %3875 = vmatmul.mubr.msk.bf16.gmra.mrb[16].mxu0 %vm532_vm1, %v5827_v20 }
  0xdf   : > { %3878 = vmatprep.mubr.msk.bf16.mxu0 %vm532_vm1, %v5828_v15 }
  0xe1   : > { %3929 = vmatpush3.bf16.msra.mxu1 %v5826_v10 }
  0xe4   : > { %3719 = vmatmul.mubr.msk.bf16.gmra.mrb[4].mxu1 %vm532_vm1, %v4665_v45  ;;  %v2228_v45 = vsel %vm386_vm0, %v2226_v58, %v2227_v18 }
  0xe5   : > { %3722 = vmatprep.mubr.msk.bf16.mxu1 %vm532_vm1, %v4679_v33  ;;  %v2230_v33 = vsel %vm386_vm0, %v2227_v18, %v2229_v40 }
  0xe6   : > { %3879 = vmatmul.mubr.msk.bf16.gmra.mrb[20].mxu0 %vm532_vm1, %v4721_v19  ;;  %v2238_v52 = vpack.c.bf16 %v2230_v33, %v2228_v45 }
  0xe7   : > { %3882 = vmatprep.mubr.msk.bf16.mxu0 %vm532_vm1, %v4734_v8 }
  0xec   : > { %3723 = vmatmul.mubr.msk.bf16.gmra.mrb[8].mxu1 %vm532_vm1, %v4700_v44 }
  0xed   : > { %3726 = vmatprep.mubr.msk.bf16.mxu1 %vm532_vm1, %v4715_v47 }
  0xee   : > { %3883 = vmatmul.mubr.msk.bf16.gmra.mrb[24].mxu0 %vm532_vm1, %v4797_v29 }
  0xef   : > { %3886 = vmatprep.mubr.msk.bf16.mxu0 %vm532_vm1, %v4899_v24 }
  0xf4   : > { %3727 = vmatmul.mubr.msk.bf16.gmra.mrb[12].mxu1 %vm532_vm1, %v4730_v4 }
  0xf5   : > { %3730 = vmatprep.mubr.msk.bf16.mxu1 %vm532_vm1, %v4740_v39 }
  0xf6   : > { %3887 = vmatmul.mubr.msk.bf16.gmra.mrb[28].mxu0 %vm532_vm1, %v2238_v52 }
  0xf7   : > { %3894 = vmatprep.mubr.msk.bf16.mxu0 %vm532_vm1, %v5812_v9 }
  0xfc   : > { %3731 = vmatmul.mubr.msk.bf16.gmra.mrb[16].mxu1 %vm532_vm1, %v4747_v46 }
  0xfd   : > { %3734 = vmatprep.mubr.msk.bf16.mxu1 %vm532_vm1, %v4751_v32 }
  0xfe   : > { %3895 = vmatmul.mubr.msk.bf16.vlgmr.msra.gmra.mrb[0].mxu0 %vm532_vm1, %v5814_v63 }
  0xff   : > { %3898 = vmatprep.mubr.msk.bf16.mxu0 %vm532_vm1, %v5815_v34 }
 0x104   : > { %3735 = vmatmul.mubr.msk.bf16.gmra.mrb[20].mxu1 %vm532_vm1, %v4755_v13 }
 0x105   : > { %3738 = vmatprep.mubr.msk.bf16.mxu1 %vm532_vm1, %v4759_v56 }
 0x106   : > { %3899 = vmatmul.mubr.msk.bf16.gmra.mrb[4].mxu0 %vm532_vm1, %v5816_v17 }
 0x107   : > { %3902 = vmatprep.mubr.msk.bf16.mxu0 %vm532_vm1, %v4775_v16 }
 0x10c   : > { %3739 = vmatmul.mubr.msk.bf16.gmra.mrb[24].mxu1 %vm532_vm1, %v4763_v55 }
 0x10d   : > { %3742 = vmatprep.mubr.msk.bf16.mxu1 %vm532_vm1, %v4767_v51 }
 0x10e   : > { %3903 = vmatmul.mubr.msk.bf16.gmra.mrb[8].mxu0 %vm532_vm1, %v4782_v37 }
 0x10f   : > { %3906 = vmatprep.mubr.msk.bf16.mxu0 %vm532_vm1, %v4805_v50 }
 0x114   : > { %3743 = vmatmul.mubr.msk.bf16.gmra.mrb[28].mxu1 %vm532_vm1, %v4975_v48 }
 0x115   : > { %3766 = vmatprep.mubr.msk.bf16.mxu1 %vm532_vm1, %v5824_v54 }
 0x116   : > { %3907 = vmatmul.mubr.msk.bf16.gmra.mrb[12].mxu0 %vm532_vm1, %v4809_v2 }
 0x117   : > { %3910 = vmatprep.mubr.msk.bf16.mxu0 %vm532_vm1, %v4829_v27 }
 0x11c   : > { %3767 = vmatmul.mubr.msk.bf16.vlgmr.msra.gmra.mrb[16].mxu1 %vm532_vm1, %v5825_v60 }
 0x11d   : > { %3770 = vmatprep.mubr.msk.bf16.mxu1 %vm532_vm1, %v5827_v20 }
 0x11e   : > { %3911 = vmatmul.mubr.msk.bf16.gmra.mrb[16].mxu0 %vm532_vm1, %v4833_v35 }
 0x11f   : > { %3914 = vmatprep.mubr.msk.bf16.mxu0 %vm532_vm1, %v4858_v43 }
 0x124   : > { %3771 = vmatmul.mubr.msk.bf16.gmra.mrb[20].mxu1 %vm532_vm1, %v5828_v15 }
 0x125   : > { %3774 = vmatprep.mubr.msk.bf16.mxu1 %vm532_vm1, %v4721_v19 }
 0x126   : > { %3915 = vmatmul.mubr.msk.bf16.gmra.mrb[20].mxu0 %vm532_vm1, %v4862_v57 }
 0x127   : > { %3918 = vmatprep.mubr.msk.bf16.mxu0 %vm532_vm1, %v4883_v1 }
 0x12c   : > { %3775 = vmatmul.mubr.msk.bf16.gmra.mrb[24].mxu1 %vm532_vm1, %v4734_v8 }
 0x12d   : > { %3778 = vmatprep.mubr.msk.bf16.mxu1 %vm532_vm1, %v4797_v29 }
 0x12e   : > { %3919 = vmatmul.mubr.msk.bf16.gmra.mrb[24].mxu0 %vm532_vm1, %v4887_v42 }
 0x12f   : > { %3922 = vmatprep.mubr.msk.bf16.mxu0 %vm532_vm1, %v4901_v62 }
 0x134   : > { %3779 = vmatmul.mubr.msk.bf16.gmra.mrb[28].mxu1 %vm532_vm1, %v4899_v24 }
 0x136   : > { %3923 = vmatmul.mubr.msk.bf16.gmra.mrb[28].mxu0 %vm532_vm1, %v2459_v22 }
 0x1af   : > { %v3716_v44 = vpop.f32.mrb[0].mxu1 }
 0x1b0   : > { %v1405_v37 = vpop.f32.mrb[1].mxu1 }
 0x1b1   : > { %v3717_v47 = vpop.f32.mrb[2].mxu1 }
 0x1b2   : > { %v1408_v19 = vpop.f32.mrb[3].mxu1 }
 0x1b7   : > { %v3720_v4 = vpop.f32.mrb[4].mxu1 }
 0x1b8   : > { %v1421_v8 = vpop.f32.mrb[5].mxu1 }
 0x1b9   : > { %v3721_v39 = vpop.f32.mrb[6].mxu1 }
 0x1ba   : > { %v1424_v46 = vpop.f32.mrb[7].mxu1 }
 0x1bf   : > { %v3724_v32 = vpop.f32.mrb[8].mxu1 }
 0x1c0   : > { %v1437_v13 = vpop.f32.mrb[9].mxu1 }
 0x1c1   : > { %v3725_v56 = vpop.f32.mrb[10].mxu1 }
 0x1c2   : > { %v1440_v55 = vpop.f32.mrb[11].mxu1 }
 0x1c7   : > { %v3728_v51 = vpop.f32.mrb[12].mxu1 }
 0x1c8   : > { %v1453_v16 = vpop.f32.mrb[13].mxu1 }
 0x1c9   : > { %v3729_v29 = vpop.f32.mrb[14].mxu1 }
 0x1ca   : > { %v1456_v50 = vpop.f32.mrb[15].mxu1 }
 0x1d1   : > { %v3896_v2 = vpop.f32.mrb[0].mxu0 }
 0x1d2   : > { %v5134_v27 = vadd.f32 %v3896_v2, %v3716_v44  ;;  %v2509_v35 = vpop.f32.mrb[1].mxu0 }
 0x1d3   : > { %v5136_v43 = vadd.f32 %v2509_v35, %v1405_v37  ;;  %v3897_v57 = vpop.f32.mrb[2].mxu0 }
 0x1d4   : > { %v5138_v1 = vadd.f32 %v3897_v57, %v3717_v47  ;;  %v2512_v42 = vpop.f32.mrb[3].mxu0  ;;  %v2671_v30 = vsel %vm532_vm1, %v5134_v27, 0.0 }
 0x1d5   : > { %v5140_v59 = vadd.f32 %v2512_v42, %v1408_v19  ;;  %v2668_v24 = vsel %vm532_vm1, %v5136_v43, 0.0 }
 0x1d6   : > { %v2673_v34 = vsel %vm532_vm1, %v5138_v1, 0.0 }
 0x1d7   : > { %v2669_v62 = vsel %vm532_vm1, %v5140_v59, 0.0 }
 0x1d8   : > { %v2670_v5 = vadd.f32 %v2669_v62, %v2668_v24 }
 0x1d9   : > { %v3900_v0 = vpop.f32.mrb[4].mxu0 }
 0x1da   : > { %v2672_v9 = vadd.f32 %v2671_v30, %v2670_v5  ;;  %v5148_v28 = vadd.f32 %v3900_v0, %v3720_v4  ;;  %v2525_v63 = vpop.f32.mrb[5].mxu0 }
 0x1db   : > { %v5152_v17 = vadd.f32 %v2525_v63, %v1421_v8  ;;  %v3901_v48 = vpop.f32.mrb[6].mxu0 }
 0x1dc   : > { %v2674_v23 = vadd.f32 %v2673_v34, %v2672_v9  ;;  %v5154_v61 = vadd.f32 %v3901_v48, %v3721_v39  ;;  %v2528_v38 = vpop.f32.mrb[7].mxu0  ;;  %v2679_v11 = vsel %vm532_vm1, %v5148_v28, 0.0 }
 0x1dd   : > { %v2675_v25 = vsel %vm532_vm1, %v5152_v17, 0.0  ;;  %v5158_v12 = vadd.f32 %v2528_v38, %v1424_v46 }
 0x1de   : > { %v2676_v49 = vadd.f32 %v2675_v25, %v2674_v23  ;;  %v2681_v41 = vsel %vm532_vm1, %v5154_v61, 0.0 }
 0x1df   : > { %v2677_v14 = vsel %vm532_vm1, %v5158_v12, 0.0 }
 0x1e0   : > { %v2678_v36 = vadd.f32 %v2677_v14, %v2676_v49 }
 0x1e1   : > { %v3904_v22 = vpop.f32.mrb[8].mxu0 }
 0x1e2   : > { %v2680_v31 = vadd.f32 %v2679_v11, %v2678_v36  ;;  %v5164_v3 = vadd.f32 %v3904_v22, %v3724_v32  ;;  %v2541_v21 = vpop.f32.mrb[9].mxu0 }
 0x1e3   : > { %v5168_v6 = vadd.f32 %v2541_v21, %v1437_v13  ;;  %v3905_v7 = vpop.f32.mrb[10].mxu0 }
 0x1e4   : > { %v2682_v26 = vadd.f32 %v2681_v41, %v2680_v31  ;;  %v5170_v53 = vadd.f32 %v3905_v7, %v3725_v56  ;;  %v2544_v54 = vpop.f32.mrb[11].mxu0  ;;  %v2687_v18 = vsel %vm532_vm1, %v5164_v3, 0.0 }
 0x1e5   : > { %v2683_v60 = vsel %vm532_vm1, %v5168_v6, 0.0  ;;  %v5174_v10 = vadd.f32 %v2544_v54, %v1440_v55 }
 0x1e6   : > { %v2684_v20 = vadd.f32 %v2683_v60, %v2682_v26  ;;  %v2689_v44 = vsel %vm532_vm1, %v5170_v53, 0.0 }
 0x1e7   : > { %v2685_v15 = vsel %vm532_vm1, %v5174_v10, 0.0 }
 0x1e8   : > { %v2686_v58 = vadd.f32 %v2685_v15, %v2684_v20 }
 0x1e9   : > { %v3908_v40 = vpop.f32.mrb[12].mxu0 }
 0x1ea   : > { %v2688_v45 = vadd.f32 %v2687_v18, %v2686_v58  ;;  %v5180_v33 = vadd.f32 %v3908_v40, %v3728_v51  ;;  %v2557_v52 = vpop.f32.mrb[13].mxu0 }
 0x1eb   : > { %v5184_v37 = vadd.f32 %v2557_v52, %v1453_v16  ;;  %v3909_v47 = vpop.f32.mrb[14].mxu0 }
 0x1ec   : > { %v2690_v19 = vadd.f32 %v2689_v44, %v2688_v45  ;;  %v5186_v4 = vadd.f32 %v3909_v47, %v3729_v29  ;;  %v2560_v8 = vpop.f32.mrb[15].mxu0  ;;  %v2695_v16 = vsel %vm532_vm1, %v5180_v33, 0.0 }
 0x1ed   : > { %v2691_v39 = vsel %vm532_vm1, %v5184_v37, 0.0  ;;  %v5190_v46 = vadd.f32 %v2560_v8, %v1456_v50 }
 0x1ee   : > { %v2692_v32 = vadd.f32 %v2691_v39, %v2690_v19  ;;  %v2697_v50 = vsel %vm532_vm1, %v5186_v4, 0.0 }
 0x1ef   : > { %v3768_v13 = vpop.f32.mrb[16].mxu1  ;;  %v2693_v56 = vsel %vm532_vm1, %v5190_v46, 0.0 }
 0x1f0   : > { %v1693_v55 = vpop.f32.mrb[17].mxu1  ;;  %v2694_v51 = vadd.f32 %v2693_v56, %v2692_v32 }
 0x1f1   : > { %v3769_v2 = vpop.f32.mrb[18].mxu1  ;;  %v3912_v35 = vpop.f32.mrb[16].mxu0 }
 0x1f2   : > { %v1696_v29 = vpop.f32.mrb[19].mxu1  ;;  %v2696_v57 = vadd.f32 %v2695_v16, %v2694_v51  ;;  %v5196_v42 = vadd.f32 %v3912_v35, %v3768_v13  ;;  %v2573_v24 = vpop.f32.mrb[17].mxu0 }
 0x1f3   : > { %v5200_v62 = vadd.f32 %v2573_v24, %v1693_v55  ;;  %v3913_v5 = vpop.f32.mrb[18].mxu0 }
 0x1f4   : > { %v2698_v30 = vadd.f32 %v2697_v50, %v2696_v57  ;;  %v5202_v0 = vadd.f32 %v3913_v5, %v3769_v2  ;;  %v2576_v9 = vpop.f32.mrb[19].mxu0  ;;  %v2703_v36 = vsel %vm532_vm1, %v5196_v42, 0.0 }
 0x1f5   : > { %v2699_v63 = vsel %vm532_vm1, %v5200_v62, 0.0  ;;  %v5206_v34 = vadd.f32 %v2576_v9, %v1696_v29 }
 0x1f6   : > { %v2700_v48 = vadd.f32 %v2699_v63, %v2698_v30  ;;  %v2705_v7 = vsel %vm532_vm1, %v5202_v0, 0.0 }
 0x1f7   : > { %v3772_v23 = vpop.f32.mrb[20].mxu1  ;;  %v2701_v38 = vsel %vm532_vm1, %v5206_v34, 0.0 }
 0x1f8   : > { %v1709_v25 = vpop.f32.mrb[21].mxu1  ;;  %v2702_v49 = vadd.f32 %v2701_v38, %v2700_v48 }
 0x1f9   : > { %v3773_v14 = vpop.f32.mrb[22].mxu1  ;;  %v3916_v11 = vpop.f32.mrb[20].mxu0 }
 0x1fa   : > { %v1712_v22 = vpop.f32.mrb[23].mxu1  ;;  %v2704_v31 = vadd.f32 %v2703_v36, %v2702_v49  ;;  %v5212_v21 = vadd.f32 %v3916_v11, %v3772_v23  ;;  %v2589_v41 = vpop.f32.mrb[21].mxu0 }
 0x1fb   : > { %v5216_v26 = vadd.f32 %v2589_v41, %v1709_v25  ;;  %v3917_v54 = vpop.f32.mrb[22].mxu0 }
 0x1fc   : > { %v2706_v60 = vadd.f32 %v2705_v7, %v2704_v31  ;;  %v5218_v20 = vadd.f32 %v3917_v54, %v3773_v14  ;;  %v2592_v15 = vpop.f32.mrb[23].mxu0  ;;  %v2711_v8 = vsel %vm532_vm1, %v5212_v21, 0.0 }
 0x1fd   : > { %v2707_v58 = vsel %vm532_vm1, %v5216_v26, 0.0  ;;  %v5222_v18 = vadd.f32 %v2592_v15, %v1712_v22 }
 0x1fe   : > { %v2708_v40 = vadd.f32 %v2707_v58, %v2706_v60  ;;  %v2713_v51 = vsel %vm532_vm1, %v5218_v20, 0.0 }
 0x1ff   : > { %v3776_v45 = vpop.f32.mrb[24].mxu1  ;;  %v2709_v52 = vsel %vm532_vm1, %v5222_v18, 0.0 }
 0x200   : > { %v1725_v44 = vpop.f32.mrb[25].mxu1  ;;  %v2710_v47 = vadd.f32 %v2709_v52, %v2708_v40 }
 0x201   : > { %v3777_v19 = vpop.f32.mrb[26].mxu1  ;;  %v3920_v39 = vpop.f32.mrb[24].mxu0 }
 0x202   : > { %v1728_v32 = vpop.f32.mrb[27].mxu1  ;;  %v2712_v13 = vadd.f32 %v2711_v8, %v2710_v47  ;;  %v3954_v56 = vadd.f32 %v3920_v39, %v3776_v45  ;;  %v2605_v55 = vpop.f32.mrb[25].mxu0 }
 0x203   : > { %v3955_v2 = vadd.f32 %v2605_v55, %v1725_v44  ;;  %v3921_v16 = vpop.f32.mrb[26].mxu0 }
 0x204   : > { %v2714_v35 = vadd.f32 %v2713_v51, %v2712_v13  ;;  %v3956_v29 = vadd.f32 %v3921_v16, %v3777_v19  ;;  %v2608_v57 = vpop.f32.mrb[27].mxu0  ;;  %v2719_v38 = vsel %vm532_vm1, %v3954_v56, 0.0 }
 0x205   : > { %v2715_v24 = vsel %vm532_vm1, %v3955_v2, 0.0  ;;  %v3957_v50 = vadd.f32 %v2608_v57, %v1728_v32 }
 0x206   : > { %v2716_v5 = vadd.f32 %v2715_v24, %v2714_v35  ;;  %v2721_v22 = vsel %vm532_vm1, %v3956_v29, 0.0 }
 0x207   : > { %v3780_v30 = vpop.f32.mrb[28].mxu1  ;;  %v2717_v9 = vsel %vm532_vm1, %v3957_v50, 0.0 }
 0x208   : > { %v1741_v63 = vpop.f32.mrb[29].mxu1  ;;  %v2718_v48 = vadd.f32 %v2717_v9, %v2716_v5 }
 0x209   : > { %v3781_v23 = vpop.f32.mrb[30].mxu1  ;;  %v3924_v25 = vpop.f32.mrb[28].mxu0 }
 0x20a   : > { %v1744_v49 = vpop.f32.mrb[31].mxu1  ;;  %v2720_v14 = vadd.f32 %v2719_v38, %v2718_v48  ;;  %v3958_v36 = vadd.f32 %v3924_v25, %v3780_v30  ;;  %v2621_v11 = vpop.f32.mrb[29].mxu0 }
 0x20b   : > { %v3959_v31 = vadd.f32 %v2621_v11, %v1741_v63  ;;  %v3925_v41 = vpop.f32.mrb[30].mxu0 }
 0x20c   : > { %v2722_v7 = vadd.f32 %v2721_v22, %v2720_v14  ;;  %v3960_v54 = vadd.f32 %v3925_v41, %v3781_v23  ;;  %v2624_v60 = vpop.f32.mrb[31].mxu0  ;;  %v2727_v44 = vsel %vm532_vm1, %v3958_v36, 0.0 }
 0x20d   : > { %v2723_v15 = vsel %vm532_vm1, %v3959_v31, 0.0  ;;  %v3961_v58 = vadd.f32 %v2624_v60, %v1744_v49 }
 0x20e   : > { %v2724_v40 = vadd.f32 %v2723_v15, %v2722_v7  ;;  %v2729_v19 = vsel %vm532_vm1, %v3960_v54, 0.0 }
 0x20f   : > { %v2725_v45 = vsel %vm532_vm1, %v3961_v58, 0.0 }
 0x210   : > { %v2726_v52 = vadd.f32 %v2725_v45, %v2724_v40 }
 0x212   : > { %v2728_v47 = vadd.f32 %v2727_v44, %v2726_v52 }
 0x214   : > { %v2730_v8 = vadd.f32 %v2729_v19, %v2728_v47 }
 0x216   : > { %v2731_v39 = vrot.slane %v2730_v8, 4 }
 0x218   : > { %v2732_v32 = vadd.f32 %v2731_v39, %v2730_v8 }
 0x21a   : > { %v2733_v13 = vrot.slane %v2732_v32, 2 }
 0x21c   : > { %v2734_v55 = vadd.f32 %v2733_v13, %v2732_v32 }
 0x21e   : > { %v2735_v51 = vrot.slane %v2734_v55, 1 }
 0x220   : > { %v2736_v16 = vadd.f32 %v2735_v51, %v2734_v55 }
 0x222   : > { %v2738_v35 = vmul.f32 0.00390625, %v2736_v16 }
 0x224   : > { %v5239_v57 = vsub.f32 %v5174_v10, %v2738_v35  ;;  %v5242_v24 = vsub.f32 %v5170_v53, %v2738_v35  ;;  %v5245_v5 = vsub.f32 %v5184_v37, %v2738_v35  ;;  %v5248_v30 = vsub.f32 %v5190_v46, %v2738_v35 }
 0x225   : > { %v5251_v9 = vsub.f32 %v5180_v33, %v2738_v35  ;;  %v5254_v63 = vsub.f32 %v5186_v4, %v2738_v35  ;;  %v5257_v48 = vsub.f32 %v5200_v62, %v2738_v35  ;;  %v5260_v10 = vsub.f32 %v5206_v34, %v2738_v35 }
 0x226   : > { %v5263_v53 = vsub.f32 %v5196_v42, %v2738_v35  ;;  %v5266_v37 = vsub.f32 %v5202_v0, %v2738_v35  ;;  %v5269_v46 = vsub.f32 %v5216_v26, %v2738_v35  ;;  %v5272_v33 = vsub.f32 %v5222_v18, %v2738_v35 }
 0x227   : > { %v5275_v4 = vsub.f32 %v5212_v21, %v2738_v35  ;;  %v5278_v62 = vsub.f32 %v5218_v20, %v2738_v35  ;;  %v5280_v34 = vsub.f32 %v3955_v2, %v2738_v35  ;;  %v5282_v23 = vsub.f32 %v3957_v50, %v2738_v35 }
 0x228   : > { %v5284_v42 = vsub.f32 %v3954_v56, %v2738_v35  ;;  %v5286_v0 = vsub.f32 %v3956_v29, %v2738_v35  ;;  %v5288_v38 = vsub.f32 %v3959_v31, %v2738_v35  ;;  %v5290_v26 = vsub.f32 %v3961_v58, %v2738_v35 }
 0x229   : > { %v5292_v18 = vsub.f32 %v3958_v36, %v2738_v35  ;;  %v5294_v25 = vsub.f32 %v3960_v54, %v2738_v35  ;;  %v5297_v21 = vsub.f32 %v5136_v43, %v2738_v35  ;;  %v5300_v20 = vsub.f32 %v5140_v59, %v2738_v35 }
 0x22a   : > { %v5303_v2 = vsub.f32 %v5134_v27, %v2738_v35  ;;  %v5306_v56 = vsub.f32 %v5138_v1, %v2738_v35  ;;  %v5313_v49 = vsub.f32 %v5152_v17, %v2738_v35  ;;  %v5318_v59 = vsub.f32 %v5158_v12, %v2738_v35 }
 0x22b   : > { %v2771_v29 = vmul.f32 %v5297_v21, %v5297_v21  ;;  %v2772_v50 = vmul.f32 %v5300_v20, %v5300_v20  ;;  %v5325_v11 = vsub.f32 %v5148_v28, %v2738_v35  ;;  %v5331_v12 = vsub.f32 %v5154_v61, %v2738_v35 }
 0x22c   : > { %v2773_v43 = vmul.f32 %v5303_v2, %v5303_v2  ;;  %v2774_v27 = vmul.f32 %v5306_v56, %v5306_v56  ;;  %v2775_v17 = vmul.f32 %v5313_v49, %v5313_v49  ;;  %v2776_v41 = vmul.f32 %v5318_v59, %v5318_v59 }
 0x22d   : > { %v2803_v1 = vsel %vm532_vm1, %v2771_v29, 0.0  ;;  %v2804_v14 = vsel %vm532_vm1, %v2772_v50, 0.0  ;;  %v5337_v60 = vsub.f32 %v5168_v6, %v2738_v35  ;;  %v2777_v28 = vmul.f32 %v5325_v11, %v5325_v11 }
 0x22e   : > { %v2805_v36 = vadd.f32 %v2804_v14, %v2803_v1  ;;  %v2806_v22 = vsel %vm532_vm1, %v2773_v43, 0.0  ;;  %v2808_v7 = vsel %vm532_vm1, %v2774_v27, 0.0  ;;  %v2810_v15 = vsel %vm532_vm1, %v2775_v17, 0.0 }
 0x22f   : > { %v2778_v40 = vmul.f32 %v5331_v12, %v5331_v12  ;;  %v2812_v61 = vsel %vm532_vm1, %v2776_v41, 0.0  ;;  %v5346_v52 = vsub.f32 %v5164_v3, %v2738_v35  ;;  %v2779_v44 = vmul.f32 %v5337_v60, %v5337_v60 }
 0x230   : > { %v2807_v31 = vadd.f32 %v2806_v22, %v2805_v36  ;;  %v2814_v6 = vsel %vm532_vm1, %v2777_v28, 0.0  ;;  %v2780_v19 = vmul.f32 %v5239_v57, %v5239_v57  ;;  %v2782_v3 = vmul.f32 %v5242_v24, %v5242_v24 }
 0x231   : > { %v2816_v8 = vsel %vm532_vm1, %v2778_v40, 0.0  ;;  %v2781_v32 = vmul.f32 %v5346_v52, %v5346_v52  ;;  %v2818_v13 = vsel %vm532_vm1, %v2779_v44, 0.0  ;;  %v2783_v35 = vmul.f32 %v5245_v5, %v5245_v5 }
 0x232   : > { %v2809_v54 = vadd.f32 %v2808_v7, %v2807_v31  ;;  %v2820_v51 = vsel %vm532_vm1, %v2780_v19, 0.0  ;;  %v2784_v43 = vmul.f32 %v5248_v30, %v5248_v30  ;;  %v2824_v27 = vsel %vm532_vm1, %v2782_v3, 0.0 }
 0x233   : > { %v2822_v29 = vsel %vm532_vm1, %v2781_v32, 0.0  ;;  %v2785_v14 = vmul.f32 %v5251_v9, %v5251_v9  ;;  %v2826_v36 = vsel %vm532_vm1, %v2783_v35, 0.0  ;;  %v2786_v22 = vmul.f32 %v5254_v63, %v5254_v63 }
 0x234   : > { %v2811_v58 = vadd.f32 %v2810_v15, %v2809_v54  ;;  %v2828_v31 = vsel %vm532_vm1, %v2784_v43, 0.0  ;;  %v2787_v7 = vmul.f32 %v5257_v48, %v5257_v48  ;;  %v2788_v15 = vmul.f32 %v5260_v10, %v5260_v10 }
 0x235   : > { %v2830_v54 = vsel %vm532_vm1, %v2785_v14, 0.0 }
 0x236   : > { %v2813_v45 = vadd.f32 %v2812_v61, %v2811_v58  ;;  %v2832_v58 = vsel %vm532_vm1, %v2786_v22, 0.0  ;;  %v2789_v61 = vmul.f32 %v5263_v53, %v5263_v53 }
 0x238   : > { %v2815_v47 = vadd.f32 %v2814_v6, %v2813_v45  ;;  %v2834_v45 = vsel %vm532_vm1, %v2787_v7, 0.0  ;;  %v2790_v6 = vmul.f32 %v5266_v37, %v5266_v37 }
 0x23a   : > { %v2817_v39 = vadd.f32 %v2816_v8, %v2815_v47  ;;  %v2836_v47 = vsel %vm532_vm1, %v2788_v15, 0.0  ;;  %v2791_v8 = vmul.f32 %v5269_v46, %v5269_v46 }
 0x23c   : > { %v2819_v55 = vadd.f32 %v2818_v13, %v2817_v39  ;;  %v2838_v39 = vsel %vm532_vm1, %v2789_v61, 0.0  ;;  %v2792_v13 = vmul.f32 %v5272_v33, %v5272_v33 }
 0x23e   : > { %v2821_v16 = vadd.f32 %v2820_v51, %v2819_v55  ;;  %v2840_v55 = vsel %vm532_vm1, %v2790_v6, 0.0  ;;  %v2793_v51 = vmul.f32 %v5275_v4, %v5275_v4 }
 0x240   : > { %v2823_v50 = vadd.f32 %v2822_v29, %v2821_v16  ;;  %v2842_v16 = vsel %vm532_vm1, %v2791_v8, 0.0  ;;  %v2794_v29 = vmul.f32 %v5278_v62, %v5278_v62 }
 0x242   : > { %v2825_v1 = vadd.f32 %v2824_v27, %v2823_v50  ;;  %v2844_v50 = vsel %vm532_vm1, %v2792_v13, 0.0  ;;  %v2795_v27 = vmul.f32 %v5280_v34, %v5280_v34 }
 0x244   : > { %v2827_v17 = vadd.f32 %v2826_v36, %v2825_v1  ;;  %v2846_v1 = vsel %vm532_vm1, %v2793_v51, 0.0  ;;  %v2796_v36 = vmul.f32 %v5282_v23, %v5282_v23 }
 0x246   : > { %v2829_v41 = vadd.f32 %v2828_v31, %v2827_v17  ;;  %v2848_v17 = vsel %vm532_vm1, %v2794_v29, 0.0  ;;  %v2797_v31 = vmul.f32 %v5284_v42, %v5284_v42 }
 0x248   : > { %v2831_v28 = vadd.f32 %v2830_v54, %v2829_v41  ;;  %v2850_v41 = vsel %vm532_vm1, %v2795_v27, 0.0  ;;  %v2798_v54 = vmul.f32 %v5286_v0, %v5286_v0 }
 0x24a   : > { %v2833_v40 = vadd.f32 %v2832_v58, %v2831_v28  ;;  %v2852_v28 = vsel %vm532_vm1, %v2796_v36, 0.0  ;;  %v2799_v58 = vmul.f32 %v5288_v38, %v5288_v38 }
 0x24c   : > { %v2835_v44 = vadd.f32 %v2834_v45, %v2833_v40  ;;  %v2854_v40 = vsel %vm532_vm1, %v2797_v31, 0.0  ;;  %v2800_v45 = vmul.f32 %v5290_v26, %v5290_v26 }
 0x24e   : > { %v2837_v19 = vadd.f32 %v2836_v47, %v2835_v44  ;;  %v2856_v44 = vsel %vm532_vm1, %v2798_v54, 0.0  ;;  %v2801_v47 = vmul.f32 %v5292_v18, %v5292_v18 }
 0x250   : > { %v2839_v32 = vadd.f32 %v2838_v39, %v2837_v19  ;;  %v2858_v19 = vsel %vm532_vm1, %v2799_v58, 0.0  ;;  %v2802_v39 = vmul.f32 %v5294_v25, %v5294_v25 }
 0x252   : > { %v2841_v3 = vadd.f32 %v2840_v55, %v2839_v32  ;;  %v2860_v32 = vsel %vm532_vm1, %v2800_v45, 0.0  ;;  %v2862_v55 = vsel %vm532_vm1, %v2801_v47, 0.0  ;;  %v2864_v51 = vsel %vm532_vm1, %v2802_v39, 0.0 }
 0x254   : > { %v2843_v35 = vadd.f32 %v2842_v16, %v2841_v3 }
 0x256   : > { %v2845_v43 = vadd.f32 %v2844_v50, %v2843_v35 }
 0x258   : > { %v2847_v14 = vadd.f32 %v2846_v1, %v2845_v43 }
 0x25a   : > { %v2849_v22 = vadd.f32 %v2848_v17, %v2847_v14 }
 0x25c   : > { %v2851_v7 = vadd.f32 %v2850_v41, %v2849_v22 }
 0x25e   : > { %v2853_v15 = vadd.f32 %v2852_v28, %v2851_v7 }
 0x260   : > { %v2855_v61 = vadd.f32 %v2854_v40, %v2853_v15 }
 0x262   : > { %v2857_v6 = vadd.f32 %v2856_v44, %v2855_v61 }
 0x264   : > { %v2859_v8 = vadd.f32 %v2858_v19, %v2857_v6 }
 0x266   : > { %v2861_v13 = vadd.f32 %v2860_v32, %v2859_v8 }
 0x268   : > { %v2863_v3 = vadd.f32 %v2862_v55, %v2861_v13 }
 0x26a   : > { %v2865_v16 = vadd.f32 %v2864_v51, %v2863_v3 }
 0x26c   : > { %v2866_v35 = vrot.slane %v2865_v16, 4 }
 0x26e   : > { %v2867_v29 = vadd.f32 %v2866_v35, %v2865_v16 }
 0x270   : > { %v2868_v50 = vrot.slane %v2867_v29, 2 }
 0x272   : > { %v2869_v43 = vadd.f32 %v2868_v50, %v2867_v29  ;;  %v3436_v50 = vld [vmem:[%s5766_s3] ss:$0 sm:$0xff] }
 0x274   : > { %v2870_v27 = vrot.slane %v2869_v43, 1 }
 0x276   : > { %v2871_v1 = vadd.f32 %v2870_v27, %v2869_v43 }
 0x278   : > { %v2872_v14 = vmul.f32 0.00390625, %v2871_v1 }
 0x27a   : > { %v2873_v36 = vadd.f32 1e-05, %v2872_v14 }
 0x27c   : > { %4229 = vrsqrt.f32 %v2873_v36 }
 0x286   : > { %v4230_v17 = vpop.eup %4229 }
 0x287   : > { %v2896_v22 = vmul.f32 %v4230_v17, %v5272_v33  ;;  %v2897_v31 = vmul.f32 %v4230_v17, %v5275_v4  ;;  %v2898_v41 = vmul.f32 %v4230_v17, %v5278_v62  ;;  %v2899_v7 = vmul.f32 %v4230_v17, %v5280_v34 }
 0x288   : > { %v2900_v54 = vmul.f32 %v4230_v17, %v5282_v23  ;;  %v2901_v28 = vmul.f32 %v4230_v17, %v5284_v42  ;;  %v2902_v15 = vmul.f32 %v4230_v17, %v5286_v0  ;;  %v2903_v58 = vmul.f32 %v4230_v17, %v5288_v38 }
 0x289   : > { %v2904_v40 = vmul.f32 %v4230_v17, %v5290_v26  ;;  %v2905_v61 = vmul.f32 %v4230_v17, %v5292_v18  ;;  %v2906_v33 = vmul.f32 %v4230_v17, %v5294_v25  ;;  %v2875_v4 = vmul.f32 %v4230_v17, %v5297_v21 }
 0x28a   : > { %v2876_v62 = vmul.f32 %v4230_v17, %v5300_v20  ;;  %v2877_v34 = vmul.f32 %v4230_v17, %v5303_v2  ;;  %v2878_v23 = vmul.f32 %v4230_v17, %v5306_v56  ;;  %v2879_v42 = vmul.f32 %v4230_v17, %v5313_v49  ;;  %v3435_v56 = vld [vmem:[%s5765_s2] ss:$0 sm:$0xff] }
 0x28b   : > { %v2880_v0 = vmul.f32 %v4230_v17, %v5318_v59  ;;  %v2881_v38 = vmul.f32 %v4230_v17, %v5325_v11  ;;  %v2882_v26 = vmul.f32 %v4230_v17, %v5331_v12  ;;  %v2883_v18 = vmul.f32 %v4230_v17, %v5337_v60 }
 0x28c   : > { %v2884_v25 = vmul.f32 %v4230_v17, %v5239_v57  ;;  %v2885_v21 = vmul.f32 %v4230_v17, %v5346_v52  ;;  %v2886_v20 = vmul.f32 %v4230_v17, %v5242_v24  ;;  %v2887_v2 = vmul.f32 %v4230_v17, %v5245_v5 }
 0x28d   : > { %v2888_v49 = vmul.f32 %v4230_v17, %v5248_v30  ;;  %v2889_v59 = vmul.f32 %v4230_v17, %v5251_v9  ;;  %v2890_v11 = vmul.f32 %v4230_v17, %v5254_v63  ;;  %v2891_v12 = vmul.f32 %v4230_v17, %v5257_v48 }
 0x28e   : > { %v2892_v57 = vmul.f32 %v4230_v17, %v5260_v10  ;;  %v2893_v60 = vmul.f32 %v4230_v17, %v5263_v53  ;;  %v2894_v24 = vmul.f32 %v4230_v17, %v5266_v37  ;;  %v2895_v5 = vmul.f32 %v4230_v17, %v5269_v46 }
 0x28f   : > { %v2914_v52 = vmul.f32 %v3435_v56, %v2875_v4  ;;  %v2915_v45 = vmul.f32 %v3435_v56, %v2876_v62  ;;  %v2916_v44 = vmul.f32 %v3435_v56, %v2877_v34  ;;  %v2917_v6 = vmul.f32 %v3435_v56, %v2878_v23 }
 0x290   : > { %v2918_v47 = vmul.f32 %v3435_v56, %v2879_v42  ;;  %v2919_v30 = vmul.f32 %v3435_v56, %v2880_v0  ;;  %v2920_v19 = vmul.f32 %v3435_v56, %v2881_v38  ;;  %v2921_v9 = vmul.f32 %v3435_v56, %v2882_v26 }
 0x291   : > { %v2922_v8 = vmul.f32 %v3435_v56, %v2883_v18  ;;  %v2923_v63 = vmul.f32 %v3435_v56, %v2884_v25  ;;  %v2924_v39 = vmul.f32 %v3435_v56, %v2885_v21  ;;  %v2925_v48 = vmul.f32 %v3435_v56, %v2886_v20 }
 0x292   : > { %v2926_v32 = vmul.f32 %v3435_v56, %v2887_v2  ;;  %v2927_v10 = vmul.f32 %v3435_v56, %v2888_v49  ;;  %v2928_v13 = vmul.f32 %v3435_v56, %v2889_v59  ;;  %v2929_v53 = vmul.f32 %v3435_v56, %v2890_v11 }
 0x293   : > { %v2930_v55 = vmul.f32 %v3435_v56, %v2891_v12  ;;  %v2931_v37 = vmul.f32 %v3435_v56, %v2892_v57  ;;  %v2932_v3 = vmul.f32 %v3435_v56, %v2893_v60  ;;  %v2933_v46 = vmul.f32 %v3435_v56, %v2894_v24 }
 0x294   : > { %v2934_v51 = vmul.f32 %v3435_v56, %v2895_v5  ;;  %v2935_v16 = vmul.f32 %v3435_v56, %v2896_v22  ;;  %v2936_v35 = vmul.f32 %v3435_v56, %v2897_v31  ;;  %v2937_v29 = vmul.f32 %v3435_v56, %v2898_v41 }
 0x295   : > { %v2938_v43 = vmul.f32 %v3435_v56, %v2899_v7  ;;  %v2939_v27 = vmul.f32 %v3435_v56, %v2900_v54  ;;  %v2940_v1 = vmul.f32 %v3435_v56, %v2901_v28  ;;  %v2941_v14 = vmul.f32 %v3435_v56, %v2902_v15 }
 0x296   : > { %v2942_v36 = vmul.f32 %v3435_v56, %v2903_v58  ;;  %v2943_v17 = vmul.f32 %v3435_v56, %v2904_v40  ;;  %v2944_v4 = vmul.f32 %v3435_v56, %v2905_v61  ;;  %v2945_v62 = vmul.f32 %v3435_v56, %v2906_v33 }
 0x297   : > { %v5460_v34 = vadd.f32 %v3436_v50, %v2914_v52  ;;  %v5462_v23 = vadd.f32 %v3436_v50, %v2915_v45  ;;  %v5464_v42 = vadd.f32 %v3436_v50, %v2916_v44  ;;  %v5466_v22 = vadd.f32 %v3436_v50, %v2917_v6 }
 0x298   : > { %v5468_v31 = vadd.f32 %v3436_v50, %v2918_v47  ;;  %v5470_v41 = vadd.f32 %v3436_v50, %v2919_v30  ;;  %v5472_v7 = vadd.f32 %v3436_v50, %v2920_v19  ;;  %v5474_v54 = vadd.f32 %v3436_v50, %v2921_v9 }
 0x299   : > { %v5476_v28 = vadd.f32 %v3436_v50, %v2922_v8  ;;  %v5478_v15 = vadd.f32 %v3436_v50, %v2923_v63  ;;  %v5480_v58 = vadd.f32 %v3436_v50, %v2924_v39  ;;  %v5482_v40 = vadd.f32 %v3436_v50, %v2925_v48 }
 0x29a   : > { %v5484_v61 = vadd.f32 %v3436_v50, %v2926_v32  ;;  %v5486_v33 = vadd.f32 %v3436_v50, %v2927_v10  ;;  %v5488_v0 = vadd.f32 %v3436_v50, %v2928_v13  ;;  %v5490_v38 = vadd.f32 %v3436_v50, %v2929_v53 }
 0x29b   : > { %v5492_v26 = vadd.f32 %v3436_v50, %v2930_v55  ;;  %v5494_v18 = vadd.f32 %v3436_v50, %v2931_v37  ;;  %v5496_v25 = vadd.f32 %v3436_v50, %v2932_v3  ;;  %v5498_v21 = vadd.f32 %v3436_v50, %v2933_v46 }
 0x29c   : > { %v5500_v20 = vadd.f32 %v3436_v50, %v2934_v51  ;;  %v5502_v2 = vadd.f32 %v3436_v50, %v2935_v16  ;;  %v5504_v56 = vadd.f32 %v3436_v50, %v2936_v35  ;;  %v5506_v49 = vadd.f32 %v3436_v50, %v2937_v29 }
 0x29d   : > { %v5508_v59 = vadd.f32 %v3436_v50, %v2938_v43  ;;  %v5510_v11 = vadd.f32 %v3436_v50, %v2939_v27  ;;  %v5512_v12 = vadd.f32 %v3436_v50, %v2940_v1  ;;  %v5514_v57 = vadd.f32 %v3436_v50, %v2941_v14 }
 0x29e   : > { %v5517_v60 = vadd.f32 %v3436_v50, %v2942_v36  ;;  %v5519_v24 = vadd.f32 %v3436_v50, %v2943_v17  ;;  %vm2985_vm3 = vcmp.ge.f32.partialorder %v5460_v34, 0.0  ;;  %vm2986_vm4 = vcmp.ge.f32.partialorder %v5462_v23, 0.0 }
 0x29f   : > { %vm2987_vm5 = vcmp.ge.f32.partialorder %v5464_v42, 0.0  ;;  %vm2988_vm6 = vcmp.ge.f32.partialorder %v5466_v22, 0.0  ;;  %vm2989_vm7 = vcmp.ge.f32.partialorder %v5468_v31, 0.0  ;;  %vm2990_vm8 = vcmp.ge.f32.partialorder %v5470_v41, 0.0 }
 0x2a0   : > { %vm2991_vm9 = vcmp.ge.f32.partialorder %v5472_v7, 0.0  ;;  %vm2992_vm10 = vcmp.ge.f32.partialorder %v5474_v54, 0.0  ;;  %v5536_v5 = vadd.f32 %v3436_v50, %v2944_v4  ;;  %v3017_v52 = vmul.f32 0.01, %v5460_v34 }
 0x2a1   : > { %v3018_v45 = vmul.f32 0.01, %v5462_v23  ;;  %v3019_v44 = vmul.f32 0.01, %v5464_v42  ;;  %v5545_v6 = vadd.f32 %v3436_v50, %v2945_v62  ;;  %vm3000_vm12 = vcmp.ge.f32.partialorder %v5490_v38, 0.0 }
 0x2a2   : > { %vm3001_vm13 = vcmp.ge.f32.partialorder %v5492_v26, 0.0  ;;  %v3020_v47 = vmul.f32 0.01, %v5466_v22  ;;  %v3021_v30 = vmul.f32 0.01, %v5468_v31  ;;  %vm3006_vm2 = vcmp.ge.f32.partialorder %v5502_v2, 0.0 }
 0x2a3   : > { %v3022_v19 = vmul.f32 0.01, %v5470_v41  ;;  %v3023_v9 = vmul.f32 0.01, %v5472_v7  ;;  %v3024_v8 = vmul.f32 0.01, %v5474_v54  ;;  %v3049_v39 = vsel %vm2985_vm3, %v5460_v34, %v3017_v52 }
 0x2a4   : > { %v3025_v63 = vmul.f32 0.01, %v5476_v28  ;;  %vm3007_vm14 = vcmp.ge.f32.partialorder %v5504_v56, 0.0  ;;  %v3026_v48 = vmul.f32 0.01, %v5478_v15  ;;  %v3050_v13 = vsel %vm2986_vm4, %v5462_v23, %v3018_v45  ;;  %3081 = vst.msk [vmem:[%s5534_s21] sm:$0xff] %vm532_vm1, %v3049_v39 }
 0x2a5   : > { %v3027_v32 = vmul.f32 0.01, %v5480_v58  ;;  %v3028_v10 = vmul.f32 0.01, %v5482_v40  ;;  %vm3011_vm3 = vcmp.ge.f32.partialorder %v5512_v12, 0.0  ;;  %vm3012_vm0 = vcmp.ge.f32.partialorder %v5514_v57, 0.0 }
 0x2a6   : > { %vm3014_vm11 = vcmp.ge.f32.partialorder %v5519_v24, 0.0  ;;  %v3029_v53 = vmul.f32 0.01, %v5484_v61  ;;  %v3030_v55 = vmul.f32 0.01, %v5486_v33  ;;  %v3051_v3 = vsel %vm2987_vm5, %v5464_v42, %v3019_v44  ;;  %3082 = vst.msk [vmem:[%s5534_s21 + $0x8] sm:$0xff] %vm532_vm1, %v3050_v13 }
 0x2a7   : > { %v3031_v37 = vmul.f32 0.01, %v5488_v0  ;;  %vm3015_vm4 = vcmp.ge.f32.partialorder %v5536_v5, 0.0  ;;  %vm3016_vm15 = vcmp.ge.f32.partialorder %v5545_v6, 0.0  ;;  %v3032_v46 = vmul.f32 0.01, %v5490_v38 }
 0x2a8   : > { %v3033_v51 = vmul.f32 0.01, %v5492_v26  ;;  %v3034_v16 = vmul.f32 0.01, %v5494_v18  ;;  %v3052_v35 = vsel %vm2988_vm6, %v5466_v22, %v3020_v47  ;;  %3083 = vst.msk [vmem:[%s5534_s21 + $0x10] sm:$0xff] %vm532_vm1, %v3051_v3  ;;  %v3053_v27 = vsel %vm2989_vm7, %v5468_v31, %v3021_v30 }
 0x2a9   : > { %v3035_v29 = vmul.f32 0.01, %v5496_v25  ;;  %v3036_v50 = vmul.f32 0.01, %v5498_v21  ;;  %v3037_v43 = vmul.f32 0.01, %v5500_v20  ;;  %v3054_v17 = vsel %vm2990_vm8, %v5470_v41, %v3022_v19 }
 0x2aa   : > { %3084 = vst.msk [vmem:[%s5534_s21 + $0x18] sm:$0xff] %vm532_vm1, %v3052_v35  ;;  %v3038_v1 = vmul.f32 0.01, %v5502_v2  ;;  %v3039_v14 = vmul.f32 0.01, %v5504_v56  ;;  %3085 = vst.msk [vmem:[%s5534_s21 + $0x20] sm:$0xff] %vm532_vm1, %v3053_v27  ;;  %v3055_v23 = vsel %vm2991_vm9, %v5472_v7, %v3023_v9  ;;  %v3056_v41 = vsel %vm2992_vm10, %v5474_v54, %v3024_v8 }
 0x2ab   : > { %v3040_v36 = vmul.f32 0.01, %v5506_v49  ;;  %v3041_v4 = vmul.f32 0.01, %v5508_v59  ;;  %v3042_v62 = vmul.f32 0.01, %v5510_v11 }
 0x2ac   : > { %v3043_v34 = vmul.f32 0.01, %v5512_v12  ;;  %3086 = vst.msk [vmem:[%s5534_s21 + $0x28] sm:$0xff] %vm532_vm1, %v3054_v17  ;;  %v3044_v42 = vmul.f32 0.01, %v5514_v57  ;;  %3087 = vst.msk [vmem:[%s5534_s21 + $0x30] sm:$0xff] %vm532_vm1, %v3055_v23 }
 0x2ad   : > { %v3045_v22 = vmul.f32 0.01, %v5517_v60  ;;  %v3046_v31 = vmul.f32 0.01, %v5519_v24  ;;  %v3047_v52 = vmul.f32 0.01, %v5536_v5 }
 0x2ae   : > { %v3048_v7 = vmul.f32 0.01, %v5545_v6  ;;  %vm5829_vm5 = vcmp.ge.f32.partialorder %v5476_v28, 0.0  ;;  %vm5830_vm6 = vcmp.ge.f32.partialorder %v5478_v15, 0.0  ;;  %3088 = vst.msk [vmem:[%s5534_s21 + $0x38] sm:$0xff] %vm532_vm1, %v3056_v41  ;;  %vm5831_vm7 = vcmp.ge.f32.partialorder %v5480_v58, 0.0 }
 0x2af   : > { %v3057_v45 = vsel %vm5829_vm5, %v5476_v28, %v3025_v63  ;;  %v3058_v44 = vsel %vm5830_vm6, %v5478_v15, %v3026_v48  ;;  %v3059_v54 = vsel %vm5831_vm7, %v5480_v58, %v3027_v32  ;;  %vm5832_vm8 = vcmp.ge.f32.partialorder %v5482_v40, 0.0 }
 0x2b0   : > { %v3060_v47 = vsel %vm5832_vm8, %v5482_v40, %v3028_v10  ;;  %vm5833_vm9 = vcmp.ge.f32.partialorder %v5484_v61, 0.0  ;;  %vm5834_vm10 = vcmp.ge.f32.partialorder %v5486_v33, 0.0  ;;  %3089 = vst.msk [vmem:[%s5534_s21 + $0x40] sm:$0xff] %vm532_vm1, %v3057_v45  ;;  %3090 = vst.msk [vmem:[%s5534_s21 + $0x48] sm:$0xff] %vm532_vm1, %v3058_v44  ;;  %vm5835_vm5 = vcmp.ge.f32.partialorder %v5488_v0, 0.0 }
 0x2b1   : > { %v3061_v30 = vsel %vm5833_vm9, %v5484_v61, %v3029_v53  ;;  %v3062_v28 = vsel %vm5834_vm10, %v5486_v33, %v3030_v55  ;;  %v3063_v15 = vsel %vm5835_vm5, %v5488_v0, %v3031_v37  ;;  %v3064_v58 = vsel %vm3000_vm12, %v5490_v38, %v3032_v46  ;;  %3091 = vst.msk [vmem:[%s5534_s21 + $0x50] sm:$0xff] %vm532_vm1, %v3059_v54 }
 0x2b2   : > { %v3065_v40 = vsel %vm3001_vm13, %v5492_v26, %v3033_v51  ;;  %vm5836_vm6 = vcmp.ge.f32.partialorder %v5494_v18, 0.0  ;;  %3092 = vst.msk [vmem:[%s5534_s21 + $0x58] sm:$0xff] %vm532_vm1, %v3060_v47  ;;  %3093 = vst.msk [vmem:[%s5534_s21 + $0x60] sm:$0xff] %vm532_vm1, %v3061_v30  ;;  %vm5837_vm12 = vcmp.ge.f32.partialorder %v5496_v25, 0.0  ;;  %vm5838_vm13 = vcmp.ge.f32.partialorder %v5498_v21, 0.0 }
 0x2b3   : > { %v3066_v61 = vsel %vm5836_vm6, %v5494_v18, %v3034_v16  ;;  %3094 = vst.msk [vmem:[%s5534_s21 + $0x68] sm:$0xff] %vm532_vm1, %v3062_v28  ;;  %v3067_v33 = vsel %vm5837_vm12, %v5496_v25, %v3035_v29  ;;  %v3068_v0 = vsel %vm5838_vm13, %v5498_v21, %v3036_v50  ;;  %vm5839_vm7 = vcmp.ge.f32.partialorder %v5500_v20, 0.0  ;;  %3095 = vst.msk [vmem:[%s5534_s21 + $0x70] sm:$0xff] %vm532_vm1, %v3063_v15 }
 0x2b4   : > { %v3069_v38 = vsel %vm5839_vm7, %v5500_v20, %v3037_v43  ;;  %v3070_v26 = vsel %vm3006_vm2, %v5502_v2, %v3038_v1  ;;  %3096 = vst.msk [vmem:[%s5534_s21 + $0x78] sm:$0xff] %vm532_vm1, %v3064_v58  ;;  %3097 = vst.msk [vmem:[%s5534_s21 + $0x80] sm:$0xff] %vm532_vm1, %v3065_v40  ;;  %v3071_v18 = vsel %vm3007_vm14, %v5504_v56, %v3039_v14  ;;  %vm5840_vm8 = vcmp.ge.f32.partialorder %v5506_v49, 0.0 }
 0x2b5   : > { %3098 = vst.msk [vmem:[%s5534_s21 + $0x88] sm:$0xff] %vm532_vm1, %v3066_v61  ;;  %v3072_v25 = vsel %vm5840_vm8, %v5506_v49, %v3040_v36  ;;  %vm5841_vm2 = vcmp.ge.f32.partialorder %v5508_v59, 0.0  ;;  %vm5842_vm9 = vcmp.ge.f32.partialorder %v5510_v11, 0.0  ;;  %3099 = vst.msk [vmem:[%s5534_s21 + $0x90] sm:$0xff] %vm532_vm1, %v3067_v33  ;;  %v3075_v2 = vsel %vm3011_vm3, %v5512_v12, %v3043_v34 }
 0x2b6   : > { %v3073_v21 = vsel %vm5841_vm2, %v5508_v59, %v3041_v4  ;;  %v3074_v20 = vsel %vm5842_vm9, %v5510_v11, %v3042_v62  ;;  %3100 = vst.msk [vmem:[%s5534_s21 + $0x98] sm:$0xff] %vm532_vm1, %v3068_v0  ;;  %3101 = vst.msk [vmem:[%s5534_s21 + $0xa0] sm:$0xff] %vm532_vm1, %v3069_v38  ;;  %v3076_v56 = vsel %vm3012_vm0, %v5514_v57, %v3044_v42  ;;  %vm5843_vm14 = vcmp.ge.f32.partialorder %v5517_v60, 0.0 }
 0x2b7   : > { %3102 = vst.msk [vmem:[%s5534_s21 + $0xa8] sm:$0xff] %vm532_vm1, %v3070_v26  ;;  %v3077_v49 = vsel %vm5843_vm14, %v5517_v60, %v3045_v22  ;;  %v3078_v59 = vsel %vm3014_vm11, %v5519_v24, %v3046_v31  ;;  %3103 = vst.msk [vmem:[%s5534_s21 + $0xb0] sm:$0xff] %vm532_vm1, %v3071_v18  ;;  %v3079_v11 = vsel %vm3015_vm4, %v5536_v5, %v3047_v52 }
 0x2b8   : > { %3104 = vst.msk [vmem:[%s5534_s21 + $0xb8] sm:$0xff] %vm532_vm1, %v3072_v25  ;;  %3105 = vst.msk [vmem:[%s5534_s21 + $0xc0] sm:$0xff] %vm532_vm1, %v3073_v21  ;;  %v3080_v12 = vsel %vm3016_vm15, %v5545_v6, %v3048_v7 }
 0x2b9   : > { %3106 = vst.msk [vmem:[%s5534_s21 + $0xc8] sm:$0xff] %vm532_vm1, %v3074_v20  ;;  %3107 = vst.msk [vmem:[%s5534_s21 + $0xd0] sm:$0xff] %vm532_vm1, %v3075_v2 }
 0x2ba   : > { %3108 = vst.msk [vmem:[%s5534_s21 + $0xd8] sm:$0xff] %vm532_vm1, %v3076_v56  ;;  %3109 = vst.msk [vmem:[%s5534_s21 + $0xe0] sm:$0xff] %vm532_vm1, %v3077_v49 }
 0x2bb   : > { %3110 = vst.msk [vmem:[%s5534_s21 + $0xe8] sm:$0xff] %vm532_vm1, %v3078_v59  ;;  %3111 = vst.msk [vmem:[%s5534_s21 + $0xf0] sm:$0xff] %vm532_vm1, %v3079_v11 }
 0x2bc   : > { %3112 = vst.msk [vmem:[%s5534_s21 + $0xf8] sm:$0xff] %vm532_vm1, %v3080_v12 }
 0x2bd PF: > { %s14_s17 = sadd.s32 1, %s4253_s17   ;;  %s5844_s15 = smov %s4249_s16 }
 0x2be   : > { %p11_p5 = scmp.ge.s32.totalorder %s14_s17, 4   ;;  %s5845_s16 = smov %s5847_s18 }
 0x2c0   :  { %13 = sbr.rel (!%p11_p5) target bundleno = 2 (0x2), region = 83 }

// kernel: residual_block_forward.3
= control target key start
LH: loop header
LB: loop body
LE: loop exit
PB: predicated region body
PF: predicated region fallthrough
CT: control target
= control target key end

     0   :  { %10 = vsyncpa [#allocation3], 0  ;;  %s5924_s0 = inlined_call_operand.vmem [shape: f32[2,18,18,32], index: 0, kind: input, shape index: {}]   ;;  %s5925_s1 = inlined_call_operand.vmem [shape: bf16[3,3,32,32], index: 1, kind: input, shape index: {}]   ;;  %s5926_s2 = inlined_call_operand.vmem [shape: f32[1,32], index: 2, kind: input, shape index: {}]   ;;  %s5927_s3 = inlined_call_operand.vmem [shape: f32[1,32], index: 3, kind: input, shape index: {}]   ;;  %s5928_s4 = inlined_call_operand.vmem [shape: f32[2,256,32], index: 4, kind: input, shape index: {}]   ;;  %s5929_s5 = inlined_call_operand.hbm [shape: f32[2,256,32], index: 5, kind: output, shape index: {}]  }
   0x1   :  { %12 = vsyncpa [#allocation3 + $0x1], 0  ;;  %s4427_s18 = smov 0   ;;  %s4429_s19 = smov 0  }
   0x2   :  { %s4431_s20 = smov 0   ;;  %s4433_s21 = smov 0  }
   0x3   :  { %s4435_s22 = smov 0   ;;  %s4437_s23 = smov 0  }
   0x4 LB: > { %s3275_s24 = sadd.s32 4294967295, %s4392_s23   ;;  %s3276_s25 = sadd.s32 4294967294, %s4392_s23   ;;  %s4392_s23 = sphi %s4437_s23, %s18_s23   ;;  %s4388_s22 = sphi %s4435_s22, %s5997_s22   ;;  %s4384_s21 = sphi %s4433_s21, %s5996_s21   ;;  %s4380_s20 = sphi %s4431_s20, %s5995_s20   ;;  %s4376_s19 = sphi %s4429_s19, %s5994_s19   ;;  %s4372_s18 = sphi %s4427_s18, %s5993_s18  }
   0x5   : > { %s30_s26 = sadd.s32 1, %s4388_s22  ;;  %s171_s27 = sadd.s32 1, %s4380_s20 }
   0x6   : > { %p32_p0 = scmp.ge.s32.totalorder %s30_s26, 2  ;;  %p181_p1 = scmp.ne.s32.totalorder %s4380_s20, %s4376_s19 }
   0x7   : > { %p182_p2 = scmp.eq.s32.totalorder %s3275_s24, 1  ;;  %p187_p3 = scmp.ne.s32.totalorder %s4376_s19, %s4372_s18 }
   0x8   : > { %s5999_s26 = smov (%p32_p0, %s30_s26), 0  ;;  %p188_p5 = scmp.eq.s32.totalorder %s3276_s25, 1 }
   0x9   : > { %p4467_p4 = por %p182_p2, %p181_p1  ;;  %s166_s29 = ssub.s32 %s4388_s22, %s5999_s26 }
   0xa   : > { %p3282_p6 = scmp.ge.s32.totalorder %s4392_s23, 1  ;;  %p169_p7 = scmp.eq.s32.totalorder %s166_s29, 0 }
   0xb   : > { %p4474_p8 = por %p188_p5, %p187_p3  ;;  %p244_p9 = scmp.lt.s32.totalorder %s4392_s23, 3 }
   0xc   : > { %s4480_s6 = scalar_select %p169_p7, %s4380_s20, %s171_s27  }
   0xd   : > { %p245_p10 = pnand %p3282_p6, %p244_p9 }
   0xf   : > { %248 = sbr.rel (%p245_p10) target bundleno = 712 (0x2c8), region = 40 }
  0x16   : > { %v4294_v0 = vld [vmem:[%s5925_s1 + $0x10] sm:$0xff]   ;;  %p290_p11 = scmp.lt.s32.totalorder %s4384_s21, 1  ;;  %v4489_v1 = vld [vmem:[%s5925_s1 + $0x40] sm:$0xff]   ;;  %v4296_v2 = vld [vmem:[%s5925_s1 + $0x18] sm:$0xff]   ;;  %vm436_vm0 = vcmask 1046528   ;;  %vm582_vm1 = vcmask 261120  }
  0x17   : > { %5959 = vst [vmem:[#allocation5_spill] sm:$0xff] %v4489_v1  ;;  %3652 = vmatprep.subr.bf16.mxu1 %v4294_v0  ;;  %3796 = vmatprep.subr.bf16.mxu0 %v4489_v1  ;;  %v4501_v3 = vld [vmem:[%s5925_s1 + $0x48] sm:$0xff]   ;;  %v4298_v4 = vld [vmem:[%s5925_s1] sm:$0xff]   ;;  %v4512_v5 = vld [vmem:[%s5925_s1 + $0x50] sm:$0xff]   ;;  %vm1013_vm2 = vcmask 1045504   ;;  %s287_s29 = sand.u32 1, %s4376_s19  }
  0x18   : > { %s4495_s13 = scalar_select %p290_p11, %s4384_s21, 1  ;;  %3653 = vmatpush3.bf16.msra.mxu1 %v4294_v0  ;;  %5960 = vst [vmem:[#allocation6_spill] sm:$0xff] %v4501_v3  ;;  %3797 = vmatpush3.bf16.msra.mxu0 %v4489_v1  ;;  %v4300_v51 = vld [vmem:[%s5925_s1 + $0x58] sm:$0xff]   ;;  %v4301_v55 = vld [vmem:[%s5925_s1 + $0x8] sm:$0xff]   ;;  %v4641_v0 = vld [vmem:[%s5925_s1 + $0x60] sm:$0xff]  }
  0x19   : > { %3654 = vmatprep.subr.bf16.mxu1 %v4296_v2  ;;  %3798 = vmatprep.subr.bf16.mxu0 %v4501_v3  ;;  %s3283_s15 = sshll.u32 %s287_s29, 8  ;;  %s3489_s17 = sshll.u32 %s4384_s21, 12 }
  0x1a   : > { %s4236_s16 = smul.u32 432, %s4495_s13  ;;  %s3488_s27 = sshll.u32 %s4495_s13, 8 }
  0x1b   : > { %s5618_s12 = scalar_lea.vmem %s5928_s4, %s3488_s27  ;;  %s5842_s27 = scalar_lea.hbm %s5929_s5, %s3489_s17 }
  0x1c   : > { %s4517_s8 = scalar_lea.vmem %s5924_s0, %s4236_s16  ;;  %3655 = vmatpush3.bf16.msra.mxu1 %v4296_v2  ;;  %3799 = vmatpush3.bf16.msra.mxu0 %v4501_v3  ;;  %s5659_s16 = scalar_lea.vmem [#allocation2], %s3283_s15 }
  0x1d   : > { %v4520_v6 = vld [vmem:[%s4517_s8] sm:$0xff]  ;;  %v4523_v7 = vld [vmem:[%s4517_s8 + $0x8] sm:$0xff]  ;;  %v4526_v8 = vld [vmem:[%s4517_s8 + $0x10] sm:$0x3]  ;;  %3688 = vmatprep.subr.bf16.mxu1 %v4298_v4  ;;  %3832 = vmatprep.subr.bf16.mxu0 %v4512_v5  ;;  %s3146_s24 = sshll.u32 %s5659_s16, 4  ;;  %s5878_s21 = scalar_lea.sflag [#allocation3], %s287_s29  ;;  %s5846_s24 = int_to_ptr.vmem [resolvable:$true] %s3146_s24 }
  0x1e   : > { %v437_v9 = vrot.slane %v4520_v6, 1  ;;  %v438_v10 = vrot.slane %v4523_v7, 1  ;;  %v440_v11 = vrot.slane %v4526_v8, 1  ;;  %v4533_v12 = vld [vmem:[%s4517_s8 + $0x18] sm:$0xff]  ;;  %v4536_v13 = vld [vmem:[%s4517_s8 + $0x20] sm:$0xff]  ;;  %v4548_v17 = vld [vmem:[%s4517_s8 + $0x30] sm:$0xff] }
  0x1f   : > { %v4539_v14 = vld [vmem:[%s4517_s8 + $0x28] sm:$0x3]  ;;  %v4543_v15 = vpack.c.bf16 %v4536_v13, %v4533_v12  ;;  %v442_v16 = vrot.slane %v4533_v12, 1  ;;  %v443_v20 = vrot.slane %v4536_v13, 1  ;;  %v4555_v22 = vld [vmem:[%s4517_s8 + $0x38] sm:$0xff]  ;;  %v4564_v26 = vld [vmem:[%s4517_s8 + $0x50] sm:$0xff] }
  0x20   : > { %v439_v18 = vsel %vm436_vm0, %v437_v9, %v438_v10  ;;  %v441_v19 = vsel %vm436_vm0, %v438_v10, %v440_v11  ;;  %v445_v21 = vrot.slane %v4539_v14, 1  ;;  %v4558_v23 = vld [vmem:[%s4517_s8 + $0x40] sm:$0x3]  ;;  %v4561_v25 = vld [vmem:[%s4517_s8 + $0x48] sm:$0xff]  ;;  %v447_v29 = vrot.slane %v4548_v17, 1  ;;  %v4585_v37 = vld [vmem:[%s4517_s8 + $0x78] sm:$0xff] }
  0x21   : > { %v554_v24 = vpack.c.bf16 %v441_v19, %v439_v18  ;;  %v444_v27 = vsel %vm436_vm0, %v442_v16, %v443_v20  ;;  %v448_v30 = vrot.slane %v4555_v22, 1  ;;  %v4571_v31 = vld [vmem:[%s4517_s8 + $0x58] sm:$0x3]  ;;  %v4574_v32 = vld [vmem:[%s4517_s8 + $0x60] sm:$0xff]  ;;  %v4577_v33 = vld [vmem:[%s4517_s8 + $0x68] sm:$0xff]  ;;  %v450_v35 = vrot.slane %v4558_v23, 1 }
  0x22   : > { %v446_v28 = vsel %vm436_vm0, %v443_v20, %v445_v21  ;;  %v4582_v36 = vld [vmem:[%s4517_s8 + $0x70] sm:$0x3]  ;;  %v452_v39 = vrot.slane %v4561_v25, 1  ;;  %v453_v40 = vrot.slane %v4564_v26, 1  ;;  %v4591_v41 = vld [vmem:[%s4517_s8 + $0x80] sm:$0xff]  ;;  %v455_v44 = vrot.slane %v4571_v31, 1 }
  0x23   : > { %3656 = vmatprep.mubr.msk.bf16.mxu1 %vm582_vm1, %v554_v24  ;;  %v555_v34 = vpack.c.bf16 %v446_v28, %v444_v27  ;;  %v449_v38 = vsel %vm436_vm0, %v447_v29, %v448_v30  ;;  %v4594_v42 = vld [vmem:[%s4517_s8 + $0x88] sm:$0x3]  ;;  %v451_v43 = vsel %vm436_vm0, %v448_v30, %v450_v35  ;;  %v457_v45 = vrot.slane %v4574_v32, 1  ;;  %v4626_v59 = vld [vmem:[%s4517_s8 + $0x90] sm:$0xff]  ;;  %v4633_v62 = vld [vmem:[%s4517_s8 + $0x98] sm:$0xff]  ;;  %s4314_s7 = scalar_lea.vmem %s5846_s24, 4096 }
  0x24   : > { %v458_v46 = vrot.slane %v4577_v33, 1  ;;  %v4602_v47 = vpack.c.bf16 %v451_v43, %v449_v38  ;;  %v454_v48 = vsel %vm436_vm0, %v452_v39, %v453_v40  ;;  %v460_v49 = vrot.slane %v4582_v36, 1  ;;  %v4636_v63 = vld [vmem:[%s4517_s8 + $0xa0] sm:$0x3]  ;;  %v4644_v2 = vld [vmem:[%s4517_s8 + $0xa8] sm:$0xff]  ;;  %v4894_v1 = vld [vmem:[%s4517_s8 + $0x170] sm:$0xff]  ;;  %p4315_p12 = scmp.ne.s32.totalorder %s5846_s24, %s4314_s7 }
  0x25   : > { %3800 = vmatprep.mubr.msk.bf16.mxu0 %vm582_vm1, %v555_v34  ;;  %3657 = vmatmul.mubr.msk.bf16.vlgmr.msra.gmra.mrb[0].mxu1 %vm582_vm1, %v555_v34  ;;  %v462_v50 = vrot.slane %v4585_v37, 1  ;;  %v456_v52 = vsel %vm436_vm0, %v453_v40, %v455_v44  ;;  %v463_v53 = vrot.slane %v4591_v41, 1  ;;  %v465_v54 = vrot.slane %v4594_v42, 1  ;;  %v4670_v24 = vld [vmem:[%s4517_s8 + $0xc0] sm:$0xff]  ;;  %v4677_v29 = vld [vmem:[%s4517_s8 + $0xc8] sm:$0xff]  ;;  %s4394_s9 = smov [#allocation2]  }
  0x26   : > { %3689 = vmatpush3.bf16.msra.mxu1 %v4298_v4  ;;  %5961 = vst [vmem:[#allocation7_spill] sm:$0xff] %v4602_v47  ;;  %3801 = vmatmul.mubr.msk.bf16.vlgmr.msra.gmra.mrb[0].mxu0 %vm582_vm1, %v4602_v47  ;;  %v4620_v56 = vpack.c.bf16 %v456_v52, %v454_v48  ;;  %v459_v57 = vsel %vm436_vm0, %v457_v45, %v458_v46  ;;  %v4647_v4 = vld [vmem:[%s4517_s8 + $0xb0] sm:$0xff]  ;;  %v467_v11 = vrot.slane %v4626_v59, 1  ;;  %v468_v16 = vrot.slane %v4633_v62, 1  ;;  %v4682_v30 = vld [vmem:[%s5925_s1 + $0x20] sm:$0xff]   ;;  %p4316_p13 = pnand %p4315_p12, %p4467_p4  ;;  %s4318_s10 = sshll.u32 %s4394_s9, 4  ;;  %s4319_s10 = int_to_ptr.vmem [resolvable:$false] %s4318_s10 }
  0x27   : > { %3660 = vmatprep.mubr.msk.bf16.mxu1 %vm582_vm1, %v4602_v47  ;;  %3833 = vmatpush3.bf16.msra.mxu0 %v4512_v5  ;;  %v461_v58 = vsel %vm436_vm0, %v458_v46, %v460_v49  ;;  %v464_v60 = vsel %vm436_vm0, %v462_v50, %v463_v53  ;;  %v466_v61 = vsel %vm436_vm0, %v463_v53, %v465_v54  ;;  %v4650_v5 = vld [vmem:[%s4517_s8 + $0xb8] sm:$0x3]  ;;  %v470_v18 = vrot.slane %v4636_v63, 1  ;;  %v4687_v38 = vld [vmem:[%s4517_s8 + $0xd0] sm:$0x3]  ;;  %s4320_s11 = scalar_lea.vmem %s4319_s10, 8192  ;;  %p4321_p1 = scmp.lt.s32.totalorder %s5846_s24, %s4319_s10 }
  0x28   : > { %5962 = vst [vmem:[#allocation8_spill] sm:$0xff] %v4620_v56  ;;  %3690 = vmatprep.subr.bf16.mxu1 %v4301_v55  ;;  %3804 = vmatprep.mubr.msk.bf16.mxu0 %vm582_vm1, %v4620_v56  ;;  %v4652_v9 = vpack.c.bf16 %v461_v58, %v459_v57  ;;  %v4656_v10 = vpack.c.bf16 %v466_v61, %v464_v60  ;;  %v472_v19 = vrot.slane %v4644_v2, 1  ;;  %v473_v20 = vrot.slane %v4647_v4, 1  ;;  %v4699_v49 = vld [vmem:[%s4517_s8 + $0xd8] sm:$0xff]  ;;  %v4712_v50 = vld [vmem:[%s4517_s8 + $0xe8] sm:$0x3]  ;;  %p4317_p0 = pneg %p4316_p13  ;;  %p4322_p2 = scmp.lt.s32.totalorder %s4320_s11, %s4314_s7 }
  0x29   : > { %3834 = vmatprep.subr.bf16.mxu0 %v4300_v51  ;;  %v475_v21 = vrot.slane %v4650_v5, 1  ;;  %v469_v27 = vsel %vm436_vm0, %v467_v11, %v468_v16  ;;  %v471_v28 = vsel %vm436_vm0, %v468_v16, %v470_v18  ;;  %v1019_v39 = vrot.slane %v4533_v12, 2  ;;  %v4717_v53 = vld [vmem:[%s4517_s8 + $0xf0] sm:$0xff]  ;;  %v4720_v54 = vld [vmem:[%s4517_s8 + $0xf8] sm:$0xff]  ;;  %v4728_v60 = vld [vmem:[%s4517_s8 + $0x100] sm:$0x3] }
  0x2a   : > { %3691 = vmatpush3.bf16.msra.mxu1 %v4301_v55  ;;  %5963 = vst [vmem:[#allocation9_spill] sm:$0xff] %v4652_v9  ;;  %5964 = vst [vmem:[#allocation10_spill] sm:$0xff] %v4656_v10  ;;  %v474_v34 = vsel %vm436_vm0, %v472_v19, %v473_v20  ;;  %v1020_v40 = vrot.slane %v4536_v13, 2  ;;  %v1022_v43 = vrot.slane %v4539_v14, 2  ;;  %v1024_v44 = vrot.slane %v4548_v17, 2  ;;  %v4707_v14 = vld [vmem:[%s4517_s8 + $0xe0] sm:$0xff]  ;;  %p4323_p3 = por %p4322_p2, %p4321_p1 }
  0x2b   : > { %3835 = vmatpush3.bf16.msra.mxu0 %v4300_v51  ;;  %v476_v35 = vsel %vm436_vm0, %v473_v20, %v475_v21  ;;  %3724 = vmatprep.subr.bf16.mxu1 %v4682_v30  ;;  %v4694_v45 = vpack.c.bf16 %v471_v28, %v469_v27  ;;  %v477_v46 = vrot.slane %v4670_v24, 1  ;;  %v478_v48 = vrot.slane %v4677_v29, 1  ;;  %v4739_v20 = vld [vmem:[%s4517_s8 + $0x108] sm:$0xff]  ;;  %v4743_v27 = vld [vmem:[%s4517_s8 + $0x110] sm:$0xff] }
  0x2c   : > { %3868 = vmatprep.subr.bf16.mxu0 %v4641_v0  ;;  %v4703_v12 = vpack.c.bf16 %v476_v35, %v474_v34  ;;  %v480_v13 = vrot.slane %v4687_v38, 1  ;;  %v1025_v51 = vrot.slane %v4555_v22, 2  ;;  %v1027_v52 = vrot.slane %v4558_v23, 2  ;;  %v4750_v35 = vld [vmem:[%s4517_s8 + $0x118] sm:$0x3]  ;;  %p4324_p5 = pnand %p4323_p3, %p4317_p0 }
  0x2d   : > { %3661 = vmatmul.mubr.msk.bf16.gmra.mrb[4].mxu1 %vm582_vm1, %v4620_v56  ;;  %5965 = vst [vmem:[#allocation11_spill] sm:$0xff] %v4694_v45  ;;  %v479_v55 = vsel %vm436_vm0, %v477_v46, %v478_v48  ;;  %v1021_v57 = vsel %vm1013_vm2, %v1019_v39, %v1020_v40  ;;  %v1023_v58 = vsel %vm1013_vm2, %v1020_v40, %v1022_v43  ;;  %v482_v61 = vrot.slane %v4699_v49, 1 }
  0x2e   : > { %3664 = vmatprep.mubr.msk.bf16.mxu1 %vm582_vm1, %v4652_v9  ;;  %3805 = vmatmul.mubr.msk.bf16.gmra.mrb[4].mxu0 %vm582_vm1, %v4652_v9  ;;  %5966 = vst [vmem:[#allocation12_spill] sm:$0xff] %v4703_v12  ;;  %v481_v23 = vsel %vm436_vm0, %v478_v48, %v480_v13  ;;  %v483_v11 = vrot.slane %v4707_v14, 1  ;;  %v485_v16 = vrot.slane %v4712_v50, 1  ;;  %v487_v18 = vrot.slane %v4717_v53, 1  ;;  %v4759_v48 = vld [vmem:[%s4517_s8 + $0x120] sm:$0xff]  ;;  %v4797_v9 = vld [vmem:[%s4517_s8 + $0x138] sm:$0xff] }
  0x2f   : > { %3808 = vmatprep.mubr.msk.bf16.mxu0 %vm582_vm1, %v4656_v10  ;;  %v488_v19 = vrot.slane %v4720_v54, 1  ;;  %v490_v21 = vrot.slane %v4728_v60, 1  ;;  %v4745_v28 = vpack.c.bf16 %v481_v23, %v479_v55  ;;  %v4747_v34 = vpack.c.bf16 %v1023_v58, %v1021_v57  ;;  %v4768_v23 = vld [vmem:[%s4517_s8 + $0x128] sm:$0xff] }
  0x30   : > { %v484_v39 = vsel %vm436_vm0, %v482_v61, %v483_v11  ;;  %v486_v40 = vsel %vm436_vm0, %v483_v11, %v485_v16  ;;  %v1026_v43 = vsel %vm1013_vm2, %v1024_v44, %v1025_v51  ;;  %v1028_v46 = vsel %vm1013_vm2, %v1025_v51, %v1027_v52  ;;  %v4771_v61 = vld [vmem:[%s4517_s8 + $0x130] sm:$0x3] }
  0x31   : > { %5967 = vst [vmem:[#allocation13_spill] sm:$0xff] %v4745_v28  ;;  %v489_v13 = vsel %vm436_vm0, %v487_v18, %v488_v19  ;;  %v1029_v55 = vrot.slane %v4561_v25, 2  ;;  %v1030_v57 = vrot.slane %v4564_v26, 2  ;;  %v1032_v58 = vrot.slane %v4571_v31, 2 }
  0x32   : > { %v491_v44 = vsel %vm436_vm0, %v488_v19, %v490_v21  ;;  %v492_v51 = vrot.slane %v4739_v20, 1  ;;  %v493_v52 = vrot.slane %v4743_v27, 1  ;;  %v495_v11 = vrot.slane %v4750_v35, 1 }
  0x33   : > { %v4781_v31 = vpack.c.bf16 %v486_v40, %v484_v39  ;;  %v497_v16 = vrot.slane %v4759_v48, 1  ;;  %v498_v18 = vrot.slane %v4768_v23, 1  ;;  %v500_v19 = vrot.slane %v4771_v61, 1 }
  0x34   : > { %v4786_v21 = vpack.c.bf16 %v1028_v46, %v1026_v43  ;;  %v4788_v3 = vpack.c.bf16 %v491_v44, %v489_v13  ;;  %v496_v39 = vsel %vm436_vm0, %v493_v52, %v495_v11  ;;  %v1034_v40 = vrot.slane %v4574_v32, 2  ;;  %v4800_v43 = vld [vmem:[%s4517_s8 + $0x140] sm:$0xff]  ;;  %v4820_v11 = vld [vmem:[%s4517_s8 + $0x150] sm:$0xff] }
  0x35   : > { %3665 = vmatmul.mubr.msk.bf16.gmra.mrb[8].mxu1 %vm582_vm1, %v4656_v10  ;;  %5968 = vst [vmem:[#allocation14_spill] sm:$0xff] %v4781_v31  ;;  %v1035_v10 = vrot.slane %v4577_v33, 2  ;;  %v1037_v46 = vrot.slane %v4582_v36, 2  ;;  %v1039_v13 = vrot.slane %v4585_v37, 2  ;;  %v1042_v36 = vrot.slane %v4594_v42, 2 }
  0x36   : > { %3668 = vmatprep.mubr.msk.bf16.mxu1 %vm582_vm1, %v4694_v45  ;;  %3809 = vmatmul.mubr.msk.bf16.gmra.mrb[8].mxu0 %vm582_vm1, %v4694_v45  ;;  %5969 = vst [vmem:[#allocation15_spill] sm:$0xff] %v4786_v21  ;;  %5970 = vst [vmem:[#allocation16_spill] sm:$0xff] %v4788_v3  ;;  %v494_v45 = vsel %vm436_vm0, %v492_v51, %v493_v52  ;;  %v499_v51 = vsel %vm436_vm0, %v497_v16, %v498_v18  ;;  %v502_v56 = vrot.slane %v4797_v9, 1 }
  0x37   : > { %3812 = vmatprep.mubr.msk.bf16.mxu0 %vm582_vm1, %v4703_v12  ;;  %v501_v52 = vsel %vm436_vm0, %v498_v18, %v500_v19  ;;  %v1036_v42 = vsel %vm1013_vm2, %v1034_v40, %v1035_v10  ;;  %v4841_v18 = vpack.c.bf16 %v4564_v26, %v4561_v25  ;;  %v1038_v19 = vsel %vm1013_vm2, %v1035_v10, %v1037_v46 }
  0x38   : > { %v507_v26 = vrot.slane %v4820_v11, 1  ;;  %v1044_v46 = vrot.slane %v4626_v59, 2 }
  0x3d   : > { %3669 = vmatmul.mubr.msk.bf16.gmra.mrb[12].mxu1 %vm582_vm1, %v4703_v12  ;;  %v1031_v12 = vsel %vm1013_vm2, %v1029_v55, %v1030_v57  ;;  %v1040_v55 = vrot.slane %v4591_v41, 2 }
  0x3e   : > { %3672 = vmatprep.mubr.msk.bf16.mxu1 %vm582_vm1, %v4745_v28  ;;  %3813 = vmatmul.mubr.msk.bf16.gmra.mrb[12].mxu0 %vm582_vm1, %v4745_v28  ;;  %v1033_v28 = vsel %vm1013_vm2, %v1030_v57, %v1032_v58  ;;  %v4806_v57 = vld [vmem:[%s4517_s8 + $0x148] sm:$0x3]  ;;  %v4810_v58 = vpack.c.bf16 %v4555_v22, %v4548_v17  ;;  %v503_v17 = vrot.slane %v4800_v43, 1  ;;  %v4827_v22 = vld [vmem:[%s4517_s8 + $0x158] sm:$0xff] }
  0x3f   : > { %3836 = vmatprep.mubr.msk.bf16.mxu0 %vm582_vm1, %v4747_v34  ;;  %v4814_v44 = vpack.c.bf16 %v1033_v28, %v1031_v12  ;;  %v4304_v12 = vld [vmem:[%s5925_s1 + $0x68] sm:$0xff]   ;;  %v4835_v28 = vpack.c.bf16 %v496_v39, %v494_v45  ;;  %v505_v16 = vrot.slane %v4806_v57, 1  ;;  %v1041_v47 = vsel %vm1013_vm2, %v1039_v13, %v1040_v55 }
  0x40   : > { %v4851_v45 = vpack.c.bf16 %v4577_v33, %v4574_v32  ;;  %v1043_v25 = vsel %vm1013_vm2, %v1040_v55, %v1042_v36  ;;  %v508_v10 = vrot.slane %v4827_v22, 1  ;;  %v504_v40 = vsel %vm436_vm0, %v502_v56, %v503_v17 }
  0x41   : > { %5971 = vst [vmem:[#allocation17_spill] sm:$0xff] %v4814_v44  ;;  %5972 = vst [vmem:[#allocation18_spill] sm:$0xff] %v4835_v28  ;;  %v1045_v32 = vrot.slane %v4633_v62, 2  ;;  %v4865_v33 = vpack.c.bf16 %v4591_v41, %v4585_v37  ;;  %v506_v13 = vsel %vm436_vm0, %v503_v17, %v505_v16  ;;  %v1047_v56 = vrot.slane %v4636_v63, 2  ;;  %v4882_v41 = vld [vmem:[%s4517_s8 + $0x168] sm:$0xff] }
  0x42   : > { %v1049_v55 = vrot.slane %v4644_v2, 2  ;;  %v4877_v36 = vpack.c.bf16 %v1038_v19, %v1036_v42  ;;  %v4879_v37 = vpack.c.bf16 %v1043_v25, %v1041_v47  ;;  %v509_v63 = vsel %vm436_vm0, %v507_v26, %v508_v10  ;;  %v4897_v42 = vld [vmem:[%s4517_s8 + $0x178] sm:$0x3] }
  0x43   : > { %v1052_v16 = vrot.slane %v4650_v5, 2  ;;  %v4901_v47 = vpack.c.bf16 %v4647_v4, %v4644_v2  ;;  %v4907_v19 = vpack.c.bf16 %v506_v13, %v504_v40  ;;  %v1046_v5 = vsel %vm1013_vm2, %v1044_v46, %v1045_v32 }
  0x44   : > { %5974 = vst [vmem:[#allocation20_spill] sm:$0xff] %v4877_v36  ;;  %5975 = vst [vmem:[#allocation21_spill] sm:$0xff] %v4879_v37  ;;  %v1048_v25 = vsel %vm1013_vm2, %v1045_v32, %v1047_v56  ;;  %v512_v2 = vrot.slane %v4882_v41, 1  ;;  %v513_v26 = vrot.slane %v4894_v1, 1  ;;  %v4933_v46 = vpack.c.bf16 %v4720_v54, %v4717_v53 }
  0x45   : > { %3673 = vmatmul.mubr.msk.bf16.gmra.mrb[16].mxu1 %vm582_vm1, %v4781_v31  ;;  %v4830_v31 = vld [vmem:[%s4517_s8 + $0x160] sm:$0x3]  ;;  %v4937_v32 = vpack.c.bf16 %v4743_v27, %v4739_v20  ;;  %v4941_v13 = vpack.c.bf16 %v4768_v23, %v4759_v48  ;;  %v4945_v56 = vpack.c.bf16 %v4800_v43, %v4797_v9 }
  0x46   : > { %3676 = vmatprep.mubr.msk.bf16.mxu1 %vm582_vm1, %v4788_v3  ;;  %3837 = vmatmul.mubr.msk.bf16.vlgmr.msra.gmra.mrb[0].mxu0 %vm582_vm1, %v4786_v21  ;;  %v4846_v3 = vpack.c.bf16 %v501_v52, %v499_v51  ;;  %v510_v39 = vrot.slane %v4830_v31, 1  ;;  %v1050_v51 = vrot.slane %v4647_v4, 2  ;;  %v1014_v52 = vrot.slane %v4520_v6, 2 }
  0x47   : > { %3869 = vmatpush3.bf16.msra.mxu0 %v4641_v0  ;;  %3840 = vmatprep.mubr.msk.bf16.mxu0 %vm582_vm1, %v4814_v44  ;;  %v4870_v0 = vld [vmem:[%s5925_s1 + $0x70] sm:$0xff]   ;;  %v4886_v44 = vpack.c.bf16 %v4633_v62, %v4626_v59  ;;  %v1015_v59 = vrot.slane %v4523_v7, 2  ;;  %v1017_v62 = vrot.slane %v4526_v8, 2  ;;  %v4916_v4 = vpack.c.bf16 %v4677_v29, %v4670_v24 }
  0x48   : > { %5973 = vst [vmem:[#allocation19_spill] sm:$0xff] %v4846_v3  ;;  %3870 = vmatprep.subr.bf16.mxu0 %v4304_v12  ;;  %v511_v17 = vsel %vm436_vm0, %v508_v10, %v510_v39  ;;  %v515_v10 = vrot.slane %v4897_v42, 1  ;;  %v4926_v39 = vpack.c.bf16 %v4707_v14, %v4699_v49  ;;  %v1053_v40 = vsel %vm1013_vm2, %v1050_v51, %v1052_v16 }
  0x49   : > { %v4920_v8 = vpack.c.bf16 %v511_v17, %v509_v63  ;;  %v4956_v63 = vsel %vm1013_vm2, %v1014_v52, %v1015_v59  ;;  %v4959_v17 = vsel %vm1013_vm2, %v1015_v59, %v1017_v62  ;;  %v4961_v16 = vpack.c.bf16 %v1048_v25, %v1046_v5 }
  0x4a   : > { %v1055_v52 = vrot.slane %v4677_v29, 2  ;;  %v1057_v21 = vrot.slane %v4687_v38, 2  ;;  %v516_v59 = vsel %vm436_vm0, %v513_v26, %v515_v10  ;;  %v1060_v62 = vrot.slane %v4707_v14, 2 }
  0x4b   : > { %3871 = vmatpush3.bf16.msra.mxu0 %v4304_v12  ;;  %v1051_v12 = vsel %vm1013_vm2, %v1049_v55, %v1050_v51  ;;  %v4949_v55 = vpack.c.bf16 %v4827_v22, %v4820_v11  ;;  %v4953_v51 = vpack.c.bf16 %v4894_v1, %v4882_v41  ;;  %v1062_v5 = vrot.slane %v4712_v50, 2 }
  0x4c   : > { %3904 = vmatprep.subr.bf16.mxu0 %v4870_v0  ;;  %v1058_v25 = vsel %vm1013_vm2, %v1055_v52, %v1057_v21  ;;  %v1067_v21 = vrot.slane %v4728_v60, 2 }
  0x4d   : > { %3677 = vmatmul.mubr.msk.bf16.gmra.mrb[20].mxu1 %vm582_vm1, %v4835_v28  ;;  %v1131_v28 = vpack.c.bf16 %v4959_v17, %v4956_v63  ;;  %v1063_v14 = vsel %vm1013_vm2, %v1060_v62, %v1062_v5  ;;  %v1082_v5 = vrot.slane %v4806_v57, 2  ;;  %v5978_v63 = vld [vmem:[#allocation17_spill] sm:$0xff] }
  0x4e   : > { %3680 = vmatprep.mubr.msk.bf16.mxu1 %vm582_vm1, %v4846_v3  ;;  %3841 = vmatmul.mubr.msk.bf16.gmra.mrb[4].mxu0 %vm582_vm1, %v4877_v36  ;;  %v1054_v3 = vrot.slane %v4670_v24, 2  ;;  %v514_v36 = vsel %vm436_vm0, %v512_v2, %v513_v26  ;;  %v1059_v24 = vrot.slane %v4699_v49, 2  ;;  %v1072_v26 = vrot.slane %v4750_v35, 2  ;;  %v5980_v17 = vld [vmem:[#allocation21_spill] sm:$0xff] }
  0x4f   : > { %3844 = vmatprep.mubr.msk.bf16.mxu0 %vm582_vm1, %v4879_v37  ;;  %v4968_v37 = vpack.c.bf16 %v1053_v40, %v1051_v12  ;;  %v4983_v29 = vpack.c.bf16 %v516_v59, %v514_v36  ;;  %v372_v12 = vpack.c.bf16 %v4523_v7, %v4520_v6  ;;  %v1064_v36 = vrot.slane %v4717_v53, 2 }
  0x50   : > { %v1056_v38 = vsel %vm1013_vm2, %v1054_v3, %v1055_v52  ;;  %v1061_v49 = vsel %vm1013_vm2, %v1059_v24, %v1060_v62  ;;  %v1065_v3 = vrot.slane %v4720_v54, 2  ;;  %v1069_v6 = vrot.slane %v4739_v20, 2  ;;  %v4305_v20 = vld [vmem:[%s5925_s1 + $0x28] sm:$0xff]  }
  0x51   : > { %v4991_v50 = vpack.c.bf16 %v1058_v25, %v1056_v38  ;;  %v4995_v2 = vpack.c.bf16 %v1063_v14, %v1061_v49  ;;  %v1070_v7 = vrot.slane %v4743_v27, 2  ;;  %v1074_v40 = vrot.slane %v4759_v48, 2  ;;  %v5033_v48 = vld [vmem:[%s5925_s1 + $0x30] sm:$0xff]  }
  0x52   : > { %v1066_v53 = vsel %vm1013_vm2, %v1064_v36, %v1065_v3  ;;  %v1068_v54 = vsel %vm1013_vm2, %v1065_v3, %v1067_v21  ;;  %v1075_v52 = vrot.slane %v4768_v23, 2  ;;  %v1077_v59 = vrot.slane %v4771_v61, 2  ;;  %v362_v21 = vld [vmem:[%s4517_s8 + $0x180] sm:$0xff] }
  0x53   : > { %v1071_v60 = vsel %vm1013_vm2, %v1069_v6, %v1070_v7  ;;  %v1073_v10 = vsel %vm1013_vm2, %v1070_v7, %v1072_v26  ;;  %v5015_v27 = vpack.c.bf16 %v1068_v54, %v1066_v53  ;;  %v1079_v24 = vrot.slane %v4797_v9, 2  ;;  %v364_v6 = vld [vmem:[%s4517_s8 + $0x190] sm:$0x3] }
  0x54   : > { %v5019_v35 = vpack.c.bf16 %v1073_v10, %v1071_v60  ;;  %v1080_v62 = vrot.slane %v4800_v43, 2  ;;  %v1078_v9 = vsel %vm1013_vm2, %v1075_v52, %v1077_v59  ;;  %v1084_v38 = vrot.slane %v4820_v11, 2 }
  0x55   : > { %3681 = vmatmul.mubr.msk.bf16.gmra.mrb[24].mxu1 %vm582_vm1, %v4907_v19  ;;  %v1085_v25 = vrot.slane %v4827_v22, 2  ;;  %v1089_v49 = vrot.slane %v4882_v41, 2  ;;  %v1090_v14 = vrot.slane %v4894_v1, 2  ;;  %v1092_v36 = vrot.slane %v4897_v42, 2  ;;  %v363_v41 = vld [vmem:[%s4517_s8 + $0x188] sm:$0xff] }
  0x56   : > { %3684 = vmatprep.mubr.msk.bf16.mxu1 %vm582_vm1, %v4920_v8  ;;  %3845 = vmatmul.mubr.msk.bf16.gmra.mrb[8].mxu0 %vm582_vm1, %v4961_v16  ;;  %v1081_v23 = vsel %vm1013_vm2, %v1079_v24, %v1080_v62  ;;  %v1083_v61 = vsel %vm1013_vm2, %v1080_v62, %v1082_v5  ;;  %v1838_v7 = vrot.slane %v362_v21, 2  ;;  %v1839_v26 = vrot.slane %v363_v41, 2  ;;  %v4308_v5 = vld [vmem:[%s5925_s1 + $0x78] sm:$0xff]  }
  0x57   : > { %3848 = vmatprep.mubr.msk.bf16.mxu0 %vm582_vm1, %v4968_v37  ;;  %v5048_v57 = vpack.c.bf16 %v1083_v61, %v1081_v23  ;;  %v1086_v11 = vsel %vm1013_vm2, %v1084_v38, %v1085_v25  ;;  %v1093_v3 = vsel %vm1013_vm2, %v1090_v14, %v1092_v36  ;;  %v1841_v53 = vrot.slane %v364_v6, 2  ;;  %v365_v23 = vld [vmem:[%s4517_s8 + $0x198] sm:$0xff]  ;;  %v366_v61 = vld [vmem:[%s4517_s8 + $0x1a0] sm:$0xff] }
  0x58   : > { %v1617_v54 = vrot.slane %v362_v21, 1  ;;  %v1618_v60 = vrot.slane %v363_v41, 1  ;;  %v1620_v10 = vrot.slane %v364_v6, 1  ;;  %v2497_v38 = vrot.slane %v365_v23, 2  ;;  %v5984_v6 = vld [vmem:[#allocation10_spill] sm:$0xff] }
  0x5a   : > { %v1621_v59 = vsel %vm436_vm0, %v1618_v60, %v1620_v10  ;;  %v5990_v10 = vld [vmem:[#allocation6_spill] sm:$0xff] }
  0x5d   : > { %3685 = vmatmul.mubr.msk.bf16.gmra.mrb[28].mxu1 %vm582_vm1, %v4983_v29 }
  0x5e   : > { %3692 = vmatprep.mubr.msk.bf16.mxu1 %vm582_vm1, %v372_v12  ;;  %3849 = vmatmul.mubr.msk.bf16.gmra.mrb[12].mxu0 %vm582_vm1, %v4991_v50  ;;  %v1087_v12 = vrot.slane %v4830_v31, 2  ;;  %v1091_v31 = vsel %vm1013_vm2, %v1089_v49, %v1090_v14  ;;  %v2064_v14 = vpack.c.bf16 %v366_v61, %v365_v23 }
  0x5f   : > { %3852 = vmatprep.mubr.msk.bf16.mxu0 %vm582_vm1, %v4995_v2  ;;  %v5073_v42 = vpack.c.bf16 %v1093_v3, %v1091_v31  ;;  %v5981_v31 = vld [vmem:[#allocation7_spill] sm:$0xff]  ;;  %v4311_v3 = vld [vmem:[%s5925_s1 + $0x88] sm:$0xff]  }
  0x60   : > { %v1088_v22 = vsel %vm1013_vm2, %v1085_v25, %v1087_v12  ;;  %v2498_v25 = vrot.slane %v366_v61, 2  ;;  %v367_v12 = vld [vmem:[%s4517_s8 + $0x1a8] sm:$0x3] }
  0x61   : > { %v5069_v1 = vpack.c.bf16 %v1088_v22, %v1086_v11  ;;  %v2500_v49 = vrot.slane %v367_v12, 2 }
  0x62   : > { %v5175_v36 = vsel %vm1013_vm2, %v2497_v38, %v2498_v25 }
  0x63   : > { %v5178_v11 = vsel %vm1013_vm2, %v2498_v25, %v2500_v49 }
  0x64   : > { %v2509_v22 = vpack.c.bf16 %v5178_v11, %v5175_v36 }
  0x65   : > { %3693 = vmatmul.mubr.msk.bf16.vlgmr.msra.gmra.mrb[0].mxu1 %vm582_vm1, %v4543_v15 }
  0x66   : > { %3725 = vmatpush3.bf16.msra.mxu1 %v4682_v30  ;;  %3696 = vmatprep.mubr.msk.bf16.mxu1 %vm582_vm1, %v4810_v58  ;;  %v1076_v30 = vsel %vm1013_vm2, %v1074_v40, %v1075_v52  ;;  %v1842_v40 = vsel %vm1013_vm2, %v1839_v26, %v1841_v53  ;;  %v1619_v52 = vsel %vm436_vm0, %v1617_v54, %v1618_v60  ;;  %v5987_v53 = vld [vmem:[#allocation13_spill] sm:$0xff]  ;;  %v5988_v54 = vld [vmem:[#allocation14_spill] sm:$0xff]  ;;  %v5989_v60 = vld [vmem:[#allocation16_spill] sm:$0xff] }
  0x67   : > { %3726 = vmatprep.subr.bf16.mxu1 %v4305_v20  ;;  %3853 = vmatmul.mubr.msk.bf16.gmra.mrb[16].mxu0 %vm582_vm1, %v5015_v27  ;;  %v5044_v43 = vpack.c.bf16 %v1078_v9, %v1076_v30  ;;  %v5085_v24 = vpack.c.bf16 %v1621_v59, %v1619_v52  ;;  %v4310_v30 = vld [vmem:[%s5925_s1 + $0x80] sm:$0xff]   ;;  %v5976_v9 = vld [vmem:[#allocation15_spill] sm:$0xff] }
  0x68   : > { %3856 = vmatprep.mubr.msk.bf16.mxu0 %vm582_vm1, %v5019_v35 }
  0x6a   : > { %3727 = vmatpush3.bf16.msra.mxu1 %v4305_v20  ;;  %v1840_v20 = vsel %vm1013_vm2, %v1838_v7, %v1839_v26  ;;  %v5985_v7 = vld [vmem:[#allocation11_spill] sm:$0xff]  ;;  %v5986_v26 = vld [vmem:[#allocation12_spill] sm:$0xff] }
  0x6b   : > { %3760 = vmatprep.subr.bf16.mxu1 %v5033_v48  ;;  %v5087_v62 = vpack.c.bf16 %v1842_v40, %v1840_v20  ;;  %v5991_v20 = vld [vmem:[#allocation18_spill] sm:$0xff]  ;;  %v2279_v40 = vrot.slane %v367_v12, 1 }
  0x6d   : > { %3697 = vmatmul.mubr.msk.bf16.gmra.mrb[4].mxu1 %vm582_vm1, %v4841_v18 }
  0x6e   : > { %3700 = vmatprep.mubr.msk.bf16.mxu1 %vm582_vm1, %v4851_v45 }
  0x6f   : > { %3857 = vmatmul.mubr.msk.bf16.gmra.mrb[20].mxu0 %vm582_vm1, %v5044_v43 }
  0x70   : > { %3860 = vmatprep.mubr.msk.bf16.mxu0 %vm582_vm1, %v5048_v57 }
  0x75   : > { %3701 = vmatmul.mubr.msk.bf16.gmra.mrb[8].mxu1 %vm582_vm1, %v4865_v33 }
  0x76   : > { %3704 = vmatprep.mubr.msk.bf16.mxu1 %vm582_vm1, %v4886_v44 }
  0x77   : > { %3861 = vmatmul.mubr.msk.bf16.gmra.mrb[24].mxu0 %vm582_vm1, %v5069_v1 }
  0x78   : > { %3864 = vmatprep.mubr.msk.bf16.mxu0 %vm582_vm1, %v5073_v42 }
  0x7d   : > { %3705 = vmatmul.mubr.msk.bf16.gmra.mrb[12].mxu1 %vm582_vm1, %v4901_v47 }
  0x7e   : > { %3708 = vmatprep.mubr.msk.bf16.mxu1 %vm582_vm1, %v4916_v4 }
  0x7f   : > { %3865 = vmatmul.mubr.msk.bf16.gmra.mrb[28].mxu0 %vm582_vm1, %v5087_v62 }
  0x80   : > { %3872 = vmatprep.mubr.msk.bf16.mxu0 %vm582_vm1, %v4810_v58 }
  0x85   : > { %3709 = vmatmul.mubr.msk.bf16.gmra.mrb[16].mxu1 %vm582_vm1, %v4926_v39 }
  0x86   : > { %3712 = vmatprep.mubr.msk.bf16.mxu1 %vm582_vm1, %v4933_v46 }
  0x87   : > { %3873 = vmatmul.mubr.msk.bf16.vlgmr.msra.gmra.mrb[0].mxu0 %vm582_vm1, %v4841_v18 }
  0x88   : > { %3905 = vmatpush3.bf16.msra.mxu0 %v4870_v0  ;;  %3876 = vmatprep.mubr.msk.bf16.mxu0 %vm582_vm1, %v4851_v45  ;;  %v4309_v0 = vld [vmem:[%s5925_s1 + $0x38] sm:$0xff]  }
  0x89   : > { %3906 = vmatprep.subr.bf16.mxu0 %v4308_v5 }
  0x8c   : > { %3907 = vmatpush3.bf16.msra.mxu0 %v4308_v5 }
  0x8d   : > { %3713 = vmatmul.mubr.msk.bf16.gmra.mrb[20].mxu1 %vm582_vm1, %v4937_v32  ;;  %3940 = vmatprep.subr.bf16.mxu0 %v4310_v30 }
  0x8e   : > { %3716 = vmatprep.mubr.msk.bf16.mxu1 %vm582_vm1, %v4941_v13 }
  0x8f   : > { %3877 = vmatmul.mubr.msk.bf16.gmra.mrb[4].mxu0 %vm582_vm1, %v4865_v33 }
  0x90   : > { %3880 = vmatprep.mubr.msk.bf16.mxu0 %vm582_vm1, %v4886_v44 }
  0x95   : > { %3717 = vmatmul.mubr.msk.bf16.gmra.mrb[24].mxu1 %vm582_vm1, %v4945_v56 }
  0x96   : > { %3720 = vmatprep.mubr.msk.bf16.mxu1 %vm582_vm1, %v4949_v55 }
  0x97   : > { %3881 = vmatmul.mubr.msk.bf16.gmra.mrb[8].mxu0 %vm582_vm1, %v4901_v47 }
  0x98   : > { %3884 = vmatprep.mubr.msk.bf16.mxu0 %vm582_vm1, %v4916_v4 }
  0x9d   : > { %3721 = vmatmul.mubr.msk.bf16.gmra.mrb[28].mxu1 %vm582_vm1, %v4953_v51 }
  0x9e   : > { %3728 = vmatprep.mubr.msk.bf16.mxu1 %vm582_vm1, %v1131_v28  ;;  %v5977_v28 = vld [vmem:[#allocation5_spill] sm:$0xff] }
  0x9f   : > { %3885 = vmatmul.mubr.msk.bf16.gmra.mrb[12].mxu0 %vm582_vm1, %v4926_v39 }
  0xa0   : > { %3888 = vmatprep.mubr.msk.bf16.mxu0 %vm582_vm1, %v4933_v46 }
  0xa5   : > { %3729 = vmatmul.mubr.msk.bf16.vlgmr.msra.gmra.mrb[0].mxu1 %vm582_vm1, %v4747_v34  ;;  %v5979_v34 = vld [vmem:[#allocation20_spill] sm:$0xff] }
  0xa6   : > { %3761 = vmatpush3.bf16.msra.mxu1 %v5033_v48  ;;  %3732 = vmatprep.mubr.msk.bf16.mxu1 %vm582_vm1, %v5976_v9  ;;  %v5161_v48 = vpack.c.bf16 %v363_v41, %v362_v21  ;;  %v5982_v21 = vld [vmem:[#allocation8_spill] sm:$0xff]  ;;  %v5983_v41 = vld [vmem:[#allocation9_spill] sm:$0xff] }
  0xa7   : > { %3762 = vmatprep.subr.bf16.mxu1 %v4309_v0  ;;  %3889 = vmatmul.mubr.msk.bf16.gmra.mrb[16].mxu0 %vm582_vm1, %v4937_v32 }
  0xa8   : > { %3892 = vmatprep.mubr.msk.bf16.mxu0 %vm582_vm1, %v4941_v13 }
  0xaa   : > { %3763 = vmatpush3.bf16.msra.mxu1 %v4309_v0 }
  0xab   : > { %3976 = vmatprep.subr.bf16.mxu1 %v5977_v28 }
  0xad   : > { %3733 = vmatmul.mubr.msk.bf16.gmra.mrb[4].mxu1 %vm582_vm1, %v5978_v63 }
  0xae   : > { %3736 = vmatprep.mubr.msk.bf16.mxu1 %vm582_vm1, %v5979_v34 }
  0xaf   : > { %3893 = vmatmul.mubr.msk.bf16.gmra.mrb[20].mxu0 %vm582_vm1, %v4945_v56 }
  0xb0   : > { %3896 = vmatprep.mubr.msk.bf16.mxu0 %vm582_vm1, %v4949_v55 }
  0xb5   : > { %3737 = vmatmul.mubr.msk.bf16.gmra.mrb[8].mxu1 %vm582_vm1, %v5980_v17 }
  0xb6   : > { %3740 = vmatprep.mubr.msk.bf16.mxu1 %vm582_vm1, %v4961_v16 }
  0xb7   : > { %3897 = vmatmul.mubr.msk.bf16.gmra.mrb[24].mxu0 %vm582_vm1, %v4953_v51 }
  0xb8   : > { %3900 = vmatprep.mubr.msk.bf16.mxu0 %vm582_vm1, %v5161_v48 }
  0xbd   : > { %3741 = vmatmul.mubr.msk.bf16.gmra.mrb[12].mxu1 %vm582_vm1, %v4968_v37 }
  0xbe   : > { %3744 = vmatprep.mubr.msk.bf16.mxu1 %vm582_vm1, %v4991_v50 }
  0xbf   : > { %3901 = vmatmul.mubr.msk.bf16.gmra.mrb[28].mxu0 %vm582_vm1, %v2064_v14 }
  0xc0   : > { %3908 = vmatprep.mubr.msk.bf16.mxu0 %vm582_vm1, %v5981_v31 }
  0xc5   : > { %3745 = vmatmul.mubr.msk.bf16.gmra.mrb[16].mxu1 %vm582_vm1, %v4995_v2 }
  0xc6   : > { %3748 = vmatprep.mubr.msk.bf16.mxu1 %vm582_vm1, %v5015_v27 }
  0xc7   : > { %3909 = vmatmul.mubr.msk.bf16.vlgmr.msra.gmra.mrb[0].mxu0 %vm582_vm1, %v5982_v21 }
  0xc8   : > { %3941 = vmatpush3.bf16.msra.mxu0 %v4310_v30  ;;  %3912 = vmatprep.mubr.msk.bf16.mxu0 %vm582_vm1, %v5983_v41 }
  0xc9   : > { %3942 = vmatprep.subr.bf16.mxu0 %v4311_v3 }
  0xcc   : > { %3943 = vmatpush3.bf16.msra.mxu0 %v4311_v3 }
  0xcd   : > { %3749 = vmatmul.mubr.msk.bf16.gmra.mrb[20].mxu1 %vm582_vm1, %v5019_v35 }
  0xce   : > { %3752 = vmatprep.mubr.msk.bf16.mxu1 %vm582_vm1, %v5044_v43 }
  0xcf   : > { %3913 = vmatmul.mubr.msk.bf16.gmra.mrb[4].mxu0 %vm582_vm1, %v5984_v6 }
  0xd0   : > { %3916 = vmatprep.mubr.msk.bf16.mxu0 %vm582_vm1, %v5985_v7 }
  0xd5   : > { %3753 = vmatmul.mubr.msk.bf16.gmra.mrb[24].mxu1 %vm582_vm1, %v5048_v57 }
  0xd6   : > { %3756 = vmatprep.mubr.msk.bf16.mxu1 %vm582_vm1, %v5069_v1 }
  0xd7   : > { %3917 = vmatmul.mubr.msk.bf16.gmra.mrb[8].mxu0 %vm582_vm1, %v5986_v26 }
  0xd8   : > { %3920 = vmatprep.mubr.msk.bf16.mxu0 %vm582_vm1, %v5987_v53 }
  0xdd   : > { %3757 = vmatmul.mubr.msk.bf16.gmra.mrb[28].mxu1 %vm582_vm1, %v5073_v42 }
  0xde   : > { %3764 = vmatprep.mubr.msk.bf16.mxu1 %vm582_vm1, %v4543_v15  ;;  %v5992_v15 = vld [vmem:[#allocation19_spill] sm:$0xff] }
  0xdf   : > { %3921 = vmatmul.mubr.msk.bf16.gmra.mrb[12].mxu0 %vm582_vm1, %v5988_v54 }
  0xe0   : > { %3924 = vmatprep.mubr.msk.bf16.mxu0 %vm582_vm1, %v5989_v60 }
  0xe5   : > { %3765 = vmatmul.mubr.msk.bf16.vlgmr.msra.gmra.mrb[0].mxu1 %vm582_vm1, %v4810_v58  ;;  %v2276_v58 = vrot.slane %v365_v23, 1 }
  0xe6   : > { %3978 = vmatpush3.bf16.msra.mxu1 %v5977_v28  ;;  %3768 = vmatprep.mubr.msk.bf16.mxu1 %vm582_vm1, %v4841_v18  ;;  %v2277_v18 = vrot.slane %v366_v61, 1 }
  0xe7   : > { %3977 = vmatprep.subr.bf16.mxu1 %v5990_v10  ;;  %3925 = vmatmul.mubr.msk.bf16.gmra.mrb[16].mxu0 %vm582_vm1, %v5991_v20 }
  0xe8   : > { %3928 = vmatprep.mubr.msk.bf16.mxu0 %vm582_vm1, %v5992_v15 }
  0xea   : > { %3979 = vmatpush3.bf16.msra.mxu1 %v5990_v10 }
  0xed   : > { %3769 = vmatmul.mubr.msk.bf16.gmra.mrb[4].mxu1 %vm582_vm1, %v4851_v45  ;;  %v2278_v45 = vsel %vm436_vm0, %v2276_v58, %v2277_v18 }
  0xee   : > { %3772 = vmatprep.mubr.msk.bf16.mxu1 %vm582_vm1, %v4865_v33  ;;  %v2280_v33 = vsel %vm436_vm0, %v2277_v18, %v2279_v40 }
  0xef   : > { %3929 = vmatmul.mubr.msk.bf16.gmra.mrb[20].mxu0 %vm582_vm1, %v4907_v19  ;;  %v2288_v52 = vpack.c.bf16 %v2280_v33, %v2278_v45 }
  0xf0   : > { %3932 = vmatprep.mubr.msk.bf16.mxu0 %vm582_vm1, %v4920_v8 }
  0xf5   : > { %3773 = vmatmul.mubr.msk.bf16.gmra.mrb[8].mxu1 %vm582_vm1, %v4886_v44 }
  0xf6   : > { %3776 = vmatprep.mubr.msk.bf16.mxu1 %vm582_vm1, %v4901_v47 }
  0xf7   : > { %3933 = vmatmul.mubr.msk.bf16.gmra.mrb[24].mxu0 %vm582_vm1, %v4983_v29 }
  0xf8   : > { %3936 = vmatprep.mubr.msk.bf16.mxu0 %vm582_vm1, %v5085_v24 }
  0xfd   : > { %3777 = vmatmul.mubr.msk.bf16.gmra.mrb[12].mxu1 %vm582_vm1, %v4916_v4 }
  0xfe   : > { %3780 = vmatprep.mubr.msk.bf16.mxu1 %vm582_vm1, %v4926_v39 }
  0xff   : > { %3937 = vmatmul.mubr.msk.bf16.gmra.mrb[28].mxu0 %vm582_vm1, %v2288_v52 }
 0x100   : > { %3944 = vmatprep.mubr.msk.bf16.mxu0 %vm582_vm1, %v5976_v9 }
 0x105   : > { %3781 = vmatmul.mubr.msk.bf16.gmra.mrb[16].mxu1 %vm582_vm1, %v4933_v46 }
 0x106   : > { %3784 = vmatprep.mubr.msk.bf16.mxu1 %vm582_vm1, %v4937_v32 }
 0x107   : > { %3945 = vmatmul.mubr.msk.bf16.vlgmr.msra.gmra.mrb[0].mxu0 %vm582_vm1, %v5978_v63 }
 0x108   : > { %3948 = vmatprep.mubr.msk.bf16.mxu0 %vm582_vm1, %v5979_v34 }
 0x10d   : > { %3785 = vmatmul.mubr.msk.bf16.gmra.mrb[20].mxu1 %vm582_vm1, %v4941_v13 }
 0x10e   : > { %3788 = vmatprep.mubr.msk.bf16.mxu1 %vm582_vm1, %v4945_v56 }
 0x10f   : > { %3949 = vmatmul.mubr.msk.bf16.gmra.mrb[4].mxu0 %vm582_vm1, %v5980_v17 }
 0x110   : > { %3952 = vmatprep.mubr.msk.bf16.mxu0 %vm582_vm1, %v4961_v16 }
 0x115   : > { %3789 = vmatmul.mubr.msk.bf16.gmra.mrb[24].mxu1 %vm582_vm1, %v4949_v55 }
 0x116   : > { %3792 = vmatprep.mubr.msk.bf16.mxu1 %vm582_vm1, %v4953_v51 }
 0x117   : > { %3953 = vmatmul.mubr.msk.bf16.gmra.mrb[8].mxu0 %vm582_vm1, %v4968_v37 }
 0x118   : > { %3956 = vmatprep.mubr.msk.bf16.mxu0 %vm582_vm1, %v4991_v50 }
 0x11d   : > { %3793 = vmatmul.mubr.msk.bf16.gmra.mrb[28].mxu1 %vm582_vm1, %v5161_v48 }
 0x11e   : > { %3816 = vmatprep.mubr.msk.bf16.mxu1 %vm582_vm1, %v5988_v54 }
 0x11f   : > { %3957 = vmatmul.mubr.msk.bf16.gmra.mrb[12].mxu0 %vm582_vm1, %v4995_v2 }
 0x120   : > { %3960 = vmatprep.mubr.msk.bf16.mxu0 %vm582_vm1, %v5015_v27 }
 0x125   : > { %3817 = vmatmul.mubr.msk.bf16.vlgmr.msra.gmra.mrb[16].mxu1 %vm582_vm1, %v5989_v60 }
 0x126   : > { %3820 = vmatprep.mubr.msk.bf16.mxu1 %vm582_vm1, %v5991_v20 }
 0x127   : > { %3961 = vmatmul.mubr.msk.bf16.gmra.mrb[16].mxu0 %vm582_vm1, %v5019_v35 }
 0x128   : > { %3964 = vmatprep.mubr.msk.bf16.mxu0 %vm582_vm1, %v5044_v43 }
 0x12d   : > { %3821 = vmatmul.mubr.msk.bf16.gmra.mrb[20].mxu1 %vm582_vm1, %v5992_v15 }
 0x12e   : > { %3824 = vmatprep.mubr.msk.bf16.mxu1 %vm582_vm1, %v4907_v19 }
 0x12f   : > { %3965 = vmatmul.mubr.msk.bf16.gmra.mrb[20].mxu0 %vm582_vm1, %v5048_v57 }
 0x130   : > { %3968 = vmatprep.mubr.msk.bf16.mxu0 %vm582_vm1, %v5069_v1 }
 0x135   : > { %3825 = vmatmul.mubr.msk.bf16.gmra.mrb[24].mxu1 %vm582_vm1, %v4920_v8 }
 0x136   : > { %3828 = vmatprep.mubr.msk.bf16.mxu1 %vm582_vm1, %v4983_v29 }
 0x137   : > { %3969 = vmatmul.mubr.msk.bf16.gmra.mrb[24].mxu0 %vm582_vm1, %v5073_v42 }
 0x138   : > { %3972 = vmatprep.mubr.msk.bf16.mxu0 %vm582_vm1, %v5087_v62 }
 0x13d   : > { %3829 = vmatmul.mubr.msk.bf16.gmra.mrb[28].mxu1 %vm582_vm1, %v5085_v24 }
 0x13f   : > { %3973 = vmatmul.mubr.msk.bf16.gmra.mrb[28].mxu0 %vm582_vm1, %v2509_v22 }
 0x1b8   : > { %v3766_v44 = vpop.f32.mrb[0].mxu1 }
 0x1b9   : > { %v1455_v37 = vpop.f32.mrb[1].mxu1 }
 0x1ba   : > { %v3767_v47 = vpop.f32.mrb[2].mxu1 }
 0x1bb   : > { %v1458_v19 = vpop.f32.mrb[3].mxu1 }
 0x1c0   : > { %v3770_v4 = vpop.f32.mrb[4].mxu1 }
 0x1c1   : > { %v1471_v8 = vpop.f32.mrb[5].mxu1 }
 0x1c2   : > { %v3771_v39 = vpop.f32.mrb[6].mxu1 }
 0x1c3   : > { %v1474_v46 = vpop.f32.mrb[7].mxu1 }
 0x1c8   : > { %v3774_v32 = vpop.f32.mrb[8].mxu1 }
 0x1c9   : > { %v1487_v13 = vpop.f32.mrb[9].mxu1 }
 0x1ca   : > { %v3775_v56 = vpop.f32.mrb[10].mxu1 }
 0x1cb   : > { %v1490_v55 = vpop.f32.mrb[11].mxu1 }
 0x1d0   : > { %v3778_v51 = vpop.f32.mrb[12].mxu1 }
 0x1d1   : > { %v1503_v16 = vpop.f32.mrb[13].mxu1 }
 0x1d2   : > { %v3779_v29 = vpop.f32.mrb[14].mxu1 }
 0x1d3   : > { %v1506_v50 = vpop.f32.mrb[15].mxu1 }
 0x1da   : > { %v3946_v2 = vpop.f32.mrb[0].mxu0 }
 0x1db   : > { %v5320_v27 = vadd.f32 %v3946_v2, %v3766_v44  ;;  %v2559_v35 = vpop.f32.mrb[1].mxu0 }
 0x1dc   : > { %v5322_v43 = vadd.f32 %v2559_v35, %v1455_v37  ;;  %v3947_v57 = vpop.f32.mrb[2].mxu0 }
 0x1dd   : > { %v5324_v1 = vadd.f32 %v3947_v57, %v3767_v47  ;;  %v2562_v42 = vpop.f32.mrb[3].mxu0  ;;  %v2721_v30 = vsel %vm582_vm1, %v5320_v27, 0.0 }
 0x1de   : > { %v5326_v59 = vadd.f32 %v2562_v42, %v1458_v19  ;;  %v2718_v24 = vsel %vm582_vm1, %v5322_v43, 0.0 }
 0x1df   : > { %v2723_v34 = vsel %vm582_vm1, %v5324_v1, 0.0 }
 0x1e0   : > { %v2719_v62 = vsel %vm582_vm1, %v5326_v59, 0.0 }
 0x1e1   : > { %v2720_v5 = vadd.f32 %v2719_v62, %v2718_v24 }
 0x1e2   : > { %v3950_v0 = vpop.f32.mrb[4].mxu0 }
 0x1e3   : > { %v2722_v9 = vadd.f32 %v2721_v30, %v2720_v5  ;;  %v5334_v28 = vadd.f32 %v3950_v0, %v3770_v4  ;;  %v2575_v63 = vpop.f32.mrb[5].mxu0 }
 0x1e4   : > { %v5338_v17 = vadd.f32 %v2575_v63, %v1471_v8  ;;  %v3951_v48 = vpop.f32.mrb[6].mxu0 }
 0x1e5   : > { %v2724_v23 = vadd.f32 %v2723_v34, %v2722_v9  ;;  %v5340_v61 = vadd.f32 %v3951_v48, %v3771_v39  ;;  %v2578_v38 = vpop.f32.mrb[7].mxu0  ;;  %v2729_v11 = vsel %vm582_vm1, %v5334_v28, 0.0 }
 0x1e6   : > { %v2725_v25 = vsel %vm582_vm1, %v5338_v17, 0.0  ;;  %v5344_v12 = vadd.f32 %v2578_v38, %v1474_v46 }
 0x1e7   : > { %v2726_v49 = vadd.f32 %v2725_v25, %v2724_v23  ;;  %v2731_v41 = vsel %vm582_vm1, %v5340_v61, 0.0 }
 0x1e8   : > { %v2727_v14 = vsel %vm582_vm1, %v5344_v12, 0.0 }
 0x1e9   : > { %v2728_v36 = vadd.f32 %v2727_v14, %v2726_v49 }
 0x1ea   : > { %v3954_v22 = vpop.f32.mrb[8].mxu0 }
 0x1eb   : > { %v2730_v31 = vadd.f32 %v2729_v11, %v2728_v36  ;;  %v5350_v3 = vadd.f32 %v3954_v22, %v3774_v32  ;;  %v2591_v21 = vpop.f32.mrb[9].mxu0 }
 0x1ec   : > { %v5354_v6 = vadd.f32 %v2591_v21, %v1487_v13  ;;  %v3955_v7 = vpop.f32.mrb[10].mxu0 }
 0x1ed   : > { %v2732_v26 = vadd.f32 %v2731_v41, %v2730_v31  ;;  %v5356_v53 = vadd.f32 %v3955_v7, %v3775_v56  ;;  %v2594_v54 = vpop.f32.mrb[11].mxu0  ;;  %v2737_v18 = vsel %vm582_vm1, %v5350_v3, 0.0 }
 0x1ee   : > { %v2733_v60 = vsel %vm582_vm1, %v5354_v6, 0.0  ;;  %v5360_v10 = vadd.f32 %v2594_v54, %v1490_v55 }
 0x1ef   : > { %v2734_v20 = vadd.f32 %v2733_v60, %v2732_v26  ;;  %v2739_v44 = vsel %vm582_vm1, %v5356_v53, 0.0 }
 0x1f0   : > { %v2735_v15 = vsel %vm582_vm1, %v5360_v10, 0.0 }
 0x1f1   : > { %v2736_v58 = vadd.f32 %v2735_v15, %v2734_v20 }
 0x1f2   : > { %v3958_v40 = vpop.f32.mrb[12].mxu0 }
 0x1f3   : > { %v2738_v45 = vadd.f32 %v2737_v18, %v2736_v58  ;;  %v5366_v33 = vadd.f32 %v3958_v40, %v3778_v51  ;;  %v2607_v52 = vpop.f32.mrb[13].mxu0 }
 0x1f4   : > { %v5370_v37 = vadd.f32 %v2607_v52, %v1503_v16  ;;  %v3959_v47 = vpop.f32.mrb[14].mxu0 }
 0x1f5   : > { %v2740_v19 = vadd.f32 %v2739_v44, %v2738_v45  ;;  %v5372_v4 = vadd.f32 %v3959_v47, %v3779_v29  ;;  %v2610_v8 = vpop.f32.mrb[15].mxu0  ;;  %v2745_v16 = vsel %vm582_vm1, %v5366_v33, 0.0 }
 0x1f6   : > { %v2741_v39 = vsel %vm582_vm1, %v5370_v37, 0.0  ;;  %v5376_v46 = vadd.f32 %v2610_v8, %v1506_v50 }
 0x1f7   : > { %v2742_v32 = vadd.f32 %v2741_v39, %v2740_v19  ;;  %v2747_v50 = vsel %vm582_vm1, %v5372_v4, 0.0 }
 0x1f8   : > { %v3818_v13 = vpop.f32.mrb[16].mxu1  ;;  %v2743_v56 = vsel %vm582_vm1, %v5376_v46, 0.0 }
 0x1f9   : > { %v1743_v55 = vpop.f32.mrb[17].mxu1  ;;  %v2744_v51 = vadd.f32 %v2743_v56, %v2742_v32 }
 0x1fa   : > { %v3819_v2 = vpop.f32.mrb[18].mxu1  ;;  %v3962_v35 = vpop.f32.mrb[16].mxu0 }
 0x1fb   : > { %v1746_v29 = vpop.f32.mrb[19].mxu1  ;;  %v2746_v57 = vadd.f32 %v2745_v16, %v2744_v51  ;;  %v5382_v42 = vadd.f32 %v3962_v35, %v3818_v13  ;;  %v2623_v24 = vpop.f32.mrb[17].mxu0 }
 0x1fc   : > { %v5386_v62 = vadd.f32 %v2623_v24, %v1743_v55  ;;  %v3963_v5 = vpop.f32.mrb[18].mxu0 }
 0x1fd   : > { %v2748_v30 = vadd.f32 %v2747_v50, %v2746_v57  ;;  %v5388_v0 = vadd.f32 %v3963_v5, %v3819_v2  ;;  %v2626_v9 = vpop.f32.mrb[19].mxu0  ;;  %v2753_v36 = vsel %vm582_vm1, %v5382_v42, 0.0 }
 0x1fe   : > { %v2749_v63 = vsel %vm582_vm1, %v5386_v62, 0.0  ;;  %v5392_v34 = vadd.f32 %v2626_v9, %v1746_v29 }
 0x1ff   : > { %v2750_v48 = vadd.f32 %v2749_v63, %v2748_v30  ;;  %v2755_v7 = vsel %vm582_vm1, %v5388_v0, 0.0 }
 0x200   : > { %v3822_v23 = vpop.f32.mrb[20].mxu1  ;;  %v2751_v38 = vsel %vm582_vm1, %v5392_v34, 0.0 }
 0x201   : > { %v1759_v25 = vpop.f32.mrb[21].mxu1  ;;  %v2752_v49 = vadd.f32 %v2751_v38, %v2750_v48 }
 0x202   : > { %v3823_v14 = vpop.f32.mrb[22].mxu1  ;;  %v3966_v11 = vpop.f32.mrb[20].mxu0 }
 0x203   : > { %v1762_v22 = vpop.f32.mrb[23].mxu1  ;;  %v2754_v31 = vadd.f32 %v2753_v36, %v2752_v49  ;;  %v5398_v21 = vadd.f32 %v3966_v11, %v3822_v23  ;;  %v2639_v41 = vpop.f32.mrb[21].mxu0 }
 0x204   : > { %v5402_v26 = vadd.f32 %v2639_v41, %v1759_v25  ;;  %v3967_v54 = vpop.f32.mrb[22].mxu0 }
 0x205   : > { %v2756_v60 = vadd.f32 %v2755_v7, %v2754_v31  ;;  %v5404_v20 = vadd.f32 %v3967_v54, %v3823_v14  ;;  %v2642_v15 = vpop.f32.mrb[23].mxu0  ;;  %v2761_v8 = vsel %vm582_vm1, %v5398_v21, 0.0 }
 0x206   : > { %v2757_v58 = vsel %vm582_vm1, %v5402_v26, 0.0  ;;  %v5408_v18 = vadd.f32 %v2642_v15, %v1762_v22 }
 0x207   : > { %v2758_v40 = vadd.f32 %v2757_v58, %v2756_v60  ;;  %v2763_v51 = vsel %vm582_vm1, %v5404_v20, 0.0 }
 0x208   : > { %v3826_v45 = vpop.f32.mrb[24].mxu1  ;;  %v2759_v52 = vsel %vm582_vm1, %v5408_v18, 0.0 }
 0x209   : > { %v1775_v44 = vpop.f32.mrb[25].mxu1  ;;  %v2760_v47 = vadd.f32 %v2759_v52, %v2758_v40 }
 0x20a   : > { %v3827_v19 = vpop.f32.mrb[26].mxu1  ;;  %v3970_v39 = vpop.f32.mrb[24].mxu0 }
 0x20b   : > { %v1778_v32 = vpop.f32.mrb[27].mxu1  ;;  %v2762_v13 = vadd.f32 %v2761_v8, %v2760_v47  ;;  %v4004_v56 = vadd.f32 %v3970_v39, %v3826_v45  ;;  %v2655_v55 = vpop.f32.mrb[25].mxu0 }
 0x20c   : > { %v4005_v2 = vadd.f32 %v2655_v55, %v1775_v44  ;;  %v3971_v16 = vpop.f32.mrb[26].mxu0 }
 0x20d   : > { %v2764_v35 = vadd.f32 %v2763_v51, %v2762_v13  ;;  %v4006_v29 = vadd.f32 %v3971_v16, %v3827_v19  ;;  %v2658_v57 = vpop.f32.mrb[27].mxu0  ;;  %v2769_v38 = vsel %vm582_vm1, %v4004_v56, 0.0 }
 0x20e   : > { %v2765_v24 = vsel %vm582_vm1, %v4005_v2, 0.0  ;;  %v4007_v50 = vadd.f32 %v2658_v57, %v1778_v32 }
 0x20f   : > { %v2766_v5 = vadd.f32 %v2765_v24, %v2764_v35  ;;  %v2771_v22 = vsel %vm582_vm1, %v4006_v29, 0.0 }
 0x210   : > { %v3830_v30 = vpop.f32.mrb[28].mxu1  ;;  %v2767_v9 = vsel %vm582_vm1, %v4007_v50, 0.0 }
 0x211   : > { %v1791_v63 = vpop.f32.mrb[29].mxu1  ;;  %v2768_v48 = vadd.f32 %v2767_v9, %v2766_v5 }
 0x212   : > { %v3831_v23 = vpop.f32.mrb[30].mxu1  ;;  %v3974_v25 = vpop.f32.mrb[28].mxu0 }
 0x213   : > { %v1794_v49 = vpop.f32.mrb[31].mxu1  ;;  %v2770_v14 = vadd.f32 %v2769_v38, %v2768_v48  ;;  %v4008_v36 = vadd.f32 %v3974_v25, %v3830_v30  ;;  %v2671_v11 = vpop.f32.mrb[29].mxu0 }
 0x214   : > { %v4009_v31 = vadd.f32 %v2671_v11, %v1791_v63  ;;  %v3975_v41 = vpop.f32.mrb[30].mxu0 }
 0x215   : > { %v2772_v7 = vadd.f32 %v2771_v22, %v2770_v14  ;;  %v4010_v54 = vadd.f32 %v3975_v41, %v3831_v23  ;;  %v2674_v60 = vpop.f32.mrb[31].mxu0  ;;  %v2777_v44 = vsel %vm582_vm1, %v4008_v36, 0.0 }
 0x216   : > { %v2773_v15 = vsel %vm582_vm1, %v4009_v31, 0.0  ;;  %v4011_v58 = vadd.f32 %v2674_v60, %v1794_v49 }
 0x217   : > { %v2774_v40 = vadd.f32 %v2773_v15, %v2772_v7  ;;  %v2779_v19 = vsel %vm582_vm1, %v4010_v54, 0.0 }
 0x218   : > { %v2775_v45 = vsel %vm582_vm1, %v4011_v58, 0.0 }
 0x219   : > { %v2776_v52 = vadd.f32 %v2775_v45, %v2774_v40 }
 0x21b   : > { %v2778_v47 = vadd.f32 %v2777_v44, %v2776_v52 }
 0x21d   : > { %v2780_v8 = vadd.f32 %v2779_v19, %v2778_v47 }
 0x21f   : > { %v2781_v39 = vrot.slane %v2780_v8, 4 }
 0x221   : > { %v2782_v32 = vadd.f32 %v2781_v39, %v2780_v8 }
 0x223   : > { %v2783_v13 = vrot.slane %v2782_v32, 2 }
 0x225   : > { %v2784_v55 = vadd.f32 %v2783_v13, %v2782_v32 }
 0x227   : > { %v2785_v51 = vrot.slane %v2784_v55, 1 }
 0x229   : > { %v2786_v16 = vadd.f32 %v2785_v51, %v2784_v55 }
 0x22b   : > { %v2788_v35 = vmul.f32 0.00390625, %v2786_v16 }
 0x22d   : > { %v5425_v57 = vsub.f32 %v5360_v10, %v2788_v35  ;;  %v5428_v24 = vsub.f32 %v5356_v53, %v2788_v35  ;;  %v5431_v5 = vsub.f32 %v5370_v37, %v2788_v35  ;;  %v5434_v30 = vsub.f32 %v5376_v46, %v2788_v35 }
 0x22e   : > { %v5437_v9 = vsub.f32 %v5366_v33, %v2788_v35  ;;  %v5440_v63 = vsub.f32 %v5372_v4, %v2788_v35  ;;  %v5443_v48 = vsub.f32 %v5386_v62, %v2788_v35  ;;  %v5446_v10 = vsub.f32 %v5392_v34, %v2788_v35 }
 0x22f   : > { %v5449_v53 = vsub.f32 %v5382_v42, %v2788_v35  ;;  %v5452_v37 = vsub.f32 %v5388_v0, %v2788_v35  ;;  %v5455_v46 = vsub.f32 %v5402_v26, %v2788_v35  ;;  %v5458_v33 = vsub.f32 %v5408_v18, %v2788_v35 }
 0x230   : > { %v5461_v4 = vsub.f32 %v5398_v21, %v2788_v35  ;;  %v5464_v62 = vsub.f32 %v5404_v20, %v2788_v35  ;;  %v5466_v34 = vsub.f32 %v4005_v2, %v2788_v35  ;;  %v5468_v23 = vsub.f32 %v4007_v50, %v2788_v35 }
 0x231   : > { %v5470_v42 = vsub.f32 %v4004_v56, %v2788_v35  ;;  %v5472_v0 = vsub.f32 %v4006_v29, %v2788_v35  ;;  %v5474_v38 = vsub.f32 %v4009_v31, %v2788_v35  ;;  %v5476_v26 = vsub.f32 %v4011_v58, %v2788_v35 }
 0x232   : > { %v5478_v18 = vsub.f32 %v4008_v36, %v2788_v35  ;;  %v5480_v25 = vsub.f32 %v4010_v54, %v2788_v35  ;;  %v5483_v21 = vsub.f32 %v5322_v43, %v2788_v35  ;;  %v5486_v20 = vsub.f32 %v5326_v59, %v2788_v35 }
 0x233   : > { %v5489_v2 = vsub.f32 %v5320_v27, %v2788_v35  ;;  %v5492_v56 = vsub.f32 %v5324_v1, %v2788_v35  ;;  %v5499_v49 = vsub.f32 %v5338_v17, %v2788_v35  ;;  %v5504_v59 = vsub.f32 %v5344_v12, %v2788_v35 }
 0x234   : > { %v2821_v29 = vmul.f32 %v5483_v21, %v5483_v21  ;;  %v2822_v50 = vmul.f32 %v5486_v20, %v5486_v20  ;;  %v5511_v11 = vsub.f32 %v5334_v28, %v2788_v35  ;;  %v5517_v12 = vsub.f32 %v5340_v61, %v2788_v35 }
 0x235   : > { %v2823_v43 = vmul.f32 %v5489_v2, %v5489_v2  ;;  %v2824_v27 = vmul.f32 %v5492_v56, %v5492_v56  ;;  %v2825_v17 = vmul.f32 %v5499_v49, %v5499_v49  ;;  %v2826_v41 = vmul.f32 %v5504_v59, %v5504_v59 }
 0x236   : > { %v2853_v1 = vsel %vm582_vm1, %v2821_v29, 0.0  ;;  %v2854_v14 = vsel %vm582_vm1, %v2822_v50, 0.0  ;;  %v5523_v60 = vsub.f32 %v5354_v6, %v2788_v35  ;;  %v2827_v28 = vmul.f32 %v5511_v11, %v5511_v11 }
 0x237   : > { %v2855_v36 = vadd.f32 %v2854_v14, %v2853_v1  ;;  %v2856_v22 = vsel %vm582_vm1, %v2823_v43, 0.0  ;;  %v2858_v7 = vsel %vm582_vm1, %v2824_v27, 0.0  ;;  %v2860_v15 = vsel %vm582_vm1, %v2825_v17, 0.0 }
 0x238   : > { %v2828_v40 = vmul.f32 %v5517_v12, %v5517_v12  ;;  %v2862_v61 = vsel %vm582_vm1, %v2826_v41, 0.0  ;;  %v5532_v52 = vsub.f32 %v5350_v3, %v2788_v35  ;;  %v2829_v44 = vmul.f32 %v5523_v60, %v5523_v60 }
 0x239   : > { %v2857_v31 = vadd.f32 %v2856_v22, %v2855_v36  ;;  %v2864_v6 = vsel %vm582_vm1, %v2827_v28, 0.0  ;;  %v2830_v19 = vmul.f32 %v5425_v57, %v5425_v57  ;;  %v2832_v3 = vmul.f32 %v5428_v24, %v5428_v24 }
 0x23a   : > { %v2866_v8 = vsel %vm582_vm1, %v2828_v40, 0.0  ;;  %v2831_v32 = vmul.f32 %v5532_v52, %v5532_v52  ;;  %v2868_v13 = vsel %vm582_vm1, %v2829_v44, 0.0  ;;  %v2833_v35 = vmul.f32 %v5431_v5, %v5431_v5 }
 0x23b   : > { %v2859_v54 = vadd.f32 %v2858_v7, %v2857_v31  ;;  %v2870_v51 = vsel %vm582_vm1, %v2830_v19, 0.0  ;;  %v2834_v43 = vmul.f32 %v5434_v30, %v5434_v30  ;;  %v2874_v27 = vsel %vm582_vm1, %v2832_v3, 0.0 }
 0x23c   : > { %v2872_v29 = vsel %vm582_vm1, %v2831_v32, 0.0  ;;  %v2835_v14 = vmul.f32 %v5437_v9, %v5437_v9  ;;  %v2876_v36 = vsel %vm582_vm1, %v2833_v35, 0.0  ;;  %v2836_v22 = vmul.f32 %v5440_v63, %v5440_v63 }
 0x23d   : > { %v2861_v58 = vadd.f32 %v2860_v15, %v2859_v54  ;;  %v2878_v31 = vsel %vm582_vm1, %v2834_v43, 0.0  ;;  %v2837_v7 = vmul.f32 %v5443_v48, %v5443_v48  ;;  %v2838_v15 = vmul.f32 %v5446_v10, %v5446_v10 }
 0x23e   : > { %v2880_v54 = vsel %vm582_vm1, %v2835_v14, 0.0 }
 0x23f   : > { %v2863_v45 = vadd.f32 %v2862_v61, %v2861_v58  ;;  %v2882_v58 = vsel %vm582_vm1, %v2836_v22, 0.0  ;;  %v2839_v61 = vmul.f32 %v5449_v53, %v5449_v53 }
 0x241   : > { %v2865_v47 = vadd.f32 %v2864_v6, %v2863_v45  ;;  %v2884_v45 = vsel %vm582_vm1, %v2837_v7, 0.0  ;;  %v2840_v6 = vmul.f32 %v5452_v37, %v5452_v37 }
 0x243   : > { %v2867_v39 = vadd.f32 %v2866_v8, %v2865_v47  ;;  %v2886_v47 = vsel %vm582_vm1, %v2838_v15, 0.0  ;;  %v2841_v8 = vmul.f32 %v5455_v46, %v5455_v46 }
 0x245   : > { %v2869_v55 = vadd.f32 %v2868_v13, %v2867_v39  ;;  %v2888_v39 = vsel %vm582_vm1, %v2839_v61, 0.0  ;;  %v2842_v13 = vmul.f32 %v5458_v33, %v5458_v33 }
 0x247   : > { %v2871_v16 = vadd.f32 %v2870_v51, %v2869_v55  ;;  %v2890_v55 = vsel %vm582_vm1, %v2840_v6, 0.0  ;;  %v2843_v51 = vmul.f32 %v5461_v4, %v5461_v4 }
 0x249   : > { %v2873_v50 = vadd.f32 %v2872_v29, %v2871_v16  ;;  %v2892_v16 = vsel %vm582_vm1, %v2841_v8, 0.0  ;;  %v2844_v29 = vmul.f32 %v5464_v62, %v5464_v62 }
 0x24b   : > { %v2875_v1 = vadd.f32 %v2874_v27, %v2873_v50  ;;  %v2894_v50 = vsel %vm582_vm1, %v2842_v13, 0.0  ;;  %v2845_v27 = vmul.f32 %v5466_v34, %v5466_v34 }
 0x24d   : > { %v2877_v17 = vadd.f32 %v2876_v36, %v2875_v1  ;;  %v2896_v1 = vsel %vm582_vm1, %v2843_v51, 0.0  ;;  %v2846_v36 = vmul.f32 %v5468_v23, %v5468_v23 }
 0x24f   : > { %v2879_v41 = vadd.f32 %v2878_v31, %v2877_v17  ;;  %v2898_v17 = vsel %vm582_vm1, %v2844_v29, 0.0  ;;  %v2847_v31 = vmul.f32 %v5470_v42, %v5470_v42 }
 0x251   : > { %v2881_v28 = vadd.f32 %v2880_v54, %v2879_v41  ;;  %v2900_v41 = vsel %vm582_vm1, %v2845_v27, 0.0  ;;  %v2848_v54 = vmul.f32 %v5472_v0, %v5472_v0 }
 0x253   : > { %v2883_v40 = vadd.f32 %v2882_v58, %v2881_v28  ;;  %v2902_v28 = vsel %vm582_vm1, %v2846_v36, 0.0  ;;  %v2849_v58 = vmul.f32 %v5474_v38, %v5474_v38 }
 0x255   : > { %v2885_v44 = vadd.f32 %v2884_v45, %v2883_v40  ;;  %v2904_v40 = vsel %vm582_vm1, %v2847_v31, 0.0  ;;  %v2850_v45 = vmul.f32 %v5476_v26, %v5476_v26 }
 0x257   : > { %v2887_v19 = vadd.f32 %v2886_v47, %v2885_v44  ;;  %v2906_v44 = vsel %vm582_vm1, %v2848_v54, 0.0  ;;  %v2851_v47 = vmul.f32 %v5478_v18, %v5478_v18 }
 0x259   : > { %v2889_v32 = vadd.f32 %v2888_v39, %v2887_v19  ;;  %v2908_v19 = vsel %vm582_vm1, %v2849_v58, 0.0  ;;  %v2852_v39 = vmul.f32 %v5480_v25, %v5480_v25 }
 0x25b   : > { %v2891_v3 = vadd.f32 %v2890_v55, %v2889_v32  ;;  %v2910_v32 = vsel %vm582_vm1, %v2850_v45, 0.0  ;;  %v2912_v55 = vsel %vm582_vm1, %v2851_v47, 0.0  ;;  %v2914_v51 = vsel %vm582_vm1, %v2852_v39, 0.0  ;;  %v3064_v45 = vld [vmem:[%s5618_s12 + $0xe8] sm:$0xff] }
 0x25d   : > { %v2893_v35 = vadd.f32 %v2892_v16, %v2891_v3 }
 0x25f   : > { %v2895_v43 = vadd.f32 %v2894_v50, %v2893_v35 }
 0x261   : > { %v2897_v14 = vadd.f32 %v2896_v1, %v2895_v43 }
 0x263   : > { %v2899_v22 = vadd.f32 %v2898_v17, %v2897_v14 }
 0x265   : > { %v2901_v7 = vadd.f32 %v2900_v41, %v2899_v22  ;;  %v5613_v22 = vld [vmem:[%s5926_s2] ss:$0 sm:$0xff] }
 0x267   : > { %v2903_v15 = vadd.f32 %v2902_v28, %v2901_v7  ;;  %v5627_v28 = vld [vmem:[%s5927_s3] ss:$0 sm:$0xff] }
 0x269   : > { %v2905_v61 = vadd.f32 %v2904_v40, %v2903_v15 }
 0x26b   : > { %v2907_v6 = vadd.f32 %v2906_v44, %v2905_v61 }
 0x26d   : > { %v2909_v8 = vadd.f32 %v2908_v19, %v2907_v6 }
 0x26f   : > { %v2911_v13 = vadd.f32 %v2910_v32, %v2909_v8 }
 0x271   : > { %v2913_v3 = vadd.f32 %v2912_v55, %v2911_v13 }
 0x273   : > { %v2915_v16 = vadd.f32 %v2914_v51, %v2913_v3 }
 0x275   : > { %v2916_v35 = vrot.slane %v2915_v16, 4 }
 0x277   : > { %v2917_v29 = vadd.f32 %v2916_v35, %v2915_v16 }
 0x279   : > { %v2918_v50 = vrot.slane %v2917_v29, 2 }
 0x27b   : > { %v2919_v43 = vadd.f32 %v2918_v50, %v2917_v29 }
 0x27d   : > { %v2920_v27 = vrot.slane %v2919_v43, 1 }
 0x27f   : > { %v2921_v1 = vadd.f32 %v2920_v27, %v2919_v43 }
 0x281   : > { %v2922_v14 = vmul.f32 0.00390625, %v2921_v1 }
 0x283   : > { %v2923_v36 = vadd.f32 1e-05, %v2922_v14 }
 0x285   : > { %4312 = vrsqrt.f32 %v2923_v36 }
 0x28f   : > { %v4313_v17 = vpop.eup %4312 }
 0x290   : > { %v2954_v31 = vmul.f32 %v4313_v17, %v5476_v26  ;;  %v2925_v41 = vmul.f32 %v4313_v17, %v5483_v21  ;;  %v2926_v7 = vmul.f32 %v4313_v17, %v5486_v20  ;;  %v2927_v54 = vmul.f32 %v4313_v17, %v5489_v2 }
 0x291   : > { %v2928_v15 = vmul.f32 %v4313_v17, %v5492_v56  ;;  %v2929_v58 = vmul.f32 %v4313_v17, %v5499_v49  ;;  %v2930_v40 = vmul.f32 %v4313_v17, %v5504_v59  ;;  %v2931_v61 = vmul.f32 %v4313_v17, %v5511_v11 }
 0x292   : > { %v2993_v26 = vmul.f32 %v5613_v22, %v2954_v31  ;;  %v2932_v21 = vmul.f32 %v4313_v17, %v5517_v12  ;;  %v2933_v20 = vmul.f32 %v4313_v17, %v5523_v60  ;;  %v2934_v2 = vmul.f32 %v4313_v17, %v5425_v57 }
 0x293   : > { %v2935_v44 = vmul.f32 %v4313_v17, %v5532_v52  ;;  %v2936_v56 = vmul.f32 %v4313_v17, %v5428_v24  ;;  %v2937_v49 = vmul.f32 %v4313_v17, %v5431_v5  ;;  %v2938_v59 = vmul.f32 %v4313_v17, %v5434_v30 }
 0x294   : > { %v3032_v11 = vadd.f32 %v5627_v28, %v2993_v26  ;;  %v2939_v6 = vmul.f32 %v4313_v17, %v5437_v9  ;;  %v2940_v47 = vmul.f32 %v4313_v17, %v5440_v63  ;;  %v2941_v12 = vmul.f32 %v4313_v17, %v5443_v48 }
 0x295   : > { %v2942_v60 = vmul.f32 %v4313_v17, %v5446_v10  ;;  %v2943_v57 = vmul.f32 %v4313_v17, %v5449_v53  ;;  %v2944_v52 = vmul.f32 %v4313_v17, %v5452_v37  ;;  %v2945_v24 = vmul.f32 %v4313_v17, %v5455_v46 }
 0x296   : > { %v3096_v19 = vadd.f32 %v3064_v45, %v3032_v11  ;;  %v2946_v5 = vmul.f32 %v4313_v17, %v5458_v33  ;;  %v2947_v30 = vmul.f32 %v4313_v17, %v5461_v4  ;;  %v2948_v8 = vmul.f32 %v4313_v17, %v5464_v62 }
 0x297   : > { %v2949_v9 = vmul.f32 %v4313_v17, %v5466_v34  ;;  %v2950_v63 = vmul.f32 %v4313_v17, %v5468_v23  ;;  %v2951_v48 = vmul.f32 %v4313_v17, %v5470_v42  ;;  %v2952_v10 = vmul.f32 %v4313_v17, %v5472_v0 }
 0x298   : > { %3128 = vst.msk [vmem:[%s5659_s16 + $0xe8] sm:$0xff] %vm582_vm1, %v3096_v19  ;;  %v2953_v53 = vmul.f32 %v4313_v17, %v5474_v38  ;;  %v2955_v37 = vmul.f32 %v4313_v17, %v5478_v18  ;;  %v2956_v46 = vmul.f32 %v4313_v17, %v5480_v25  ;;  %v2964_v33 = vmul.f32 %v5613_v22, %v2925_v41 }
 0x299   : > { %v2965_v4 = vmul.f32 %v5613_v22, %v2926_v7  ;;  %v2966_v62 = vmul.f32 %v5613_v22, %v2927_v54  ;;  %v2967_v34 = vmul.f32 %v5613_v22, %v2928_v15  ;;  %v2968_v23 = vmul.f32 %v5613_v22, %v2929_v58 }
 0x29a   : > { %v2969_v42 = vmul.f32 %v5613_v22, %v2930_v40  ;;  %v2970_v0 = vmul.f32 %v5613_v22, %v2931_v61  ;;  %v2971_v38 = vmul.f32 %v5613_v22, %v2932_v21  ;;  %v2972_v18 = vmul.f32 %v5613_v22, %v2933_v20 }
 0x29b   : > { %v2973_v25 = vmul.f32 %v5613_v22, %v2934_v2  ;;  %v2974_v39 = vmul.f32 %v5613_v22, %v2935_v44  ;;  %v2975_v32 = vmul.f32 %v5613_v22, %v2936_v56  ;;  %v2976_v13 = vmul.f32 %v5613_v22, %v2937_v49  ;;  %v3037_v56 = vld [vmem:[%s5618_s12 + $0x10] sm:$0xff]  ;;  %v3035_v49 = vld [vmem:[%s5618_s12] sm:$0xff] }
 0x29c   : > { %v2977_v55 = vmul.f32 %v5613_v22, %v2938_v59  ;;  %v2978_v3 = vmul.f32 %v5613_v22, %v2939_v6  ;;  %v2979_v51 = vmul.f32 %v5613_v22, %v2940_v47  ;;  %v2980_v16 = vmul.f32 %v5613_v22, %v2941_v12  ;;  %v3038_v12 = vld [vmem:[%s5618_s12 + $0x18] sm:$0xff] }
 0x29d   : > { %v2981_v35 = vmul.f32 %v5613_v22, %v2942_v60  ;;  %v2982_v29 = vmul.f32 %v5613_v22, %v2943_v57  ;;  %v2983_v50 = vmul.f32 %v5613_v22, %v2944_v52  ;;  %v2984_v43 = vmul.f32 %v5613_v22, %v2945_v24  ;;  %v3036_v60 = vld [vmem:[%s5618_s12 + $0x8] sm:$0xff]  ;;  %v3041_v57 = vld [vmem:[%s5618_s12 + $0x30] sm:$0xff]  ;;  %v3039_v52 = vld [vmem:[%s5618_s12 + $0x20] sm:$0xff] }
 0x29e   : > { %v2985_v27 = vmul.f32 %v5613_v22, %v2946_v5  ;;  %v2986_v1 = vmul.f32 %v5613_v22, %v2947_v30  ;;  %v2987_v14 = vmul.f32 %v5613_v22, %v2948_v8  ;;  %v2988_v36 = vmul.f32 %v5613_v22, %v2949_v9  ;;  %v3042_v8 = vld [vmem:[%s5618_s12 + $0x38] sm:$0xff]  ;;  %v3040_v9 = vld [vmem:[%s5618_s12 + $0x28] sm:$0xff] }
 0x29f   : > { %v2989_v17 = vmul.f32 %v5613_v22, %v2950_v63  ;;  %v2990_v31 = vmul.f32 %v5613_v22, %v2951_v48  ;;  %v2991_v41 = vmul.f32 %v5613_v22, %v2952_v10  ;;  %v2992_v7 = vmul.f32 %v5613_v22, %v2953_v53  ;;  %v3045_v63 = vld [vmem:[%s5618_s12 + $0x50] sm:$0xff]  ;;  %v3043_v48 = vld [vmem:[%s5618_s12 + $0x40] sm:$0xff] }
 0x2a0   : > { %v2994_v54 = vmul.f32 %v5613_v22, %v2955_v37  ;;  %v2995_v15 = vmul.f32 %v5613_v22, %v2956_v46  ;;  %v3003_v58 = vadd.f32 %v5627_v28, %v2964_v33  ;;  %v3004_v40 = vadd.f32 %v5627_v28, %v2965_v4  ;;  %v3046_v33 = vld [vmem:[%s5618_s12 + $0x58] sm:$0xff]  ;;  %v3044_v4 = vld [vmem:[%s5618_s12 + $0x48] sm:$0xff] }
 0x2a1   : > { %v3005_v61 = vadd.f32 %v5627_v28, %v2966_v62  ;;  %v3006_v26 = vadd.f32 %v5627_v28, %v2967_v34  ;;  %v3007_v21 = vadd.f32 %v5627_v28, %v2968_v23  ;;  %v3008_v20 = vadd.f32 %v5627_v28, %v2969_v42  ;;  %v3049_v62 = vld [vmem:[%s5618_s12 + $0x70] sm:$0xff] }
 0x2a2   : > { %v3009_v2 = vadd.f32 %v5627_v28, %v2970_v0  ;;  %v3010_v22 = vadd.f32 %v5627_v28, %v2971_v38  ;;  %v3011_v45 = vadd.f32 %v5627_v28, %v2972_v18  ;;  %v3012_v44 = vadd.f32 %v5627_v28, %v2973_v25  ;;  %v3047_v38 = vld [vmem:[%s5618_s12 + $0x60] sm:$0xff]  ;;  %v3050_v18 = vld [vmem:[%s5618_s12 + $0x78] sm:$0xff]  ;;  %v3048_v25 = vld [vmem:[%s5618_s12 + $0x68] sm:$0xff] }
 0x2a3   : > { %v3013_v59 = vadd.f32 %v5627_v28, %v2974_v39  ;;  %v3014_v11 = vadd.f32 %v5627_v28, %v2975_v32  ;;  %v3015_v6 = vadd.f32 %v5627_v28, %v2976_v13  ;;  %v3016_v47 = vadd.f32 %v5627_v28, %v2977_v55 }
 0x2a4   : > { %v3017_v24 = vadd.f32 %v5627_v28, %v2978_v3  ;;  %v5719_v19 = vadd.f32 %v5627_v28, %v2979_v51  ;;  %v5722_v5 = vadd.f32 %v5627_v28, %v2980_v16  ;;  %v5725_v30 = vadd.f32 %v5627_v28, %v2981_v35  ;;  %v3053_v3 = vld [vmem:[%s5618_s12 + $0x90] sm:$0xff]  ;;  %v3051_v51 = vld [vmem:[%s5618_s12 + $0x80] sm:$0xff]  ;;  %v3054_v16 = vld [vmem:[%s5618_s12 + $0x98] sm:$0xff] }
 0x2a5   : > { %v3021_v10 = vadd.f32 %v5627_v28, %v2982_v29  ;;  %v5733_v53 = vadd.f32 %v5627_v28, %v2983_v50  ;;  %v5736_v37 = vadd.f32 %v5627_v28, %v2984_v43  ;;  %v5739_v46 = vadd.f32 %v5627_v28, %v2985_v27  ;;  %v3052_v27 = vld [vmem:[%s5618_s12 + $0x88] sm:$0xff] }
 0x2a6   : > { %v3025_v34 = vadd.f32 %v5627_v28, %v2986_v1  ;;  %v5746_v23 = vadd.f32 %v5627_v28, %v2987_v14  ;;  %v5749_v42 = vadd.f32 %v5627_v28, %v2988_v36  ;;  %v5752_v0 = vadd.f32 %v5627_v28, %v2989_v17  ;;  %v3057_v1 = vld [vmem:[%s5618_s12 + $0xb0] sm:$0xff]  ;;  %v3055_v14 = vld [vmem:[%s5618_s12 + $0xa0] sm:$0xff] }
 0x2a7   : > { %v5758_v39 = vadd.f32 %v5627_v28, %v2990_v31  ;;  %v5761_v32 = vadd.f32 %v5627_v28, %v2991_v41  ;;  %v5764_v13 = vadd.f32 %v5627_v28, %v2992_v7  ;;  %v5767_v55 = vadd.f32 %v5627_v28, %v2994_v54  ;;  %v3058_v7 = vld [vmem:[%s5618_s12 + $0xb8] sm:$0xff]  ;;  %v3056_v54 = vld [vmem:[%s5618_s12 + $0xa8] sm:$0xff] }
 0x2a8   : > { %v5773_v35 = vadd.f32 %v5627_v28, %v2995_v15  ;;  %v3067_v29 = vadd.f32 %v3035_v49, %v3003_v58  ;;  %v3068_v50 = vadd.f32 %v3036_v60, %v3004_v40  ;;  %v3069_v43 = vadd.f32 %v3037_v56, %v3005_v61  ;;  %v3061_v28 = vld [vmem:[%s5618_s12 + $0xd0] sm:$0xff]  ;;  %v3063_v49 = vld [vmem:[%s5618_s12 + $0xe0] sm:$0xff] }
 0x2a9   : > { %v3070_v36 = vadd.f32 %v3038_v12, %v3006_v26  ;;  %v3071_v17 = vadd.f32 %v3039_v52, %v3007_v21  ;;  %v3072_v31 = vadd.f32 %v3040_v9, %v3008_v20  ;;  %v3073_v41 = vadd.f32 %v3041_v57, %v3009_v2  ;;  %v3059_v26 = vld [vmem:[%s5618_s12 + $0xc0] sm:$0xff]  ;;  %v3062_v21 = vld [vmem:[%s5618_s12 + $0xd8] sm:$0xff]  ;;  %v3060_v20 = vld [vmem:[%s5618_s12 + $0xc8] sm:$0xff] }
 0x2aa   : > { %v3074_v15 = vadd.f32 %v3042_v8, %v3010_v22  ;;  %v3075_v58 = vadd.f32 %v3043_v48, %v3011_v45  ;;  %v3076_v40 = vadd.f32 %v3044_v4, %v3012_v44  ;;  %v3077_v61 = vadd.f32 %v3045_v63, %v3013_v59  ;;  %3099 = vst.msk [vmem:[%s5659_s16] sm:$0xff] %vm582_vm1, %v3067_v29  ;;  %v3065_v56 = vld [vmem:[%s5618_s12 + $0xf0] sm:$0xff]  ;;  %v3066_v59 = vld [vmem:[%s5618_s12 + $0xf8] sm:$0xff] }
 0x2ab   : > { %3100 = vst.msk [vmem:[%s5659_s16 + $0x8] sm:$0xff] %vm582_vm1, %v3068_v50  ;;  %3101 = vst.msk [vmem:[%s5659_s16 + $0x10] sm:$0xff] %vm582_vm1, %v3069_v43  ;;  %v3078_v2 = vadd.f32 %v3046_v33, %v3014_v11  ;;  %v3079_v22 = vadd.f32 %v3047_v38, %v3015_v6  ;;  %v3080_v45 = vadd.f32 %v3048_v25, %v3016_v47 }
 0x2ac   : > { %v3081_v44 = vadd.f32 %v3049_v62, %v3017_v24  ;;  %3102 = vst.msk [vmem:[%s5659_s16 + $0x18] sm:$0xff] %vm582_vm1, %v3070_v36  ;;  %3103 = vst.msk [vmem:[%s5659_s16 + $0x20] sm:$0xff] %vm582_vm1, %v3071_v17  ;;  %v3082_v11 = vadd.f32 %v3050_v18, %v5719_v19  ;;  %v3083_v6 = vadd.f32 %v3051_v51, %v5722_v5 }
 0x2ad   : > { %3104 = vst.msk [vmem:[%s5659_s16 + $0x28] sm:$0xff] %vm582_vm1, %v3072_v31  ;;  %3105 = vst.msk [vmem:[%s5659_s16 + $0x30] sm:$0xff] %vm582_vm1, %v3073_v41  ;;  %v3084_v47 = vadd.f32 %v3052_v27, %v5725_v30  ;;  %v3085_v12 = vadd.f32 %v3053_v3, %v3021_v10  ;;  %v3086_v60 = vadd.f32 %v3054_v16, %v5733_v53 }
 0x2ae   : > { %3106 = vst.msk [vmem:[%s5659_s16 + $0x38] sm:$0xff] %vm582_vm1, %v3074_v15  ;;  %3107 = vst.msk [vmem:[%s5659_s16 + $0x40] sm:$0xff] %vm582_vm1, %v3075_v58  ;;  %v3087_v57 = vadd.f32 %v3055_v14, %v5736_v37  ;;  %v3088_v52 = vadd.f32 %v3056_v54, %v5739_v46  ;;  %v3089_v24 = vadd.f32 %v3057_v1, %v3025_v34 }
 0x2af   : > { %3108 = vst.msk [vmem:[%s5659_s16 + $0x48] sm:$0xff] %vm582_vm1, %v3076_v40  ;;  %3109 = vst.msk [vmem:[%s5659_s16 + $0x50] sm:$0xff] %vm582_vm1, %v3077_v61  ;;  %v3090_v19 = vadd.f32 %v3058_v7, %v5746_v23  ;;  %v3091_v5 = vadd.f32 %v3059_v26, %v5749_v42  ;;  %v3092_v30 = vadd.f32 %v3060_v20, %v5752_v0 }
 0x2b0   : > { %3110 = vst.msk [vmem:[%s5659_s16 + $0x58] sm:$0xff] %vm582_vm1, %v3078_v2  ;;  %3111 = vst.msk [vmem:[%s5659_s16 + $0x60] sm:$0xff] %vm582_vm1, %v3079_v22  ;;  %v3093_v8 = vadd.f32 %v3061_v28, %v5758_v39  ;;  %v3094_v9 = vadd.f32 %v3062_v21, %v5761_v32  ;;  %v3095_v63 = vadd.f32 %v3063_v49, %v5764_v13 }
 0x2b1   : > { %3112 = vst.msk [vmem:[%s5659_s16 + $0x68] sm:$0xff] %vm582_vm1, %v3080_v45  ;;  %3113 = vst.msk [vmem:[%s5659_s16 + $0x70] sm:$0xff] %vm582_vm1, %v3081_v44  ;;  %v3097_v48 = vadd.f32 %v3065_v56, %v5767_v55  ;;  %v3098_v10 = vadd.f32 %v3066_v59, %v5773_v35 }
 0x2b2   : > { %3114 = vst.msk [vmem:[%s5659_s16 + $0x78] sm:$0xff] %vm582_vm1, %v3082_v11  ;;  %3115 = vst.msk [vmem:[%s5659_s16 + $0x80] sm:$0xff] %vm582_vm1, %v3083_v6 }
 0x2b3   : > { %3116 = vst.msk [vmem:[%s5659_s16 + $0x88] sm:$0xff] %vm582_vm1, %v3084_v47  ;;  %3117 = vst.msk [vmem:[%s5659_s16 + $0x90] sm:$0xff] %vm582_vm1, %v3085_v12 }
 0x2b4   : > { %3118 = vst.msk [vmem:[%s5659_s16 + $0x98] sm:$0xff] %vm582_vm1, %v3086_v60  ;;  %3119 = vst.msk [vmem:[%s5659_s16 + $0xa0] sm:$0xff] %vm582_vm1, %v3087_v57 }
 0x2b5   : > { %3120 = vst.msk [vmem:[%s5659_s16 + $0xa8] sm:$0xff] %vm582_vm1, %v3088_v52  ;;  %3121 = vst.msk [vmem:[%s5659_s16 + $0xb0] sm:$0xff] %vm582_vm1, %v3089_v24 }
 0x2b6   : > { %3122 = vst.msk [vmem:[%s5659_s16 + $0xb8] sm:$0xff] %vm582_vm1, %v3090_v19  ;;  %3123 = vst.msk [vmem:[%s5659_s16 + $0xc0] sm:$0xff] %vm582_vm1, %v3091_v5 }
 0x2b7   : > { %3124 = vst.msk [vmem:[%s5659_s16 + $0xc8] sm:$0xff] %vm582_vm1, %v3092_v30  ;;  %3125 = vst.msk [vmem:[%s5659_s16 + $0xd0] sm:$0xff] %vm582_vm1, %v3093_v8 }
 0x2b8   : > { %3126 = vst.msk [vmem:[%s5659_s16 + $0xd8] sm:$0xff] %vm582_vm1, %v3094_v9  ;;  %3127 = vst.msk [vmem:[%s5659_s16 + $0xe0] sm:$0xff] %vm582_vm1, %v3095_v63 }
 0x2b9   : > { %3129 = vst.msk [vmem:[%s5659_s16 + $0xf0] sm:$0xff] %vm582_vm1, %v3097_v48  ;;  %3130 = vst.msk [vmem:[%s5659_s16 + $0xf8] sm:$0xff] %vm582_vm1, %v3098_v10 }
 0x2ba   : > { %4327 = shalt.err (!%p4324_p5)
}
 0x2bb   : > { %s4328_s29 = scalar_lea.hbm %s5842_s27, 4096  ;;  %s4332_s14 = scalar_lea.hbm %s5929_s5, 8192 }
 0x2bc   : > { %p4329_p6 = scmp.ne.s32.totalorder %s5842_s27, %s4328_s29  ;;  %p4333_p10 = scmp.lt.u32.totalorder %s5842_s27, %s5929_s5 }
 0x2bd   : > { %p4334_p11 = scmp.lt.u32.totalorder %s4332_s14, %s4328_s29  ;;  %p4336_p13 = scmp.lt.u32.totalorder %s4328_s29, %s5842_s27 }
 0x2be   : > { %p4330_p7 = pnand %p4329_p6, %p4467_p4 }
 0x2bf   : > { %p4335_p12 = por %p4334_p11, %p4333_p10 }
 0x2c0   : > { %p4331_p9 = pneg %p4330_p7 }
 0x2c1   : > { %p4337_p0 = por %p4336_p13, %p4335_p12 }
 0x2c3   : > { %p4338_p1 = pnand %p4337_p0, %p4331_p9 }
 0x2c5   : > { %4341 = shalt.err (!%p4338_p1)
}
 0x2c6   : > { %s4395_s17 = smov 128   ;;  %s4396_s8 = smov 8  }
 0x2c7   : > { %4237 = dma.vmem_to_hbm [thread:$0]  (%p4467_p4), %s5846_s24, 4096, %s5842_s27, %s5878_s21, %s4395_s17, %s4395_s17, %s4396_s8  }
 0x2c8 PF: > { %p4243_p2 = scmp.ge.s32.totalorder %s4392_s23, 2  ;;  %s3161_s25 = sand.u32 1, %s4372_s18  }
 0x2c9   : > { %s3162_s7 = scalar_lea.sflag [#allocation3], %s3161_s25 }
 0x2ca   : > { %p4240_p3 = pnand %p4243_p2, %p4474_p8 }
 0x2cc   : > { %4367 = dma.done.wait (!%p4240_p3), %s3162_s7, 4096  }
 0x2cd   : > { %4369 = vsyncadd (!%p4240_p3), %s3162_s7, 4294963200  ;;  %s18_s23 = sadd.s32 1, %s4392_s23   ;;  %s5993_s18 = smov %s4376_s19 }
 0x2ce   : > { %p15_p5 = scmp.ge.s32.totalorder %s18_s23, 4   ;;  %s5994_s19 = smov %s4380_s20 }
 0x2cf   : > { %s5995_s20 = smov %s4480_s6  ;;  %s5996_s21 = smov %s4388_s22 }
 0x2d0   : > { %s5997_s22 = smov %s5999_s26  ;;  %17 = sbr.rel (!%p15_p5) target bundleno = 4 (0x4), region = 95 }
 0x2d7   :  { %3167 = vsyncpa [#allocation3], 1 }
 0x2d8   :  { %3169 = vsyncpa [#allocation3 + $0x1], 1 }

</bundles_post_ra>
